<compile_context>
chip_gen: v7x
topology: tpu7x:2x2x1
jax: 0.10.0
libtpu: 0.0.40
codegen_flags: <defaults>
</compile_context>

<pallas_src>
import math

import numpy as np
import jax
import jax.numpy as jnp
from jax import lax
from jax.experimental import pallas as pl
from jax.experimental.pallas import tpu as pltpu


# ---------------------------------------------------------------------------
# Helpers
# ---------------------------------------------------------------------------
def _elu(x):
    # ELU(alpha=1) with ONE transcendental; exp arg clamped so the untaken branch
    # stays finite for large positive x.  (exp(x)-1 vs expm1(x): abs err ~1e-7,
    # irrelevant at the comparison tolerance.)
    return jnp.where(x > 0, x, jnp.exp(jnp.minimum(x, 0.0)) - 1.0)


def encoder_layout(p, k=6, s=4):
    """Integer replica of the Encoder.__init__ while-loop.

    Returns ([(L_in, L_out), ...] per conv layer, final length L)."""
    L = p
    conv_dims = []
    while L > 32:
        Lout = (L - k) // s + 1          # == int((L - (k-1) - 1)/s + 1)
        conv_dims.append((L, Lout))
        L = Lout
    return conv_dims, L


# ---------------------------------------------------------------------------
# Fused Pallas kernel: the whole Encoder is matmul -> +bias -> ELU chains
# ---------------------------------------------------------------------------
def _make_encoder_kernel(n_conv):
    def kernel(*refs):
        x_ref = refs[0]
        conv_refs = refs[1:1 + 2 * n_conv]          # (K_0, bias_0, K_1, bias_1, ...)
        w1_ref, b1_ref, w2_ref, b2_ref, o_ref = refs[1 + 2 * n_conv:]

        # (Bt, L0*d): (position, channel)-flattened activations, lane-dense.
        a = x_ref[0]

        # Conv1d(+bias)+ELU stages: one MXU matmul each (conv folded into kmat).
        for li in range(n_conv):
            kmat = conv_refs[2 * li][...]           # (Lin*d, Lout*d)
            bias = conv_refs[2 * li + 1][...]       # (1, Lout*d)
            a = _elu(jnp.dot(a, kmat, preferred_element_type=jnp.float32) + bias)

        # MLP head: Linear(Lf*d, 32) -> ELU -> Linear(32, r), single dots.
        h = _elu(jnp.dot(a, w1_ref[...], preferred_element_type=jnp.float32)
                 + b1_ref[...])
        out = jnp.dot(h, w2_ref[...], preferred_element_type=jnp.float32) + b2_ref[...]
        o_ref[0] = out.astype(o_ref.dtype)

    return kernel


# ---------------------------------------------------------------------------
# Parameters (mirrors the PyTorch __init__) and one-time weight preparation
# ---------------------------------------------------------------------------
def init_encoder_params(key, p, d, r, k=6, s=4):
    conv_dims, Lf = encoder_layout(p, k, s)
    params = {"conv": [], "k": k, "s": s, "p": p, "d": d, "r": r, "Lf": Lf}
    for _ in conv_dims:
        key, kw, kb = jax.random.split(key, 3)
        bound = 1.0 / math.sqrt(d * k)
        w = jax.random.uniform(kw, (d, d, k), jnp.float32, -bound, bound)  # (Cout,Cin,K)
        b = jax.random.uniform(kb, (d,), jnp.float32, -bound, bound)
        params["conv"].append((w, b))
    key, k1w, k1b, k2w, k2b = jax.random.split(key, 5)
    fin = Lf * d
    bd1 = 1.0 / math.sqrt(fin)
    params["lin1"] = (jax.random.uniform(k1w, (32, fin), jnp.float32, -bd1, bd1),
                      jax.random.uniform(k1b, (32,), jnp.float32, -bd1, bd1))
    bd2 = 1.0 / math.sqrt(32)
    params["lin2"] = (jax.random.uniform(k2w, (r, 32), jnp.float32, -bd2, bd2),
                      jax.random.uniform(k2b, (r,), jnp.float32, -bd2, bd2))
    return params


def prepare_encoder_params(params):
    """One-time weight re-layouts (hoisted out of the forward pass entirely):
       * each Conv1d is folded into a dense banded matrix that maps
         (position, channel)-flattened activations at input resolution directly to
         (position, channel)-flattened activations at OUTPUT resolution,
       * conv biases are tiled to the flattened output layout,
       * Linear-1's columns are permuted to absorb torch's channel-major flatten(1,2),
       * Linear-2 is transposed."""
    d, k, s, p, r, Lf = (params[key] for key in ("d", "k", "s", "p", "r", "Lf"))
    conv_dims, _ = encoder_layout(p, k, s)

    prep = {"convK": [], "convb": []}
    for (w, b), (lin, lout) in zip(params["conv"], conv_dims):
        w_np = np.asarray(w)                               # (Cout, Cin, K)
        kmat = np.zeros((lin * d, lout * d), np.float32)
        for l in range(lout):
            for kk in range(k):
                t = s * l + kk
                # kmat[t*d + ci, l*d + co] = w[co, ci, kk]
                kmat[t * d:(t + 1) * d, l * d:(l + 1) * d] = w_np[:, :, kk].T
        prep["convK"].append(jnp.asarray(kmat))
        bias_flat = np.tile(np.asarray(b, np.float32), lout)       # [l*d + co] = b[co]
        prep["convb"].append(jnp.asarray(bias_flat.reshape(1, lout * d)))

    w1, b1 = params["lin1"]
    # w1p[l*d + c, j] = W1[j, c*Lf + l]   (torch flatten(1,2) is channel-major)
    w1p = np.asarray(w1).reshape(32, d, Lf).transpose(2, 1, 0).reshape(Lf * d, 32)
    prep["w1p"] = jnp.asarray(np.ascontiguousarray(w1p))
    prep["b1"] = jnp.asarray(np.asarray(b1).reshape(1, 32))

    w2, b2 = params["lin2"]
    prep["w2t"] = jnp.asarray(np.ascontiguousarray(np.asarray(w2).T))   # (32, r)
    prep["b2"] = jnp.asarray(np.asarray(b2).reshape(1, r))
    return prep


# ---------------------------------------------------------------------------
# Forward-pass builder: one fused pallas_call, batch-blocked grid
# ---------------------------------------------------------------------------
def build_encoder_forward(p, d, r, k=6, s=4, bt_max=8):
    conv_dims, Lf = encoder_layout(p, k, s)
    n_conv = len(conv_dims)
    kernel = _make_encoder_kernel(n_conv)

    @jax.jit
    def forward(f_in, prep):
        B = f_in.shape[0]
        # Bt samples per grid step: fills the matmul M dimension and amortizes the
        # ~0.35 us per-step overhead; keep >= 2 grid steps when possible so both
        # v7x TensorCores get work (Bt <= B/2).  On v5e/v6e the grid is just a loop.
        bt = max(1, min(bt_max, B // 2))
        g = -(-B // bt)
        b_pad = g * bt

        # Free row-major flatten to the (position, channel) layout — no transpose.
        x = f_in.reshape(B, p * d).astype(jnp.float32)
        if b_pad != B:
            x = jnp.pad(x, ((0, b_pad - B), (0, 0)))
        x = x.reshape(g, bt, p * d)

        args = [x]
        in_specs = [pl.BlockSpec((1, bt, p * d), lambda i: (i, 0, 0))]
        for li, (lin, lout) in enumerate(conv_dims):
            args += [prep["convK"][li], prep["convb"][li]]
            in_specs += [
                pl.BlockSpec((lin * d, lout * d), lambda i: (0, 0)),   # resident weights
                pl.BlockSpec((1, lout * d), lambda i: (0, 0)),
            ]
        args += [prep["w1p"], prep["b1"], prep["w2t"], prep["b2"]]
        in_specs += [
            pl.BlockSpec((Lf * d, 32), lambda i: (0, 0)),
            pl.BlockSpec((1, 32), lambda i: (0, 0)),
            pl.BlockSpec((32, r), lambda i: (0, 0)),
            pl.BlockSpec((1, r), lambda i: (0, 0)),
        ]

        out = pl.pallas_call(
            kernel,
            out_shape=jax.ShapeDtypeStruct((g, bt, r), jnp.float32),
            grid=(g,),
            in_specs=in_specs,
            out_specs=pl.BlockSpec((1, bt, r), lambda i: (i, 0, 0)),
            compiler_params=pltpu.CompilerParams(
                dimension_semantics=("parallel",)),    # v7x: 2 TCs split the batch
        )(*args)
        return out.reshape(b_pad, r)[:B]

    return forward


# ---------------------------------------------------------------------------
# Pure-JAX reference (PyTorch-equivalent numerics) for the correctness check
# ---------------------------------------------------------------------------
def encoder_reference(f_in, params):
    s = params["s"]
    x = jnp.swapaxes(f_in, 1, 2)
    for (w, b) in params["conv"]:
        x = lax.conv_general_dilated(x, w, window_strides=(s,), padding="VALID",
                                     dimension_numbers=("NCH", "OIH", "NCH"))
        x = x + b[None, :, None]
        x = jnp.where(x > 0, x, jnp.expm1(x))
    x = x.reshape(x.shape[0], -1)
    w1, b1 = params["lin1"]
    w2, b2 = params["lin2"]
    h = x @ w1.T + b1
    h = jnp.where(h > 0, h, jnp.expm1(h))
    return h @ w2.T + b2


# ---------------------------------------------------------------------------
if __name__ == "__main__":
    # p=512, d=4 -> two Conv1d(4, 4, 6, stride=4) layers, final length 31; r=8.
    B, p, d, r = 2, 512, 4, 8
    key = jax.random.PRNGKey(0)
    key, kx, kp = jax.random.split(key, 3)

    params = init_encoder_params(kp, p, d, r)
    prep = prepare_encoder_params(params)              # hoisted weight re-layouts
    f_in = jax.random.normal(kx, (B, p, d), jnp.float32)

    forward = build_encoder_forward(p, d, r)
    out = jax.block_until_ready(forward(f_in, prep))

    ref = jax.block_until_ready(encoder_reference(f_in, params))
    assert out.shape == (B, r), out.shape
    err = jnp.max(jnp.abs(out - ref))
    # 1e-2 tolerance: the kernel runs every contraction on the MXU at default f32
    # pass-precision while the XLA reference uses its own conv/matmul passes; any
    # structural bug produces errors orders of magnitude larger than this.
    assert jnp.allclose(out, ref, atol=1e-2, rtol=1e-2), f"max abs diff {err}"
    print("KERNEL_OK")
</pallas_src>

<mosaic_0001>
module attributes {stable_mosaic.version = 11 : i64} {
  func.func @kernel(%arg0: i32, %arg1: memref<1x1x2048xf32, #tpu.memory_space<vmem>>, %arg2: memref<2048x508xf32, #tpu.memory_space<vmem>>, %arg3: memref<1x508xf32, #tpu.memory_space<vmem>>, %arg4: memref<508x124xf32, #tpu.memory_space<vmem>>, %arg5: memref<1x124xf32, #tpu.memory_space<vmem>>, %arg6: memref<124x32xf32, #tpu.memory_space<vmem>>, %arg7: memref<1x32xf32, #tpu.memory_space<vmem>>, %arg8: memref<32x8xf32, #tpu.memory_space<vmem>>, %arg9: memref<1x8xf32, #tpu.memory_space<vmem>>, %arg10: memref<1x1x8xf32, #tpu.memory_space<vmem>>) attributes {dimension_semantics = [#tpu.dimension_semantics<parallel>], iteration_bounds = array<i64: 2>, scalar_prefetch = 0 : i64, scratch_operands = 0 : i64, tpu.core_type = #tpu.core_type<tc>, window_params = [{transform_indices = @transform_0, window_bounds = array<i64: 1, 1, 2048>}, {pipeline_mode = #tpu.pipeline_mode<synchronous>, transform_indices = @transform_1, window_bounds = array<i64: 2048, 508>}, {pipeline_mode = #tpu.pipeline_mode<synchronous>, transform_indices = @transform_2, window_bounds = array<i64: 1, 508>}, {pipeline_mode = #tpu.pipeline_mode<synchronous>, transform_indices = @transform_3, window_bounds = array<i64: 508, 124>}, {pipeline_mode = #tpu.pipeline_mode<synchronous>, transform_indices = @transform_4, window_bounds = array<i64: 1, 124>}, {pipeline_mode = #tpu.pipeline_mode<synchronous>, transform_indices = @transform_5, window_bounds = array<i64: 124, 32>}, {pipeline_mode = #tpu.pipeline_mode<synchronous>, transform_indices = @transform_6, window_bounds = array<i64: 1, 32>}, {pipeline_mode = #tpu.pipeline_mode<synchronous>, transform_indices = @transform_7, window_bounds = array<i64: 32, 8>}, {pipeline_mode = #tpu.pipeline_mode<synchronous>, transform_indices = @transform_8, window_bounds = array<i64: 1, 8>}, {transform_indices = @transform_9, window_bounds = array<i64: 1, 1, 8>}]} {
    %c0 = arith.constant 0 : index
    %c0_0 = arith.constant 0 : index
    %c0_1 = arith.constant 0 : index
    %0 = vector.load %arg1[%c0, %c0_0, %c0_1] : memref<1x1x2048xf32, #tpu.memory_space<vmem>>, vector<1x1x2048xf32>
    %1 = vector.shape_cast %0 : vector<1x1x2048xf32> to vector<1x2048xf32>
    %c0_2 = arith.constant 0 : index
    %c0_3 = arith.constant 0 : index
    %2 = vector.load %arg2[%c0_2, %c0_3] : memref<2048x508xf32, #tpu.memory_space<vmem>>, vector<2048x508xf32>
    %c0_4 = arith.constant 0 : index
    %c0_5 = arith.constant 0 : index
    %3 = vector.load %arg3[%c0_4, %c0_5] : memref<1x508xf32, #tpu.memory_space<vmem>>, vector<1x508xf32>
    %cst = arith.constant dense<0.000000e+00> : vector<1x508xf32>
    %4 = tpu.matmul %1, %2, %cst {dimension_numbers = #tpu.dot_dimension_numbers<[1], [0], [0], [1], [0, 0, 1, 1], [], []>} : vector<1x2048xf32>, vector<2048x508xf32>, vector<1x508xf32> -> vector<1x508xf32>
    %5 = arith.addf %4, %3 : vector<1x508xf32>
    %cst_6 = arith.constant 0.000000e+00 : f32
    %6 = vector.broadcast %cst_6 : f32 to vector<1x508xf32>
    %7 = arith.cmpf ogt, %5, %6 : vector<1x508xf32>
    %cst_7 = arith.constant 0.000000e+00 : f32
    %8 = vector.broadcast %cst_7 : f32 to vector<1x508xf32>
    %9 = arith.minimumf %5, %8 : vector<1x508xf32>
    %10 = math.exp %9 : vector<1x508xf32>
    %cst_8 = arith.constant 1.000000e+00 : f32
    %11 = vector.broadcast %cst_8 : f32 to vector<1x508xf32>
    %12 = arith.subf %10, %11 : vector<1x508xf32>
    %13 = arith.select %7, %5, %12 : vector<1x508xi1>, vector<1x508xf32>
    %c0_9 = arith.constant 0 : index
    %c0_10 = arith.constant 0 : index
    %14 = vector.load %arg4[%c0_9, %c0_10] : memref<508x124xf32, #tpu.memory_space<vmem>>, vector<508x124xf32>
    %c0_11 = arith.constant 0 : index
    %c0_12 = arith.constant 0 : index
    %15 = vector.load %arg5[%c0_11, %c0_12] : memref<1x124xf32, #tpu.memory_space<vmem>>, vector<1x124xf32>
    %cst_13 = arith.constant dense<0.000000e+00> : vector<1x124xf32>
    %16 = tpu.matmul %13, %14, %cst_13 {dimension_numbers = #tpu.dot_dimension_numbers<[1], [0], [0], [1], [0, 0, 1, 1], [], []>} : vector<1x508xf32>, vector<508x124xf32>, vector<1x124xf32> -> vector<1x124xf32>
    %17 = arith.addf %16, %15 : vector<1x124xf32>
    %cst_14 = arith.constant 0.000000e+00 : f32
    %18 = vector.broadcast %cst_14 : f32 to vector<1x124xf32>
    %19 = arith.cmpf ogt, %17, %18 : vector<1x124xf32>
    %cst_15 = arith.constant 0.000000e+00 : f32
    %20 = vector.broadcast %cst_15 : f32 to vector<1x124xf32>
    %21 = arith.minimumf %17, %20 : vector<1x124xf32>
    %22 = math.exp %21 : vector<1x124xf32>
    %cst_16 = arith.constant 1.000000e+00 : f32
    %23 = vector.broadcast %cst_16 : f32 to vector<1x124xf32>
    %24 = arith.subf %22, %23 : vector<1x124xf32>
    %25 = arith.select %19, %17, %24 : vector<1x124xi1>, vector<1x124xf32>
    %c0_17 = arith.constant 0 : index
    %c0_18 = arith.constant 0 : index
    %26 = vector.load %arg6[%c0_17, %c0_18] : memref<124x32xf32, #tpu.memory_space<vmem>>, vector<124x32xf32>
    %cst_19 = arith.constant dense<0.000000e+00> : vector<1x32xf32>
    %27 = tpu.matmul %25, %26, %cst_19 {dimension_numbers = #tpu.dot_dimension_numbers<[1], [0], [0], [1], [0, 0, 1, 1], [], []>} : vector<1x124xf32>, vector<124x32xf32>, vector<1x32xf32> -> vector<1x32xf32>
    %c0_20 = arith.constant 0 : index
    %c0_21 = arith.constant 0 : index
    %28 = vector.load %arg7[%c0_20, %c0_21] : memref<1x32xf32, #tpu.memory_space<vmem>>, vector<1x32xf32>
    %29 = arith.addf %27, %28 : vector<1x32xf32>
    %cst_22 = arith.constant 0.000000e+00 : f32
    %30 = vector.broadcast %cst_22 : f32 to vector<1x32xf32>
    %31 = arith.cmpf ogt, %29, %30 : vector<1x32xf32>
    %cst_23 = arith.constant 0.000000e+00 : f32
    %32 = vector.broadcast %cst_23 : f32 to vector<1x32xf32>
    %33 = arith.minimumf %29, %32 : vector<1x32xf32>
    %34 = math.exp %33 : vector<1x32xf32>
    %cst_24 = arith.constant 1.000000e+00 : f32
    %35 = vector.broadcast %cst_24 : f32 to vector<1x32xf32>
    %36 = arith.subf %34, %35 : vector<1x32xf32>
    %37 = arith.select %31, %29, %36 : vector<1x32xi1>, vector<1x32xf32>
    %c0_25 = arith.constant 0 : index
    %c0_26 = arith.constant 0 : index
    %38 = vector.load %arg8[%c0_25, %c0_26] : memref<32x8xf32, #tpu.memory_space<vmem>>, vector<32x8xf32>
    %cst_27 = arith.constant dense<0.000000e+00> : vector<1x8xf32>
    %39 = tpu.matmul %37, %38, %cst_27 {dimension_numbers = #tpu.dot_dimension_numbers<[1], [0], [0], [1], [0, 0, 1, 1], [], []>} : vector<1x32xf32>, vector<32x8xf32>, vector<1x8xf32> -> vector<1x8xf32>
    %c0_28 = arith.constant 0 : index
    %c0_29 = arith.constant 0 : index
    %40 = vector.load %arg9[%c0_28, %c0_29] : memref<1x8xf32, #tpu.memory_space<vmem>>, vector<1x8xf32>
    %41 = arith.addf %39, %40 : vector<1x8xf32>
    %c0_30 = arith.constant 0 : index
    %c0_31 = arith.constant 0 : index
    %c0_32 = arith.constant 0 : index
    %42 = vector.load %arg10[%c0_30, %c0_31, %c0_32] : memref<1x1x8xf32, #tpu.memory_space<vmem>>, vector<1x1x8xf32>
    %43 = vector.shape_cast %42 : vector<1x1x8xf32> to vector<1x8xf32>
    %44 = vector.shape_cast %41 : vector<1x8xf32> to vector<1x1x8xf32>
    tpu.vector_store %arg10[%c0_30, %c0_31, %c0_32], %44 {strides = array<i32>} : memref<1x1x8xf32, #tpu.memory_space<vmem>>, vector<1x1x8xf32>,
    return
  }
  func.func @transform_0(%arg0: i32) -> (i32, i32, i32) {
    %c0_i32 = arith.constant 0 : i32
    %c0_i32_0 = arith.constant 0 : i32
    %c0_i32_1 = arith.constant 0 : i32
    return %arg0, %c0_i32, %c0_i32_0 : i32, i32, i32
  }
  func.func @transform_1(%arg0: i32) -> (i32, i32) {
    %c0_i32 = arith.constant 0 : i32
    %c0_i32_0 = arith.constant 0 : i32
    %c0_i32_1 = arith.constant 0 : i32
    return %c0_i32, %c0_i32_0 : i32, i32
  }
  func.func @transform_2(%arg0: i32) -> (i32, i32) {
    %c0_i32 = arith.constant 0 : i32
    %c0_i32_0 = arith.constant 0 : i32
    %c0_i32_1 = arith.constant 0 : i32
    return %c0_i32, %c0_i32_0 : i32, i32
  }
  func.func @transform_3(%arg0: i32) -> (i32, i32) {
    %c0_i32 = arith.constant 0 : i32
    %c0_i32_0 = arith.constant 0 : i32
    %c0_i32_1 = arith.constant 0 : i32
    return %c0_i32, %c0_i32_0 : i32, i32
  }
  func.func @transform_4(%arg0: i32) -> (i32, i32) {
    %c0_i32 = arith.constant 0 : i32
    %c0_i32_0 = arith.constant 0 : i32
    %c0_i32_1 = arith.constant 0 : i32
    return %c0_i32, %c0_i32_0 : i32, i32
  }
  func.func @transform_5(%arg0: i32) -> (i32, i32) {
    %c0_i32 = arith.constant 0 : i32
    %c0_i32_0 = arith.constant 0 : i32
    %c0_i32_1 = arith.constant 0 : i32
    return %c0_i32, %c0_i32_0 : i32, i32
  }
  func.func @transform_6(%arg0: i32) -> (i32, i32) {
    %c0_i32 = arith.constant 0 : i32
    %c0_i32_0 = arith.constant 0 : i32
    %c0_i32_1 = arith.constant 0 : i32
    return %c0_i32, %c0_i32_0 : i32, i32
  }
  func.func @transform_7(%arg0: i32) -> (i32, i32) {
    %c0_i32 = arith.constant 0 : i32
    %c0_i32_0 = arith.constant 0 : i32
    %c0_i32_1 = arith.constant 0 : i32
    return %c0_i32, %c0_i32_0 : i32, i32
  }
  func.func @transform_8(%arg0: i32) -> (i32, i32) {
    %c0_i32 = arith.constant 0 : i32
    %c0_i32_0 = arith.constant 0 : i32
    %c0_i32_1 = arith.constant 0 : i32
    return %c0_i32, %c0_i32_0 : i32, i32
  }
  func.func @transform_9(%arg0: i32) -> (i32, i32, i32) {
    %c0_i32 = arith.constant 0 : i32
    %c0_i32_0 = arith.constant 0 : i32
    %c0_i32_1 = arith.constant 0 : i32
    return %arg0, %c0_i32, %c0_i32_0 : i32, i32, i32
  }
}

</mosaic_0001>

<bundles_post_ra>
// kernel: forward.1
= control target key start
LH: loop header
LB: loop body
LE: loop exit
PB: predicated region body
PF: predicated region fallthrough
CT: control target
= control target key end

     0   :  { %s5411_s0 = inlined_call_operand.vmem [shape: f32[2,1,2048], index: 0, kind: input, shape index: {}]   ;;  %s5412_s1 = inlined_call_operand.hbm [shape: f32[2048,508], index: 1, kind: input, shape index: {}]   ;;  %s5413_s2 = inlined_call_operand.hbm [shape: f32[1,508], index: 2, kind: input, shape index: {}]   ;;  %s5414_s3 = inlined_call_operand.hbm [shape: f32[508,124], index: 3, kind: input, shape index: {}]   ;;  %s5415_s4 = inlined_call_operand.hbm [shape: f32[1,124], index: 4, kind: input, shape index: {}]   ;;  %s5416_s5 = inlined_call_operand.vmem [shape: f32[124,32], index: 5, kind: input, shape index: {}]   ;;  %s5417_s6 = inlined_call_operand.hbm [shape: f32[1,32], index: 6, kind: input, shape index: {}]   ;;  %s5418_s7 = inlined_call_operand.vmem [shape: f32[32,8], index: 7, kind: input, shape index: {}]   ;;  %s5419_s8 = inlined_call_operand.hbm [shape: f32[1,8], index: 8, kind: input, shape index: {}]   ;;  %s5420_s9 = inlined_call_operand.hbm [shape: f32[2,1,8], index: 9, kind: output, shape index: {}]  }
   0x1   :  { %5427 = sst [smem:[#allocation22_spill]] %s5413_s2 }
   0x2   :  { %5428 = sst [smem:[#allocation23_spill]] %s5415_s4 }
   0x3   :  { %14 = vsyncpa [#allocation3], 0 }
   0x4   :  { %15 = vsyncpa [#allocation6], 0 }
   0x5   :  { %16 = vsyncpa [#allocation9], 0 }
   0x6   :  { %17 = vsyncpa [#allocation12], 0 }
   0x7   :  { %18 = vsyncpa [#allocation4], 0 }
   0x8   :  { %20 = vsyncpa [#allocation4 + $0x1], 0  ;;  %s4981_s30 = smov 0   ;;  %s4983_s10 = smov 0  }
   0x9   :  { %s4985_s11 = smov 0   ;;  %s4987_s12 = smov 0  }
   0xa LB: > { %5429 = sst [smem:[#allocation19_spill]] %s4910_s11  ;;  %s5002_s13 = sadd.s32 4294967295, %s4914_s12   ;;  %s4914_s12 = sphi %s4987_s12, %s5452_s12   ;;  %s4910_s11 = sphi %s4985_s11, %s5454_s11   ;;  %s4906_s10 = sphi %s4983_s10, %s5456_s10   ;;  %s4902_s30 = sphi %s4981_s30, %s5455_s30  }
   0xb   : > { %s3224_s14 = sadd.s32 4294967294, %s4914_s12   ;;  %s5006_s15 = sadd.s32 1, %s4914_s12  }
   0xc   : > { %5430 = sst [smem:[#allocation20_spill]] %s5006_s15  ;;  %s227_s16 = sadd.s32 1, %s4910_s11 }
   0xd   : > { %s224_s17 = ssub.s32 %s4914_s12, %s5006_s15  ;;  %p237_p0 = scmp.ne.s32.totalorder %s4910_s11, %s4906_s10 }
   0xe   : > { %p225_p1 = scmp.eq.s32.totalorder %s224_s17, 0  ;;  %p238_p2 = scmp.eq.s32.totalorder %s5002_s13, 1 }
   0xf   : > { %p243_p3 = scmp.ne.s32.totalorder %s4906_s10, %s4902_s30  ;;  %p244_p4 = scmp.eq.s32.totalorder %s3224_s14, 1 }
  0x10   : > { %s5017_s18 = scalar_select %p225_p1, %s4910_s11, %s227_s16  }
  0x11   : > { %p5019_p5 = por %p238_p2, %p237_p0  ;;  %p5023_p6 = por %p244_p4, %p243_p3 }
  0x12   : > { %5431 = sst [smem:[#allocation21_spill]] %s5017_s18  ;;  %p3225_p7 = scmp.ge.s32.totalorder %s4914_s12, 1 }
  0x13   : > { %s5432_s19 = scalar_select %p5019_p5, 1, 0 }
  0x14   : > { %s5433_s20 = scalar_select %p5023_p6, 1, 0 }
  0x15   : > { %p251_p8 = scmp.lt.s32.totalorder %s4914_s12, 3  ;;  %p5421_p9 = scmp.eq.s32.totalorder %s5002_s13, 0 }
  0x16   : > { %s4916_s22 = smov [#allocation5]   ;;  %s4917_s24 = smov [#allocation8]  }
  0x17   : > { %p5030_p10 = pnand %p3225_p7, %p251_p8  ;;  %s277_s23 = sshll.u32 %s4916_s22, 4  ;;  %s278_s23 = int_to_ptr.vmem [resolvable:$true] %s277_s23 }
  0x18   : > { %s301_s25 = sshll.u32 %s4917_s24, 4  ;;  %s4918_s27 = smov [#allocation2]   ;;  %s5042_s25 = int_to_ptr.vmem [resolvable:$true] %s301_s25 }
  0x19   : > { %s5434_s21 = scalar_select %p5030_p10, 1, 0 }
  0x1a   : > { %p4571_p11 = pneg %p5030_p10  ;;  %s263_s28 = sshll.u32 %s4918_s27, 4  ;;  %s5044_s28 = int_to_ptr.vmem [resolvable:$true] %s263_s28 }
  0x1b   : > { %s5436_s2 = sld [smem:[#allocation22_spill]] }
  0x1c   : > { %p5038_p12 = pnand %p5421_p9, %p4571_p11 }
  0x1e   : > { %p5054_p0 = pneg %p5038_p12 }
  0x21   : > { %s4668_s16 = scalar_lea.hbm %s5436_s2, 64 }
  0x22   : > { %p4669_p13 = scmp.ne.s32.totalorder %s5436_s2, %s4668_s16  ;;  %p4675_p3 = scmp.lt.u32.totalorder %s4668_s16, %s5436_s2 }
  0x24   : > { %p4671_p1 = pnand %p5054_p0, %p4669_p13 }
  0x26   : > { %p4672_p2 = pneg %p4671_p1 }
  0x28   : > { %p4677_p4 = pnand %p4675_p3, %p4672_p2 }
  0x2a   : > { %4680 = shalt.err (!%p4677_p4)
}
  0x2b   : > { %s4681_s29 = scalar_lea.vmem %s278_s23, 64  ;;  %p4689_p9 = scmp.lt.s32.totalorder %s278_s23, %s278_s23 }
  0x2c   : > { %p4682_p7 = scmp.ne.s32.totalorder %s278_s23, %s4681_s29  ;;  %p4690_p6 = scmp.lt.s32.totalorder %s4681_s29, %s4681_s29 }
  0x2e   : > { %p4684_p8 = pnand %p4682_p7, %p5054_p0  ;;  %p4691_p5 = por %p4690_p6, %p4689_p9 }
  0x30   : > { %p4685_p11 = pneg %p4684_p8 }
  0x32   : > { %p4692_p10 = pnand %p4691_p5, %p4685_p11 }
  0x34   : > { %4695 = shalt.err (!%p4692_p10)
}
  0x35   : > { %4577 = dma.hbm_to_vmem [thread:$0]  (!%p5038_p12), %s5436_s2, 64, %s278_s23, [#allocation6]  }
  0x36   : > { %s5438_s4 = sld [smem:[#allocation23_spill]] }
  0x3c   : > { %s4696_s22 = scalar_lea.hbm %s5438_s4, 16 }
  0x3d   : > { %p4697_p13 = scmp.ne.s32.totalorder %s5438_s4, %s4696_s22  ;;  %p4703_p5 = scmp.lt.u32.totalorder %s4696_s22, %s5438_s4 }
  0x3f   : > { %p4699_p1 = pnand %p4697_p13, %p5054_p0 }
  0x41   : > { %p4700_p6 = pneg %p4699_p1 }
  0x43   : > { %p4705_p9 = pnand %p4703_p5, %p4700_p6 }
  0x45   : > { %4708 = shalt.err (!%p4705_p9)
}
  0x46   : > { %s4709_s23 = scalar_lea.vmem %s5042_s25, 16  ;;  %s4716_s11 = scalar_lea.vmem %s5042_s25, 32 }
  0x47   : > { %p4710_p10 = scmp.ne.s32.totalorder %s5042_s25, %s4709_s23  ;;  %p4717_p4 = scmp.lt.s32.totalorder %s5042_s25, %s5042_s25 }
  0x48   : > { %p4718_p7 = scmp.lt.s32.totalorder %s4716_s11, %s4709_s23 }
  0x49   : > { %p4712_p2 = pnand %p4710_p10, %p5054_p0 }
  0x4a   : > { %p4719_p8 = por %p4718_p7, %p4717_p4 }
  0x4b   : > { %p4713_p3 = pneg %p4712_p2 }
  0x4d   : > { %p4720_p11 = pnand %p4719_p8, %p4713_p3 }
  0x4f   : > { %4723 = shalt.err (!%p4720_p11)
}
  0x50   : > { %4583 = dma.hbm_to_vmem [thread:$0]  (!%p5038_p12), %s5438_s4, 16, %s5042_s25, [#allocation9]  }
  0x51   : > { %s4724_s16 = scalar_lea.hbm %s5412_s1, 131072 }
  0x52   : > { %p4725_p13 = scmp.ne.s32.totalorder %s5412_s1, %s4724_s16  ;;  %p4731_p5 = scmp.lt.u32.totalorder %s4724_s16, %s5412_s1 }
  0x54   : > { %p4727_p1 = pnand %p4725_p13, %p5054_p0 }
  0x56   : > { %p4728_p6 = pneg %p4727_p1 }
  0x58   : > { %p4733_p9 = pnand %p4731_p5, %p4728_p6 }
  0x5a   : > { %4736 = shalt.err (!%p4733_p9)
}
  0x5b   : > { %s4737_s25 = scalar_lea.vmem %s5044_s28, 131072  ;;  %p4745_p4 = scmp.lt.s32.totalorder %s5044_s28, %s5044_s28 }
  0x5c   : > { %p4738_p10 = scmp.ne.s32.totalorder %s5044_s28, %s4737_s25  ;;  %p4746_p7 = scmp.lt.s32.totalorder %s4737_s25, %s4737_s25 }
  0x5e   : > { %p4740_p2 = pnand %p4738_p10, %p5054_p0  ;;  %p4747_p8 = por %p4746_p7, %p4745_p4 }
  0x60   : > { %p4741_p3 = pneg %p4740_p2 }
  0x62   : > { %p4748_p11 = pnand %p4747_p8, %p4741_p3 }
  0x64   : > { %4751 = shalt.err (!%p4748_p11)
}
  0x65   : > { %s4919_s11 = smov 512   ;;  %s4920_s15 = smov 32  }
  0x66   : > { %4574 = dma.hbm_to_vmem [thread:$0]  (!%p5038_p12), %s5412_s1, 131072, %s5044_s28, [#allocation3], %s4919_s11, %s4919_s11, %s4920_s15  }
  0x67   : > { %s4921_s18 = smov [#allocation7]   ;;  %s4752_s29 = scalar_lea.hbm %s5414_s3, 8192 }
  0x68   : > { %s287_s16 = sshll.u32 %s4921_s18, 4  ;;  %p4753_p13 = scmp.ne.s32.totalorder %s5414_s3, %s4752_s29  ;;  %s288_s16 = int_to_ptr.vmem [resolvable:$true] %s287_s16 }
  0x69   : > { %p4759_p5 = scmp.lt.u32.totalorder %s4752_s29, %s5414_s3 }
  0x6a   : > { %p4755_p1 = pnand %p4753_p13, %p5054_p0 }
  0x6c   : > { %p4756_p6 = pneg %p4755_p1 }
  0x6e   : > { %p4761_p9 = pnand %p4759_p5, %p4756_p6 }
  0x70   : > { %4764 = shalt.err (!%p4761_p9)
}
  0x71   : > { %s4765_s28 = scalar_lea.vmem %s288_s16, 8192  ;;  %p4773_p4 = scmp.lt.s32.totalorder %s288_s16, %s288_s16 }
  0x72   : > { %p4766_p10 = scmp.ne.s32.totalorder %s288_s16, %s4765_s28  ;;  %p4774_p7 = scmp.lt.s32.totalorder %s4765_s28, %s4765_s28 }
  0x74   : > { %p4768_p2 = pnand %p4766_p10, %p5054_p0  ;;  %p4775_p8 = por %p4774_p7, %p4773_p4 }
  0x76   : > { %p4769_p3 = pneg %p4768_p2 }
  0x78   : > { %p4776_p11 = pnand %p4775_p8, %p4769_p3 }
  0x7a   : > { %4779 = shalt.err (!%p4776_p11)
}
  0x7b   : > { %s4922_s11 = smov 128   ;;  %s4923_s15 = smov 8  }
  0x7c   : > { %4580 = dma.hbm_to_vmem [thread:$0]  (!%p5038_p12), %s5414_s3, 8192, %s288_s16, [#allocation6], %s4922_s11, %s4922_s11, %s4923_s15  }
  0x7d   : > { %s4924_s14 = smov [#allocation10]   ;;  %s4925_s18 = smov [#allocation11]  }
  0x7e   : > { %s315_s17 = sshll.u32 %s4924_s14, 4  ;;  %s329_s22 = sshll.u32 %s4925_s18, 4  ;;  %s316_s17 = int_to_ptr.vmem [resolvable:$true] %s315_s17  ;;  %s5135_s22 = int_to_ptr.vmem [resolvable:$true] %s329_s22 }
  0x7f   : > { %s4780_s23 = scalar_lea.hbm %s5417_s6, 16 }
  0x80   : > { %p4781_p13 = scmp.ne.s32.totalorder %s5417_s6, %s4780_s23  ;;  %p4787_p5 = scmp.lt.u32.totalorder %s4780_s23, %s5417_s6 }
  0x82   : > { %p4783_p1 = pnand %p4781_p13, %p5054_p0 }
  0x84   : > { %p4784_p6 = pneg %p4783_p1 }
  0x86   : > { %p4789_p9 = pnand %p4787_p5, %p4784_p6 }
  0x88   : > { %4792 = shalt.err (!%p4789_p9)
}
  0x89   : > { %s4793_s11 = scalar_lea.vmem %s316_s17, 16  ;;  %s4800_s15 = scalar_lea.vmem %s316_s17, 32 }
  0x8a   : > { %p4794_p10 = scmp.ne.s32.totalorder %s316_s17, %s4793_s11  ;;  %p4801_p4 = scmp.lt.s32.totalorder %s316_s17, %s316_s17 }
  0x8b   : > { %p4802_p7 = scmp.lt.s32.totalorder %s4800_s15, %s4793_s11 }
  0x8c   : > { %p4796_p2 = pnand %p4794_p10, %p5054_p0 }
  0x8d   : > { %p4803_p8 = por %p4802_p7, %p4801_p4 }
  0x8e   : > { %p4797_p3 = pneg %p4796_p2 }
  0x90   : > { %p4804_p11 = pnand %p4803_p8, %p4797_p3 }
  0x92   : > { %4807 = shalt.err (!%p4804_p11)
}
  0x93   : > { %4586 = dma.hbm_to_vmem [thread:$0]  (!%p5038_p12), %s5417_s6, 16, %s316_s17, [#allocation9]  }
  0x94   : > { %s4808_s29 = scalar_lea.hbm %s5419_s8, 16 }
  0x95   : > { %p4809_p13 = scmp.ne.s32.totalorder %s5419_s8, %s4808_s29  ;;  %p4815_p5 = scmp.lt.u32.totalorder %s4808_s29, %s5419_s8 }
  0x97   : > { %p4811_p1 = pnand %p4809_p13, %p5054_p0 }
  0x99   : > { %p4812_p6 = pneg %p4811_p1 }
  0x9b   : > { %p4817_p9 = pnand %p4815_p5, %p4812_p6 }
  0x9d   : > { %4820 = shalt.err (!%p4817_p9)
}
  0x9e   : > { %s4821_s17 = scalar_lea.vmem %s5135_s22, 16  ;;  %s4828_s16 = scalar_lea.vmem %s5135_s22, 32 }
  0x9f   : > { %p4822_p10 = scmp.ne.s32.totalorder %s5135_s22, %s4821_s17  ;;  %p4829_p4 = scmp.lt.s32.totalorder %s5135_s22, %s5135_s22 }
  0xa0   : > { %p4830_p7 = scmp.lt.s32.totalorder %s4828_s16, %s4821_s17 }
  0xa1   : > { %p4824_p2 = pnand %p4822_p10, %p5054_p0 }
  0xa2   : > { %p4831_p8 = por %p4830_p7, %p4829_p4 }
  0xa3   : > { %p4825_p3 = pneg %p4824_p2 }
  0xa5   : > { %p4832_p11 = pnand %p4831_p8, %p4825_p3 }
  0xa7   : > { %4835 = shalt.err (!%p4832_p11)
}
  0xa8   : > { %4589 = dma.hbm_to_vmem [thread:$0]  (!%p5038_p12), %s5419_s8, 16, %s5135_s22, [#allocation12]  }
  0xa9   : > { %p5439_p13 = scmp.ne.s32.totalorder %s5434_s21, 0 }
  0xaa   : > { %p5440_p0 = scmp.eq.s32.totalorder (!%p5439_p13), %s5002_s13, 0 }
  0xab   : > { %349 = sbr.rel (%p5439_p13) target bundleno = 1636 (0x664), region = 56 }
  0xb2   : > { %4881 = dma.done.wait (%p5440_p0), [#allocation3], 131072   ;;  %p5441_p1 = pmov %p5440_p0 }
  0xb3   : > { %p5442_p6 = pmov %p5440_p0 }
  0xb4   : > { %4883 = vsyncadd (%p5441_p1), [#allocation3], 4294836224 }
  0xb5   : > { %4885 = dma.done.wait (%p5442_p6), [#allocation6], 8256   ;;  %p5443_p5 = pmov %p5440_p0 }
  0xb6   : > { %p5444_p9 = pmov %p5440_p0 }
  0xb7   : > { %4887 = vsyncadd (%p5443_p5), [#allocation6], 4294959040 }
  0xb8   : > { %4889 = dma.done.wait (%p5444_p9), [#allocation9], 32   ;;  %p5445_p12 = pmov %p5440_p0 }
  0xb9   : > { %p5446_p10 = pmov %p5440_p0 }
  0xba   : > { %4891 = vsyncadd (%p5445_p12), [#allocation9], 4294967264 }
  0xbb   : > { %4893 = dma.done.wait (%p5446_p10), [#allocation12], 16   ;;  %p5447_p2 = pmov %p5440_p0 }
  0xbc   : > { %v410_v0 = vld [vmem:[#allocation2 + $0x8] sm:$0xff]  ;;  %v412_v2 = vld [vmem:[#allocation2 + $0x18] sm:$0xff]  ;;  %v409_v5 = vld [vmem:[#allocation2] sm:$0xff]  ;;  %p403_p3 = scmp.lt.s32.totalorder %s5002_s13, 1  ;;  %vm2766_vm0 = vcmask 1043456   ;;  %vm4926_vm1 = vmmov 1  }
  0xbd   : > { %4895 = vsyncadd (%p5447_p2), [#allocation12], 4294967280  ;;  %v414_v1 = vld [vmem:[#allocation2 + $0x28] sm:$0xff]  ;;  %v416_v4 = vld [vmem:[#allocation2 + $0x38] sm:$0xff]  ;;  %vm2762_vm4 = vcmask 1014784   ;;  %vm4928_vm8 = vmmov 0  }
  0xbe   : > { %v3393_v3 = vpack.c.bf16 %v414_v1, %v410_v0  ;;  %v413_v6 = vld [vmem:[#allocation2 + $0x20] sm:$0xff]  ;;  %v3905_v7 = vpack.c.bf16 %v416_v4, %v412_v2  ;;  %v411_v9 = vld [vmem:[#allocation2 + $0x10] sm:$0xff]  ;;  %v418_v11 = vld [vmem:[#allocation2 + $0x48] sm:$0xff]  ;;  %s5201_s21 = scalar_select %p403_p3, %s5002_s13, 1  ;;  %vm3020_vm10 = vcmask 261120   ;;  %vm3094_vm12 = vcmask 57344  }
  0xbf   : > { %v3395_v8 = vpack.c.bf16 %v413_v6, %v409_v5  ;;  %v415_v10 = vld [vmem:[#allocation2 + $0x30] sm:$0xff]  ;;  %v422_v13 = vld [vmem:[#allocation2 + $0x68] sm:$0xff]  ;;  %v420_v14 = vld [vmem:[#allocation2 + $0x58] sm:$0xff]  ;;  %s401_s28 = sand.u32 1, %s4906_s10   ;;  %s3252_s2 = sshll.u32 %s5002_s13, 4 }
  0xc0   : > { %3394 = vmatprep.subr.bf16.mxu0 %v3393_v3  ;;  %v3907_v12 = vpack.c.bf16 %v415_v10, %v411_v9  ;;  %v424_v15 = vld [vmem:[#allocation2 + $0x78] sm:$0xff]  ;;  %3906 = vmatprep.subr.bf16.mxu1 %v3905_v7  ;;  %v3397_v16 = vpack.c.bf16 %v422_v13, %v418_v11  ;;  %v417_v18 = vld [vmem:[#allocation2 + $0x40] sm:$0xff]  ;;  %v419_v20 = vld [vmem:[#allocation2 + $0x50] sm:$0xff]  ;;  %s3240_s26 = sshll.u32 %s5201_s21, 4  ;;  %s402_s17 = scalar_lea.vmem [#allocation13], %s401_s28 }
  0xc1   : > { %3396 = vmatpush1.bf16.msra.mxu0 %v3395_v8  ;;  %v3909_v17 = vpack.c.bf16 %v424_v15, %v420_v14  ;;  %v421_v19 = vld [vmem:[#allocation2 + $0x60] sm:$0xff]  ;;  %v423_v22 = vld [vmem:[#allocation2 + $0x70] sm:$0xff]  ;;  %v426_v23 = vld [vmem:[#allocation2 + $0x88] sm:$0xff]  ;;  %s5209_s4 = scalar_lea.vmem %s5411_s0, %s3240_s26  ;;  %s3109_s16 = sshll.u32 %s402_s17, 4  ;;  %s5371_s16 = int_to_ptr.vmem [resolvable:$true] %s3109_s16 }
  0xc2   : > { %3908 = vmatpush1.bf16.msra.mxu1 %v3907_v12  ;;  %v3399_v21 = vpack.c.bf16 %v421_v19, %v417_v18  ;;  %v430_v24 = vld [vmem:[#allocation2 + $0xa8] sm:$0xff]  ;;  %3398 = vmatprep.subr.bf16.mxu0 %v3397_v16  ;;  %v3911_v25 = vpack.c.bf16 %v423_v22, %v419_v20  ;;  %v428_v27 = vld [vmem:[#allocation2 + $0x98] sm:$0xff]  ;;  %v425_v29 = vld [vmem:[#allocation2 + $0x80] sm:$0xff]  ;;  %s5369_s21 = scalar_lea.hbm %s5420_s9, %s3252_s2  ;;  %s3097_s26 = scalar_lea.sflag [#allocation4], %s401_s28 }
  0xc3   : > { %3910 = vmatprep.subr.bf16.mxu1 %v3909_v17  ;;  %v3401_v26 = vpack.c.bf16 %v430_v24, %v426_v23  ;;  %v432_v28 = vld [vmem:[#allocation2 + $0xb8] sm:$0xff]  ;;  %v429_v31 = vld [vmem:[#allocation2 + $0xa0] sm:$0xff]  ;;  %v427_v32 = vld [vmem:[#allocation2 + $0x90] sm:$0xff]  ;;  %s4836_s24 = scalar_lea.vmem %s5371_s16, 16  ;;  %p5450_p7 = scmp.ne.s32.totalorder %s5432_s19, 0 }
  0xc4   : > { %v3913_v30 = vpack.c.bf16 %v432_v28, %v428_v27  ;;  %v431_v33 = vld [vmem:[#allocation2 + $0xb0] sm:$0xff]  ;;  %v3403_v34 = vpack.c.bf16 %v429_v31, %v425_v29  ;;  %v434_v35 = vld [vmem:[#allocation2 + $0xc8] sm:$0xff]  ;;  %v436_v37 = vld [vmem:[#allocation2 + $0xd8] sm:$0xff]  ;;  %p4837_p4 = scmp.ne.s32.totalorder %s5371_s16, %s4836_s24  ;;  %s4930_s13 = smov [#allocation13]  }
  0xc5   : > { %3400 = vmatpush1.bf16.msra.mxu0 %v3399_v21  ;;  %v438_v36 = vld [vmem:[#allocation2 + $0xe8] sm:$0xff]  ;;  %v3915_v38 = vpack.c.bf16 %v431_v33, %v427_v32  ;;  %v440_v40 = vld [vmem:[#allocation2 + $0xf8] sm:$0xff]  ;;  %v433_v41 = vld [vmem:[#allocation2 + $0xc0] sm:$0xff]  ;;  %s4840_s22 = sshll.u32 %s4930_s13, 4  ;;  %s4841_s22 = int_to_ptr.vmem [resolvable:$false] %s4840_s22 }
  0xc6   : > { %3912 = vmatpush1.bf16.msra.mxu1 %v3911_v25  ;;  %3402 = vmatprep.subr.bf16.mxu0 %v3401_v26  ;;  %v3405_v39 = vpack.c.bf16 %v438_v36, %v434_v35  ;;  %v437_v42 = vld [vmem:[#allocation2 + $0xe0] sm:$0xff]  ;;  %v3917_v43 = vpack.c.bf16 %v440_v40, %v436_v37  ;;  %v435_v44 = vld [vmem:[#allocation2 + $0xd0] sm:$0xff]  ;;  %v442_v46 = vld [vmem:[#allocation2 + $0x108] sm:$0xff]  ;;  %p4838_p8 = pnand %p4837_p4, %p5450_p7  ;;  %p4843_p13 = scmp.lt.s32.totalorder %s5371_s16, %s4841_s22 }
  0xc7   : > { %3914 = vmatprep.subr.bf16.mxu1 %v3913_v30  ;;  %v439_v45 = vld [vmem:[#allocation2 + $0xf0] sm:$0xff]  ;;  %v446_v47 = vld [vmem:[#allocation2 + $0x128] sm:$0xff]  ;;  %v444_v48 = vld [vmem:[#allocation2 + $0x118] sm:$0xff]  ;;  %v3407_v50 = vpack.c.bf16 %v437_v42, %v433_v41 }
  0xc8   : > { %v448_v49 = vld [vmem:[#allocation2 + $0x138] sm:$0xff]  ;;  %v3919_v51 = vpack.c.bf16 %v439_v45, %v435_v44  ;;  %v3409_v52 = vpack.c.bf16 %v446_v47, %v442_v46  ;;  %v441_v53 = vld [vmem:[#allocation2 + $0x100] sm:$0xff]  ;;  %v443_v55 = vld [vmem:[#allocation2 + $0x110] sm:$0xff]  ;;  %v1436_v46 = vlaneseq  ;;  %p4839_p11 = pneg %p4838_p8 }
  0xc9   : > { %3404 = vmatpush1.bf16.msra.mxu0 %v3403_v34  ;;  %v445_v54 = vld [vmem:[#allocation2 + $0x120] sm:$0xff]  ;;  %v3921_v56 = vpack.c.bf16 %v448_v49, %v444_v48  ;;  %v447_v57 = vld [vmem:[#allocation2 + $0x130] sm:$0xff]  ;;  %v450_v58 = vld [vmem:[#allocation2 + $0x148] sm:$0xff] }
  0xca   : > { %3916 = vmatpush1.bf16.msra.mxu1 %v3915_v38  ;;  %3406 = vmatprep.subr.bf16.mxu0 %v3405_v39  ;;  %v454_v59 = vld [vmem:[#allocation2 + $0x168] sm:$0xff]  ;;  %v452_v60 = vld [vmem:[#allocation2 + $0x158] sm:$0xff]  ;;  %v3411_v62 = vpack.c.bf16 %v445_v54, %v441_v53  ;;  %v3923_v63 = vpack.c.bf16 %v447_v57, %v443_v55  ;;  %v449_v1 = vld [vmem:[#allocation2 + $0x140] sm:$0xff] }
  0xcb   : > { %3918 = vmatprep.subr.bf16.mxu1 %v3917_v43  ;;  %v456_v61 = vld [vmem:[#allocation2 + $0x178] sm:$0xff]  ;;  %v3413_v0 = vpack.c.bf16 %v454_v59, %v450_v58  ;;  %v453_v2 = vld [vmem:[#allocation2 + $0x160] sm:$0xff]  ;;  %v451_v3 = vld [vmem:[#allocation2 + $0x150] sm:$0xff]  ;;  %v5203_v59 = vshrl.u32 %v1436_v46, 7 }
  0xcc   : > { %v3925_v4 = vpack.c.bf16 %v456_v61, %v452_v60  ;;  %v455_v5 = vld [vmem:[#allocation2 + $0x170] sm:$0xff]  ;;  %v458_v6 = vld [vmem:[#allocation2 + $0x188] sm:$0xff]  ;;  %v460_v8 = vld [vmem:[#allocation2 + $0x198] sm:$0xff]  ;;  %v3415_v10 = vpack.c.bf16 %v453_v2, %v449_v1 }
  0xcd   : > { %3408 = vmatpush1.bf16.msra.mxu0 %v3407_v50  ;;  %v462_v7 = vld [vmem:[#allocation2 + $0x1a8] sm:$0xff]  ;;  %v464_v9 = vld [vmem:[#allocation2 + $0x1b8] sm:$0xff]  ;;  %v3927_v11 = vpack.c.bf16 %v455_v5, %v451_v3  ;;  %v457_v13 = vld [vmem:[#allocation2 + $0x180] sm:$0xff] }
  0xce   : > { %3920 = vmatpush1.bf16.msra.mxu1 %v3919_v51  ;;  %3410 = vmatprep.subr.bf16.mxu0 %v3409_v52  ;;  %v3417_v12 = vpack.c.bf16 %v462_v7, %v458_v6  ;;  %v461_v14 = vld [vmem:[#allocation2 + $0x1a0] sm:$0xff]  ;;  %v459_v15 = vld [vmem:[#allocation2 + $0x190] sm:$0xff]  ;;  %v3929_v16 = vpack.c.bf16 %v464_v9, %v460_v8  ;;  %v466_v18 = vld [vmem:[#allocation2 + $0x1c8] sm:$0xff]  ;;  %v5212_v8 = vsub.s32 1, %v5203_v59 }
  0xcf   : > { %3922 = vmatprep.subr.bf16.mxu1 %v3921_v56  ;;  %v463_v17 = vld [vmem:[#allocation2 + $0x1b0] sm:$0xff]  ;;  %v470_v19 = vld [vmem:[#allocation2 + $0x1e8] sm:$0xff]  ;;  %v468_v20 = vld [vmem:[#allocation2 + $0x1d8] sm:$0xff]  ;;  %v3419_v22 = vpack.c.bf16 %v461_v14, %v457_v13 }
  0xd0   : > { %v472_v21 = vld [vmem:[#allocation2 + $0x1f8] sm:$0xff]  ;;  %v3931_v23 = vpack.c.bf16 %v463_v17, %v459_v15  ;;  %v3421_v24 = vpack.c.bf16 %v470_v19, %v466_v18  ;;  %v465_v25 = vld [vmem:[#allocation2 + $0x1c0] sm:$0xff]  ;;  %v467_v27 = vld [vmem:[#allocation2 + $0x1d0] sm:$0xff] }
  0xd1   : > { %3412 = vmatpush1.bf16.msra.mxu0 %v3411_v62  ;;  %v469_v26 = vld [vmem:[#allocation2 + $0x1e0] sm:$0xff]  ;;  %v3933_v28 = vpack.c.bf16 %v472_v21, %v468_v20  ;;  %v471_v29 = vld [vmem:[#allocation2 + $0x1f0] sm:$0xff]  ;;  %v474_v30 = vld [vmem:[#allocation2 + $0x208] sm:$0xff] }
  0xd2   : > { %3924 = vmatpush1.bf16.msra.mxu1 %v3923_v63  ;;  %3414 = vmatprep.subr.bf16.mxu0 %v3413_v0  ;;  %v478_v31 = vld [vmem:[#allocation2 + $0x228] sm:$0xff]  ;;  %v476_v32 = vld [vmem:[#allocation2 + $0x218] sm:$0xff]  ;;  %v3423_v34 = vpack.c.bf16 %v469_v26, %v465_v25  ;;  %v3935_v35 = vpack.c.bf16 %v471_v29, %v467_v27  ;;  %v473_v37 = vld [vmem:[#allocation2 + $0x200] sm:$0xff] }
  0xd3   : > { %3926 = vmatprep.subr.bf16.mxu1 %v3925_v4  ;;  %v480_v33 = vld [vmem:[#allocation2 + $0x238] sm:$0xff]  ;;  %v3425_v36 = vpack.c.bf16 %v478_v31, %v474_v30  ;;  %v477_v38 = vld [vmem:[#allocation2 + $0x220] sm:$0xff]  ;;  %v475_v39 = vld [vmem:[#allocation2 + $0x210] sm:$0xff] }
  0xd4   : > { %v3937_v40 = vpack.c.bf16 %v480_v33, %v476_v32  ;;  %v479_v41 = vld [vmem:[#allocation2 + $0x230] sm:$0xff]  ;;  %v482_v42 = vld [vmem:[#allocation2 + $0x248] sm:$0xff]  ;;  %v484_v44 = vld [vmem:[#allocation2 + $0x258] sm:$0xff]  ;;  %v3427_v47 = vpack.c.bf16 %v477_v38, %v473_v37 }
  0xd5   : > { %3416 = vmatpush1.bf16.msra.mxu0 %v3415_v10  ;;  %v486_v43 = vld [vmem:[#allocation2 + $0x268] sm:$0xff]  ;;  %v488_v45 = vld [vmem:[#allocation2 + $0x278] sm:$0xff]  ;;  %v3939_v48 = vpack.c.bf16 %v479_v41, %v475_v39  ;;  %v481_v50 = vld [vmem:[#allocation2 + $0x240] sm:$0xff] }
  0xd6   : > { %3928 = vmatpush1.bf16.msra.mxu1 %v3927_v11  ;;  %3418 = vmatprep.subr.bf16.mxu0 %v3417_v12  ;;  %v3429_v49 = vpack.c.bf16 %v486_v43, %v482_v42  ;;  %v485_v51 = vld [vmem:[#allocation2 + $0x260] sm:$0xff]  ;;  %v483_v52 = vld [vmem:[#allocation2 + $0x250] sm:$0xff]  ;;  %v3941_v53 = vpack.c.bf16 %v488_v45, %v484_v44  ;;  %v490_v55 = vld [vmem:[#allocation2 + $0x288] sm:$0xff] }
  0xd7   : > { %3930 = vmatprep.subr.bf16.mxu1 %v3929_v16  ;;  %v487_v54 = vld [vmem:[#allocation2 + $0x270] sm:$0xff]  ;;  %v494_v56 = vld [vmem:[#allocation2 + $0x2a8] sm:$0xff]  ;;  %v492_v57 = vld [vmem:[#allocation2 + $0x298] sm:$0xff]  ;;  %v3431_v60 = vpack.c.bf16 %v485_v51, %v481_v50 }
  0xd8   : > { %v496_v58 = vld [vmem:[#allocation2 + $0x2b8] sm:$0xff]  ;;  %v3943_v61 = vpack.c.bf16 %v487_v54, %v483_v52  ;;  %v3433_v62 = vpack.c.bf16 %v494_v56, %v490_v55  ;;  %v489_v63 = vld [vmem:[#allocation2 + $0x280] sm:$0xff]  ;;  %v491_v1 = vld [vmem:[#allocation2 + $0x290] sm:$0xff] }
  0xd9   : > { %3420 = vmatpush1.bf16.msra.mxu0 %v3419_v22  ;;  %v493_v0 = vld [vmem:[#allocation2 + $0x2a0] sm:$0xff]  ;;  %v3945_v2 = vpack.c.bf16 %v496_v58, %v492_v57  ;;  %v495_v3 = vld [vmem:[#allocation2 + $0x2b0] sm:$0xff]  ;;  %v498_v4 = vld [vmem:[#allocation2 + $0x2c8] sm:$0xff] }
  0xda   : > { %3932 = vmatpush1.bf16.msra.mxu1 %v3931_v23  ;;  %3422 = vmatprep.subr.bf16.mxu0 %v3421_v24  ;;  %v502_v5 = vld [vmem:[#allocation2 + $0x2e8] sm:$0xff]  ;;  %v500_v6 = vld [vmem:[#allocation2 + $0x2d8] sm:$0xff]  ;;  %v3435_v9 = vpack.c.bf16 %v493_v0, %v489_v63  ;;  %v497_v10 = vld [vmem:[#allocation2 + $0x2c0] sm:$0xff]  ;;  %v3947_v11 = vpack.c.bf16 %v495_v3, %v491_v1 }
  0xdb   : > { %3934 = vmatprep.subr.bf16.mxu1 %v3933_v28  ;;  %v504_v7 = vld [vmem:[#allocation2 + $0x2f8] sm:$0xff]  ;;  %v3437_v12 = vpack.c.bf16 %v502_v5, %v498_v4  ;;  %v501_v13 = vld [vmem:[#allocation2 + $0x2e0] sm:$0xff]  ;;  %v499_v14 = vld [vmem:[#allocation2 + $0x2d0] sm:$0xff] }
  0xdc   : > { %v503_v15 = vld [vmem:[#allocation2 + $0x2f0] sm:$0xff]  ;;  %v3949_v16 = vpack.c.bf16 %v504_v7, %v500_v6  ;;  %v506_v17 = vld [vmem:[#allocation2 + $0x308] sm:$0xff]  ;;  %v5215_v19 = vld [vmem:[%s5209_s4] sm:$0xff]  ;;  %v3439_v23 = vpack.c.bf16 %v501_v13, %v497_v10 }
  0xdd   : > { %3424 = vmatpush1.bf16.msra.mxu0 %v3423_v34  ;;  %v510_v18 = vld [vmem:[#allocation2 + $0x328] sm:$0xff]  ;;  %v508_v20 = vld [vmem:[#allocation2 + $0x318] sm:$0xff]  ;;  %v1443_v22 = vrot.slane %v5215_v19, %v5212_v8  ;;  %v3951_v24 = vpack.c.bf16 %v503_v15, %v499_v14  ;;  %v505_v26 = vld [vmem:[#allocation2 + $0x300] sm:$0xff] }
  0xde   : > { %3936 = vmatpush1.bf16.msra.mxu1 %v3935_v35  ;;  %3426 = vmatprep.subr.bf16.mxu0 %v3425_v36  ;;  %v512_v21 = vld [vmem:[#allocation2 + $0x338] sm:$0xff]  ;;  %v3441_v25 = vpack.c.bf16 %v510_v18, %v506_v17  ;;  %v509_v27 = vld [vmem:[#allocation2 + $0x320] sm:$0xff]  ;;  %v507_v28 = vld [vmem:[#allocation2 + $0x310] sm:$0xff] }
  0xdf   : > { %3938 = vmatprep.subr.bf16.mxu1 %v3937_v40  ;;  %v3953_v29 = vpack.c.bf16 %v512_v21, %v508_v20  ;;  %v511_v30 = vld [vmem:[#allocation2 + $0x330] sm:$0xff]  ;;  %v514_v31 = vld [vmem:[#allocation2 + $0x348] sm:$0xff]  ;;  %1601 = vmatprep.mubr.f32.mxu0 %v1443_v22  ;;  %v516_v33 = vld [vmem:[#allocation2 + $0x358] sm:$0xff]  ;;  %v3443_v35 = vpack.c.bf16 %v509_v27, %v505_v26  ;;  %v5223_v21 = vsub.s32 3, %v5203_v59 }
  0xe0   : > { %v518_v32 = vld [vmem:[#allocation2 + $0x368] sm:$0xff]  ;;  %v520_v34 = vld [vmem:[#allocation2 + $0x378] sm:$0xff]  ;;  %2169 = vmatprep.mubr.f32.mxu1 %v1443_v22  ;;  %v3955_v36 = vpack.c.bf16 %v511_v30, %v507_v28  ;;  %v513_v38 = vld [vmem:[#allocation2 + $0x340] sm:$0xff] }
  0xe1   : > { %3428 = vmatpush1.bf16.msra.mxu0 %v3427_v47  ;;  %v3445_v37 = vpack.c.bf16 %v518_v32, %v514_v31  ;;  %v517_v39 = vld [vmem:[#allocation2 + $0x360] sm:$0xff]  ;;  %v515_v40 = vld [vmem:[#allocation2 + $0x350] sm:$0xff]  ;;  %v3957_v41 = vpack.c.bf16 %v520_v34, %v516_v33  ;;  %v522_v43 = vld [vmem:[#allocation2 + $0x388] sm:$0xff] }
  0xe2   : > { %3940 = vmatpush1.bf16.msra.mxu1 %v3939_v48  ;;  %3430 = vmatprep.subr.bf16.mxu0 %v3429_v49  ;;  %v519_v42 = vld [vmem:[#allocation2 + $0x370] sm:$0xff]  ;;  %v526_v44 = vld [vmem:[#allocation2 + $0x3a8] sm:$0xff]  ;;  %v524_v45 = vld [vmem:[#allocation2 + $0x398] sm:$0xff]  ;;  %v3447_v47 = vpack.c.bf16 %v517_v39, %v513_v38 }
  0xe3   : > { %3942 = vmatprep.subr.bf16.mxu1 %v3941_v53  ;;  %v528_v46 = vld [vmem:[#allocation2 + $0x3b8] sm:$0xff]  ;;  %v3959_v48 = vpack.c.bf16 %v519_v42, %v515_v40  ;;  %v3449_v49 = vpack.c.bf16 %v526_v44, %v522_v43  ;;  %v521_v50 = vld [vmem:[#allocation2 + $0x380] sm:$0xff]  ;;  %v523_v52 = vld [vmem:[#allocation2 + $0x390] sm:$0xff] }
  0xe4   : > { %v525_v51 = vld [vmem:[#allocation2 + $0x3a0] sm:$0xff]  ;;  %v3961_v53 = vpack.c.bf16 %v528_v46, %v524_v45  ;;  %v527_v54 = vld [vmem:[#allocation2 + $0x3b0] sm:$0xff]  ;;  %v530_v55 = vld [vmem:[#allocation2 + $0x3c8] sm:$0xff] }
  0xe5   : > { %3432 = vmatpush1.bf16.msra.mxu0 %v3431_v60  ;;  %v534_v56 = vld [vmem:[#allocation2 + $0x3e8] sm:$0xff]  ;;  %v532_v57 = vld [vmem:[#allocation2 + $0x3d8] sm:$0xff]  ;;  %v3451_v60 = vpack.c.bf16 %v525_v51, %v521_v50  ;;  %v529_v63 = vld [vmem:[#allocation2 + $0x3c0] sm:$0xff] }
  0xe6   : > { %3944 = vmatpush1.bf16.msra.mxu1 %v3943_v61  ;;  %3434 = vmatprep.subr.bf16.mxu0 %v3433_v62  ;;  %v536_v58 = vld [vmem:[#allocation2 + $0x3f8] sm:$0xff]  ;;  %v3963_v61 = vpack.c.bf16 %v527_v54, %v523_v52  ;;  %v3453_v62 = vpack.c.bf16 %v534_v56, %v530_v55  ;;  %v533_v0 = vld [vmem:[#allocation2 + $0x3e0] sm:$0xff]  ;;  %v531_v1 = vld [vmem:[#allocation2 + $0x3d0] sm:$0xff] }
  0xe7   : > { %3946 = vmatprep.subr.bf16.mxu1 %v3945_v2  ;;  %v3965_v2 = vpack.c.bf16 %v536_v58, %v532_v57  ;;  %v535_v3 = vld [vmem:[#allocation2 + $0x3f0] sm:$0xff]  ;;  %v538_v4 = vld [vmem:[#allocation2 + $0x408] sm:$0xff]  ;;  %v540_v6 = vld [vmem:[#allocation2 + $0x418] sm:$0xff]  ;;  %v3455_v10 = vpack.c.bf16 %v533_v0, %v529_v63 }
  0xe8   : > { %v542_v5 = vld [vmem:[#allocation2 + $0x428] sm:$0xff]  ;;  %v544_v7 = vld [vmem:[#allocation2 + $0x438] sm:$0xff]  ;;  %v537_v13 = vld [vmem:[#allocation2 + $0x400] sm:$0xff] }
  0xe9   : > { %3436 = vmatpush1.bf16.msra.mxu0 %v3435_v9  ;;  %v5220_v9 = vsub.s32 0, %v5203_v59  ;;  %v541_v14 = vld [vmem:[#allocation2 + $0x420] sm:$0xff]  ;;  %v539_v15 = vld [vmem:[#allocation2 + $0x410] sm:$0xff]  ;;  %v546_v18 = vld [vmem:[#allocation2 + $0x448] sm:$0xff] }
  0xea   : > { %3948 = vmatpush1.bf16.msra.mxu1 %v3947_v11  ;;  %3438 = vmatprep.subr.bf16.mxu0 %v3437_v12  ;;  %v3967_v11 = vpack.c.bf16 %v535_v3, %v531_v1  ;;  %v3457_v12 = vpack.c.bf16 %v542_v5, %v538_v4  ;;  %v543_v17 = vld [vmem:[#allocation2 + $0x430] sm:$0xff]  ;;  %v550_v20 = vld [vmem:[#allocation2 + $0x468] sm:$0xff]  ;;  %v545_v28 = vld [vmem:[#allocation2 + $0x440] sm:$0xff] }
  0xeb   : > { %3950 = vmatprep.subr.bf16.mxu1 %v3949_v16  ;;  %v3969_v16 = vpack.c.bf16 %v544_v7, %v540_v6  ;;  %v1439_v22 = vrot.slane %v5215_v19, %v5220_v9  ;;  %v3971_v26 = vpack.c.bf16 %v543_v17, %v539_v15  ;;  %v3461_v27 = vpack.c.bf16 %v550_v20, %v546_v18  ;;  %v547_v30 = vld [vmem:[#allocation2 + $0x450] sm:$0xff]  ;;  %v554_v33 = vld [vmem:[#allocation2 + $0x488] sm:$0xff]  ;;  %v557_v42 = vld [vmem:[#allocation2 + $0x4a0] sm:$0xff] }
  0xec   : > { %v551_v32 = vld [vmem:[#allocation2 + $0x470] sm:$0xff]  ;;  %v558_v34 = vld [vmem:[#allocation2 + $0x4a8] sm:$0xff]  ;;  %v565_v54 = vld [vmem:[#allocation2 + $0x4e0] sm:$0xff] }
  0xed   : > { %3440 = vmatpush1.bf16.msra.mxu0 %v3439_v23  ;;  %v548_v23 = vld [vmem:[#allocation2 + $0x458] sm:$0xff]  ;;  %v3975_v39 = vpack.c.bf16 %v551_v32, %v547_v30  ;;  %v3465_v40 = vpack.c.bf16 %v558_v34, %v554_v33  ;;  %v555_v43 = vld [vmem:[#allocation2 + $0x490] sm:$0xff]  ;;  %v562_v46 = vld [vmem:[#allocation2 + $0x4c8] sm:$0xff] }
  0xee   : > { %3952 = vmatpush1.bf16.msra.mxu1 %v3951_v24  ;;  %3442 = vmatprep.subr.bf16.mxu0 %v3441_v25  ;;  %v552_v24 = vld [vmem:[#allocation2 + $0x478] sm:$0xff]  ;;  %v3459_v25 = vpack.c.bf16 %v541_v14, %v537_v13  ;;  %v559_v45 = vld [vmem:[#allocation2 + $0x4b0] sm:$0xff]  ;;  %v570_v58 = vld [vmem:[#allocation2 + $0x508] sm:$0xff] }
  0xef   : > { %3954 = vmatprep.subr.bf16.mxu1 %v3953_v29  ;;  %v549_v29 = vld [vmem:[#allocation2 + $0x460] sm:$0xff]  ;;  %v3973_v31 = vpack.c.bf16 %v552_v24, %v548_v23  ;;  %v3979_v51 = vpack.c.bf16 %v559_v45, %v555_v43  ;;  %v563_v55 = vld [vmem:[#allocation2 + $0x4d0] sm:$0xff]  ;;  %v578_v7 = vld [vmem:[#allocation2 + $0x548] sm:$0xff] }
  0xf0   : > { %v3463_v38 = vpack.c.bf16 %v549_v29, %v545_v28  ;;  %v567_v57 = vld [vmem:[#allocation2 + $0x4f0] sm:$0xff]  ;;  %v573_v3 = vld [vmem:[#allocation2 + $0x520] sm:$0xff]  ;;  %v586_v23 = vld [vmem:[#allocation2 + $0x588] sm:$0xff] }
  0xf1   : > { %3444 = vmatpush1.bf16.msra.mxu0 %v3443_v35  ;;  %v1451_v35 = vrot.slane %v5215_v19, %v5223_v21  ;;  %v3983_v0 = vpack.c.bf16 %v567_v57, %v563_v55  ;;  %v571_v4 = vld [vmem:[#allocation2 + $0x510] sm:$0xff]  ;;  %v581_v17 = vld [vmem:[#allocation2 + $0x560] sm:$0xff]  ;;  %v590_v24 = vld [vmem:[#allocation2 + $0x5a8] sm:$0xff] }
  0xf2   : > { %3956 = vmatpush1.bf16.msra.mxu1 %v3955_v36  ;;  %3446 = vmatprep.subr.bf16.mxu0 %v3445_v37  ;;  %v556_v36 = vld [vmem:[#allocation2 + $0x498] sm:$0xff]  ;;  %v575_v6 = vld [vmem:[#allocation2 + $0x530] sm:$0xff]  ;;  %v3481_v29 = vpack.c.bf16 %v590_v24, %v586_v23  ;;  %v585_v30 = vld [vmem:[#allocation2 + $0x580] sm:$0xff] }
  0xf3   : > { %3958 = vmatprep.subr.bf16.mxu1 %v3957_v41  ;;  %v560_v37 = vld [vmem:[#allocation2 + $0x4b8] sm:$0xff]  ;;  %v553_v41 = vld [vmem:[#allocation2 + $0x480] sm:$0xff]  ;;  %v3987_v14 = vpack.c.bf16 %v575_v6, %v571_v4  ;;  %v579_v18 = vld [vmem:[#allocation2 + $0x550] sm:$0xff] }
  0xf4   : > { %v3977_v44 = vpack.c.bf16 %v560_v37, %v556_v36  ;;  %v3467_v50 = vpack.c.bf16 %v557_v42, %v553_v41  ;;  %v587_v32 = vld [vmem:[#allocation2 + $0x590] sm:$0xff]  ;;  %v598_v36 = vld [vmem:[#allocation2 + $0x5e8] sm:$0xff]  ;;  %v596_v37 = vld [vmem:[#allocation2 + $0x5d8] sm:$0xff] }
  0xf5   : > { %3448 = vmatpush1.bf16.msra.mxu0 %v3447_v47  ;;  %v566_v47 = vld [vmem:[#allocation2 + $0x4e8] sm:$0xff]  ;;  %v591_v34 = vld [vmem:[#allocation2 + $0x5b0] sm:$0xff]  ;;  %v593_v42 = vld [vmem:[#allocation2 + $0x5c0] sm:$0xff] }
  0xf6   : > { %3960 = vmatpush1.bf16.msra.mxu1 %v3959_v48  ;;  %3450 = vmatprep.subr.bf16.mxu0 %v3449_v49  ;;  %v564_v48 = vld [vmem:[#allocation2 + $0x4d8] sm:$0xff]  ;;  %v3469_v52 = vpack.c.bf16 %v566_v47, %v562_v46  ;;  %v597_v43 = vld [vmem:[#allocation2 + $0x5e0] sm:$0xff]  ;;  %v599_v46 = vld [vmem:[#allocation2 + $0x5f0] sm:$0xff] }
  0xf7   : > { %3962 = vmatprep.subr.bf16.mxu1 %v3961_v53  ;;  %v568_v49 = vld [vmem:[#allocation2 + $0x4f8] sm:$0xff]  ;;  %v561_v53 = vld [vmem:[#allocation2 + $0x4c0] sm:$0xff]  ;;  %v602_v47 = vld [vmem:[#allocation2 + $0x608] sm:$0xff] }
  0xf8   : > { %v3981_v56 = vpack.c.bf16 %v568_v49, %v564_v48  ;;  %v3471_v63 = vpack.c.bf16 %v565_v54, %v561_v53  ;;  %v606_v48 = vld [vmem:[#allocation2 + $0x628] sm:$0xff]  ;;  %v604_v49 = vld [vmem:[#allocation2 + $0x618] sm:$0xff]  ;;  %v601_v54 = vld [vmem:[#allocation2 + $0x600] sm:$0xff] }
  0xf9   : > { %3452 = vmatpush1.bf16.msra.mxu0 %v3451_v60  ;;  %v574_v60 = vld [vmem:[#allocation2 + $0x528] sm:$0xff]  ;;  %v3489_v53 = vpack.c.bf16 %v606_v48, %v602_v47  ;;  %v605_v55 = vld [vmem:[#allocation2 + $0x620] sm:$0xff]  ;;  %v623_v23 = vld [vmem:[#allocation2 + $0x6b0] sm:$0xff] }
  0xfa   : > { %3964 = vmatpush1.bf16.msra.mxu1 %v3963_v61  ;;  %3454 = vmatprep.subr.bf16.mxu0 %v3453_v62  ;;  %v572_v61 = vld [vmem:[#allocation2 + $0x518] sm:$0xff]  ;;  %v3473_v1 = vpack.c.bf16 %v574_v60, %v570_v58  ;;  %v607_v58 = vld [vmem:[#allocation2 + $0x630] sm:$0xff]  ;;  %v610_v60 = vld [vmem:[#allocation2 + $0x648] sm:$0xff] }
  0xfb   : > { %3966 = vmatprep.subr.bf16.mxu1 %v3965_v2  ;;  %v576_v62 = vld [vmem:[#allocation2 + $0x538] sm:$0xff]  ;;  %v569_v2 = vld [vmem:[#allocation2 + $0x500] sm:$0xff]  ;;  %v626_v24 = vld [vmem:[#allocation2 + $0x6c8] sm:$0xff] }
  0xfc   : > { %v3985_v5 = vpack.c.bf16 %v576_v62, %v572_v61  ;;  %v3475_v13 = vpack.c.bf16 %v573_v3, %v569_v2  ;;  %v614_v61 = vld [vmem:[#allocation2 + $0x668] sm:$0xff]  ;;  %v612_v62 = vld [vmem:[#allocation2 + $0x658] sm:$0xff]  ;;  %v609_v3 = vld [vmem:[#allocation2 + $0x640] sm:$0xff] }
  0xfd   : > { %3456 = vmatpush1.bf16.msra.mxu0 %v3455_v10  ;;  %v582_v10 = vld [vmem:[#allocation2 + $0x568] sm:$0xff]  ;;  %v3493_v2 = vpack.c.bf16 %v614_v61, %v610_v60  ;;  %v613_v4 = vld [vmem:[#allocation2 + $0x660] sm:$0xff]  ;;  %v639_v47 = vld [vmem:[#allocation2 + $0x730] sm:$0xff] }
  0xfe   : > { %3968 = vmatpush1.bf16.msra.mxu1 %v3967_v11  ;;  %3458 = vmatprep.subr.bf16.mxu0 %v3457_v12  ;;  %v580_v11 = vld [vmem:[#allocation2 + $0x558] sm:$0xff]  ;;  %v3477_v15 = vpack.c.bf16 %v582_v10, %v578_v7  ;;  %v615_v7 = vld [vmem:[#allocation2 + $0x670] sm:$0xff]  ;;  %v618_v10 = vld [vmem:[#allocation2 + $0x688] sm:$0xff] }
  0xff   : > { %3970 = vmatprep.subr.bf16.mxu1 %v3969_v16  ;;  %v584_v12 = vld [vmem:[#allocation2 + $0x578] sm:$0xff]  ;;  %v577_v16 = vld [vmem:[#allocation2 + $0x540] sm:$0xff]  ;;  %v642_v48 = vld [vmem:[#allocation2 + $0x748] sm:$0xff] }
 0x100   : > { %1602 = vmatmul.mubr.f32.vlgmr.msra.gmra.mrb[0].mxu0 %v1439_v22  ;;  %v3989_v20 = vpack.c.bf16 %v584_v12, %v580_v11  ;;  %v622_v11 = vld [vmem:[#allocation2 + $0x6a8] sm:$0xff]  ;;  %v620_v12 = vld [vmem:[#allocation2 + $0x698] sm:$0xff]  ;;  %v647_v60 = vld [vmem:[#allocation2 + $0x770] sm:$0xff] }
 0x101   : > { %3460 = vmatpush1.bf16.msra.mxu0 %v3459_v25  ;;  %2170 = vmatmul.mubr.f32.vlgmr.msra.gmra.mrb[0].mxu1 %v1439_v22  ;;  %v583_v22 = vld [vmem:[#allocation2 + $0x570] sm:$0xff]  ;;  %v588_v25 = vld [vmem:[#allocation2 + $0x598] sm:$0xff]  ;;  %v650_v61 = vld [vmem:[#allocation2 + $0x788] sm:$0xff] }
 0x102   : > { %3972 = vmatpush1.bf16.msra.mxu1 %v3971_v26  ;;  %3462 = vmatprep.subr.bf16.mxu0 %v3461_v27  ;;  %v592_v26 = vld [vmem:[#allocation2 + $0x5b8] sm:$0xff]  ;;  %v3479_v27 = vpack.c.bf16 %v581_v17, %v577_v16  ;;  %v3991_v28 = vpack.c.bf16 %v583_v22, %v579_v18  ;;  %v3497_v16 = vpack.c.bf16 %v622_v11, %v618_v10  ;;  %v617_v17 = vld [vmem:[#allocation2 + $0x680] sm:$0xff]  ;;  %v655_v10 = vld [vmem:[#allocation2 + $0x7b0] sm:$0xff] }
 0x103   : > { %3974 = vmatprep.subr.bf16.mxu1 %v3973_v31  ;;  %1672 = vmatprep.mubr.f32.mxu0 %v1451_v35  ;;  %v589_v31 = vld [vmem:[#allocation2 + $0x5a0] sm:$0xff]  ;;  %v3993_v33 = vpack.c.bf16 %v592_v26, %v588_v25  ;;  %v630_v25 = vld [vmem:[#allocation2 + $0x6e8] sm:$0xff]  ;;  %v628_v26 = vld [vmem:[#allocation2 + $0x6d8] sm:$0xff] }
 0x104   : > { %2240 = vmatprep.mubr.f32.mxu1 %v1451_v35  ;;  %v594_v35 = vld [vmem:[#allocation2 + $0x5c8] sm:$0xff]  ;;  %v621_v18 = vld [vmem:[#allocation2 + $0x6a0] sm:$0xff]  ;;  %vm5280_vm2 = vmpackc.low %vm2766_vm0, %vm4926_vm1 }
 0x105   : > { %3464 = vmatpush1.bf16.msra.mxu0 %v3463_v38  ;;  %v600_v38 = vld [vmem:[#allocation2 + $0x5f8] sm:$0xff]  ;;  %v3485_v41 = vpack.c.bf16 %v598_v36, %v594_v35  ;;  %v631_v35 = vld [vmem:[#allocation2 + $0x6f0] sm:$0xff]  ;;  %v634_v36 = vld [vmem:[#allocation2 + $0x708] sm:$0xff] }
 0x106   : > { %3976 = vmatpush1.bf16.msra.mxu1 %v3975_v39  ;;  %3466 = vmatprep.subr.bf16.mxu0 %v3465_v40  ;;  %v3483_v39 = vpack.c.bf16 %v589_v31, %v585_v30  ;;  %v3995_v40 = vpack.c.bf16 %v591_v34, %v587_v32  ;;  %v3997_v45 = vpack.c.bf16 %v600_v38, %v596_v37  ;;  %v625_v31 = vld [vmem:[#allocation2 + $0x6c0] sm:$0xff]  ;;  %v638_v37 = vld [vmem:[#allocation2 + $0x728] sm:$0xff]  ;;  %v636_v38 = vld [vmem:[#allocation2 + $0x718] sm:$0xff] }
 0x107   : > { %3978 = vmatprep.subr.bf16.mxu1 %v3977_v44  ;;  %v595_v44 = vld [vmem:[#allocation2 + $0x5d0] sm:$0xff]  ;;  %v3501_v30 = vpack.c.bf16 %v630_v25, %v626_v24  ;;  %v629_v32 = vld [vmem:[#allocation2 + $0x6e0] sm:$0xff]  ;;  %v658_v11 = vld [vmem:[#allocation2 + $0x7c8] sm:$0xff] }
 0x108   : > { %v663_v24 = vld [vmem:[#allocation2 + $0x7f0] sm:$0xff]  ;;  %v666_v25 = vld [vmem:[#allocation2 + $0x808] sm:$0xff] }
 0x109   : > { %3468 = vmatpush1.bf16.msra.mxu0 %v3467_v50  ;;  %v608_v50 = vld [vmem:[#allocation2 + $0x638] sm:$0xff] }
 0x10a   : > { %3980 = vmatpush1.bf16.msra.mxu1 %v3979_v51  ;;  %3470 = vmatprep.subr.bf16.mxu0 %v3469_v52  ;;  %v3487_v51 = vpack.c.bf16 %v597_v43, %v593_v42  ;;  %v3999_v52 = vpack.c.bf16 %v599_v46, %v595_v44  ;;  %v4001_v57 = vpack.c.bf16 %v608_v50, %v604_v49  ;;  %v633_v43 = vld [vmem:[#allocation2 + $0x700] sm:$0xff]  ;;  %v646_v49 = vld [vmem:[#allocation2 + $0x768] sm:$0xff]  ;;  %v644_v50 = vld [vmem:[#allocation2 + $0x758] sm:$0xff] }
 0x10b   : > { %3982 = vmatprep.subr.bf16.mxu1 %v3981_v56  ;;  %v603_v56 = vld [vmem:[#allocation2 + $0x610] sm:$0xff]  ;;  %v3505_v42 = vpack.c.bf16 %v638_v37, %v634_v36  ;;  %v637_v44 = vld [vmem:[#allocation2 + $0x720] sm:$0xff] }
 0x10c   : > { %v671_v37 = vld [vmem:[#allocation2 + $0x830] sm:$0xff] }
 0x10d   : > { %3472 = vmatpush1.bf16.msra.mxu0 %v3471_v63  ;;  %v616_v63 = vld [vmem:[#allocation2 + $0x678] sm:$0xff] }
 0x10e   : > { %3984 = vmatpush1.bf16.msra.mxu1 %v3983_v0  ;;  %3474 = vmatprep.subr.bf16.mxu0 %v3473_v1  ;;  %v3491_v0 = vpack.c.bf16 %v605_v55, %v601_v54  ;;  %v4003_v1 = vpack.c.bf16 %v607_v58, %v603_v56  ;;  %v4005_v6 = vpack.c.bf16 %v616_v63, %v612_v62  ;;  %v641_v55 = vld [vmem:[#allocation2 + $0x740] sm:$0xff]  ;;  %v654_v62 = vld [vmem:[#allocation2 + $0x7a8] sm:$0xff]  ;;  %v652_v63 = vld [vmem:[#allocation2 + $0x798] sm:$0xff] }
 0x10f   : > { %3986 = vmatprep.subr.bf16.mxu1 %v3985_v5  ;;  %v611_v5 = vld [vmem:[#allocation2 + $0x650] sm:$0xff]  ;;  %v3509_v54 = vpack.c.bf16 %v646_v49, %v642_v48  ;;  %v645_v56 = vld [vmem:[#allocation2 + $0x760] sm:$0xff] }
 0x110   : > { %v677_v48 = vld [vmem:[#allocation2 + $0x860] sm:$0xff]  ;;  %v675_v49 = vld [vmem:[#allocation2 + $0x850] sm:$0xff] }
 0x111   : > { %3476 = vmatpush1.bf16.msra.mxu0 %v3475_v13  ;;  %v624_v13 = vld [vmem:[#allocation2 + $0x6b8] sm:$0xff] }
 0x112   : > { %3988 = vmatpush1.bf16.msra.mxu1 %v3987_v14  ;;  %3478 = vmatprep.subr.bf16.mxu0 %v3477_v15  ;;  %v3495_v14 = vpack.c.bf16 %v613_v4, %v609_v3  ;;  %v4007_v15 = vpack.c.bf16 %v615_v7, %v611_v5  ;;  %v4009_v22 = vpack.c.bf16 %v624_v13, %v620_v12  ;;  %v649_v4 = vld [vmem:[#allocation2 + $0x780] sm:$0xff]  ;;  %v662_v12 = vld [vmem:[#allocation2 + $0x7e8] sm:$0xff]  ;;  %v660_v13 = vld [vmem:[#allocation2 + $0x7d8] sm:$0xff] }
 0x113   : > { %3990 = vmatprep.subr.bf16.mxu1 %v3989_v20  ;;  %v619_v20 = vld [vmem:[#allocation2 + $0x690] sm:$0xff]  ;;  %v3513_v3 = vpack.c.bf16 %v654_v62, %v650_v61  ;;  %v653_v5 = vld [vmem:[#allocation2 + $0x7a0] sm:$0xff] }
 0x114   : > { %v681_v61 = vld [vmem:[#allocation2 + $0x880] sm:$0xff] }
 0x115   : > { %3480 = vmatpush1.bf16.msra.mxu0 %v3479_v27  ;;  %v632_v27 = vld [vmem:[#allocation2 + $0x6f8] sm:$0xff]  ;;  %v685_v62 = vld [vmem:[#allocation2 + $0x8a0] sm:$0xff] }
 0x116   : > { %3992 = vmatpush1.bf16.msra.mxu1 %v3991_v28  ;;  %3482 = vmatprep.subr.bf16.mxu0 %v3481_v29  ;;  %v3499_v28 = vpack.c.bf16 %v621_v18, %v617_v17  ;;  %v4011_v29 = vpack.c.bf16 %v623_v23, %v619_v20  ;;  %v4013_v34 = vpack.c.bf16 %v632_v27, %v628_v26  ;;  %v657_v18 = vld [vmem:[#allocation2 + $0x7c0] sm:$0xff]  ;;  %v670_v26 = vld [vmem:[#allocation2 + $0x828] sm:$0xff]  ;;  %v668_v27 = vld [vmem:[#allocation2 + $0x818] sm:$0xff] }
 0x117   : > { %3994 = vmatprep.subr.bf16.mxu1 %v3993_v33  ;;  %v627_v33 = vld [vmem:[#allocation2 + $0x6d0] sm:$0xff]  ;;  %v3517_v17 = vpack.c.bf16 %v662_v12, %v658_v11  ;;  %v661_v20 = vld [vmem:[#allocation2 + $0x7e0] sm:$0xff] }
 0x118   : > { %v693_v11 = vld [vmem:[#allocation2 + $0x8e0] sm:$0xff]  ;;  %v691_v12 = vld [vmem:[#allocation2 + $0x8d0] sm:$0xff] }
 0x119   : > { %3484 = vmatpush1.bf16.msra.mxu0 %v3483_v39  ;;  %v640_v39 = vld [vmem:[#allocation2 + $0x738] sm:$0xff] }
 0x11a   : > { %3996 = vmatpush1.bf16.msra.mxu1 %v3995_v40  ;;  %3486 = vmatprep.subr.bf16.mxu0 %v3485_v41  ;;  %v3503_v40 = vpack.c.bf16 %v629_v32, %v625_v31  ;;  %v4015_v41 = vpack.c.bf16 %v631_v35, %v627_v33  ;;  %v4017_v46 = vpack.c.bf16 %v640_v39, %v636_v38  ;;  %v665_v33 = vld [vmem:[#allocation2 + $0x800] sm:$0xff]  ;;  %v667_v35 = vld [vmem:[#allocation2 + $0x810] sm:$0xff]  ;;  %v674_v38 = vld [vmem:[#allocation2 + $0x848] sm:$0xff] }
 0x11b   : > { %3998 = vmatprep.subr.bf16.mxu1 %v3997_v45  ;;  %v635_v45 = vld [vmem:[#allocation2 + $0x710] sm:$0xff]  ;;  %v3521_v32 = vpack.c.bf16 %v670_v26, %v666_v25  ;;  %v678_v39 = vld [vmem:[#allocation2 + $0x868] sm:$0xff]  ;;  %v701_v25 = vld [vmem:[#allocation2 + $0x920] sm:$0xff] }
 0x11c   : > { %v699_v26 = vld [vmem:[#allocation2 + $0x910] sm:$0xff] }
 0x11d   : > { %3488 = vmatpush1.bf16.msra.mxu0 %v3487_v51  ;;  %v648_v51 = vld [vmem:[#allocation2 + $0x778] sm:$0xff] }
 0x11e   : > { %4000 = vmatpush1.bf16.msra.mxu1 %v3999_v52  ;;  %3490 = vmatprep.subr.bf16.mxu0 %v3489_v53  ;;  %v3507_v52 = vpack.c.bf16 %v637_v44, %v633_v43  ;;  %v4019_v53 = vpack.c.bf16 %v639_v47, %v635_v45  ;;  %v4021_v58 = vpack.c.bf16 %v648_v51, %v644_v50  ;;  %v680_v43 = vld [vmem:[#allocation2 + $0x878] sm:$0xff]  ;;  %v673_v47 = vld [vmem:[#allocation2 + $0x840] sm:$0xff]  ;;  %v679_v51 = vld [vmem:[#allocation2 + $0x870] sm:$0xff] }
 0x11f   : > { %4002 = vmatprep.subr.bf16.mxu1 %v4001_v57  ;;  %v643_v57 = vld [vmem:[#allocation2 + $0x750] sm:$0xff]  ;;  %v4035_v45 = vpack.c.bf16 %v671_v37, %v667_v35  ;;  %v705_v37 = vld [vmem:[#allocation2 + $0x940] sm:$0xff] }
 0x121   : > { %3492 = vmatpush1.bf16.msra.mxu0 %v3491_v0  ;;  %v656_v0 = vld [vmem:[#allocation2 + $0x7b8] sm:$0xff] }
 0x122   : > { %4004 = vmatpush1.bf16.msra.mxu1 %v4003_v1  ;;  %3494 = vmatprep.subr.bf16.mxu0 %v3493_v2  ;;  %v3511_v1 = vpack.c.bf16 %v645_v56, %v641_v55  ;;  %v4023_v2 = vpack.c.bf16 %v647_v60, %v643_v57  ;;  %v4025_v7 = vpack.c.bf16 %v656_v0, %v652_v63  ;;  %v684_v55 = vld [vmem:[#allocation2 + $0x898] sm:$0xff]  ;;  %v683_v63 = vld [vmem:[#allocation2 + $0x890] sm:$0xff] }
 0x123   : > { %4006 = vmatprep.subr.bf16.mxu1 %v4005_v6  ;;  %v651_v6 = vld [vmem:[#allocation2 + $0x790] sm:$0xff]  ;;  %v688_v56 = vld [vmem:[#allocation2 + $0x8b8] sm:$0xff]  ;;  %v3527_v57 = vpack.c.bf16 %v677_v48, %v673_v47 }
 0x124   : > { %v4041_v0 = vpack.c.bf16 %v688_v56, %v684_v55  ;;  %v722_v55 = vld [vmem:[#allocation2 + $0x9c8] sm:$0xff] }
 0x125   : > { %3496 = vmatpush1.bf16.msra.mxu0 %v3495_v14  ;;  %v664_v14 = vld [vmem:[#allocation2 + $0x7f8] sm:$0xff]  ;;  %v726_v56 = vld [vmem:[#allocation2 + $0x9e8] sm:$0xff] }
 0x126   : > { %4008 = vmatpush1.bf16.msra.mxu1 %v4007_v15  ;;  %3498 = vmatprep.subr.bf16.mxu0 %v3497_v16  ;;  %v3515_v15 = vpack.c.bf16 %v653_v5, %v649_v4  ;;  %v4027_v16 = vpack.c.bf16 %v655_v10, %v651_v6  ;;  %v4029_v23 = vpack.c.bf16 %v664_v14, %v660_v13  ;;  %v696_v4 = vld [vmem:[#allocation2 + $0x8f8] sm:$0xff]  ;;  %v689_v10 = vld [vmem:[#allocation2 + $0x8c0] sm:$0xff]  ;;  %v695_v14 = vld [vmem:[#allocation2 + $0x8f0] sm:$0xff] }
 0x127   : > { %4010 = vmatprep.subr.bf16.mxu1 %v4009_v22  ;;  %v659_v22 = vld [vmem:[#allocation2 + $0x7d0] sm:$0xff]  ;;  %v3531_v5 = vpack.c.bf16 %v685_v62, %v681_v61  ;;  %v3549_v62 = vpack.c.bf16 %v726_v56, %v722_v55 }
 0x128   : > { %v4031_v31 = vpack.c.bf16 %v663_v24, %v659_v22  ;;  %v4047_v22 = vpack.c.bf16 %v695_v14, %v691_v12  ;;  %v697_v24 = vld [vmem:[#allocation2 + $0x900] sm:$0xff]  ;;  %v731_v14 = vld [vmem:[#allocation2 + $0xa10] sm:$0xff] }
 0x129   : > { %3500 = vmatpush1.bf16.msra.mxu0 %v3499_v28  ;;  %v672_v28 = vld [vmem:[#allocation2 + $0x838] sm:$0xff]  ;;  %v729_v12 = vld [vmem:[#allocation2 + $0xa00] sm:$0xff]  ;;  %v759_v56 = vld [vmem:[#allocation2 + $0xaf0] sm:$0xff] }
 0x12a   : > { %4012 = vmatpush1.bf16.msra.mxu1 %v4011_v29  ;;  %3502 = vmatprep.subr.bf16.mxu0 %v3501_v30  ;;  %v5230_v29 = vsub.s32 2, %v5203_v59  ;;  %v3519_v30 = vpack.c.bf16 %v661_v20, %v657_v18  ;;  %v4033_v36 = vpack.c.bf16 %v672_v28, %v668_v27  ;;  %v704_v18 = vld [vmem:[#allocation2 + $0x938] sm:$0xff]  ;;  %v3535_v20 = vpack.c.bf16 %v693_v11, %v689_v10  ;;  %v703_v28 = vld [vmem:[#allocation2 + $0x930] sm:$0xff] }
 0x12b   : > { %4014 = vmatprep.subr.bf16.mxu1 %v4013_v34  ;;  %v669_v34 = vld [vmem:[#allocation2 + $0x820] sm:$0xff]  ;;  %v4051_v35 = vpack.c.bf16 %v703_v28, %v699_v26  ;;  %v739_v28 = vld [vmem:[#allocation2 + $0xa50] sm:$0xff] }
 0x12c   : > { %v3523_v44 = vpack.c.bf16 %v669_v34, %v665_v33  ;;  %v712_v33 = vld [vmem:[#allocation2 + $0x978] sm:$0xff]  ;;  %v3539_v34 = vpack.c.bf16 %v701_v25, %v697_v24  ;;  %v737_v26 = vld [vmem:[#allocation2 + $0xa40] sm:$0xff] }
 0x12d   : > { %3504 = vmatpush1.bf16.msra.mxu0 %v3503_v40  ;;  %v1458_v40 = vsub.s32 5, %v5203_v59 }
 0x12e   : > { %4016 = vmatpush1.bf16.msra.mxu1 %v4015_v41  ;;  %3506 = vmatprep.subr.bf16.mxu0 %v3505_v42  ;;  %v1447_v41 = vrot.slane %v5215_v19, %v5230_v29  ;;  %v676_v42 = vld [vmem:[#allocation2 + $0x858] sm:$0xff] }
 0x12f   : > { %4018 = vmatprep.subr.bf16.mxu1 %v4017_v46  ;;  %v3525_v46 = vpack.c.bf16 %v678_v39, %v674_v38  ;;  %v4037_v50 = vpack.c.bf16 %v680_v43, %v676_v42  ;;  %v709_v38 = vld [vmem:[#allocation2 + $0x960] sm:$0xff]  ;;  %v707_v39 = vld [vmem:[#allocation2 + $0x950] sm:$0xff]  ;;  %v714_v43 = vld [vmem:[#allocation2 + $0x988] sm:$0xff] }
 0x130   : > { %v711_v42 = vld [vmem:[#allocation2 + $0x970] sm:$0xff]  ;;  %v3543_v47 = vpack.c.bf16 %v709_v38, %v705_v37 }
 0x131   : > { %3508 = vmatpush1.bf16.msra.mxu0 %v3507_v52  ;;  %v682_v52 = vld [vmem:[#allocation2 + $0x888] sm:$0xff]  ;;  %v4055_v48 = vpack.c.bf16 %v711_v42, %v707_v39  ;;  %v745_v39 = vld [vmem:[#allocation2 + $0xa80] sm:$0xff]  ;;  %v747_v42 = vld [vmem:[#allocation2 + $0xa90] sm:$0xff] }
 0x132   : > { %4020 = vmatpush1.bf16.msra.mxu1 %v4019_v53  ;;  %3510 = vmatprep.subr.bf16.mxu0 %v3509_v54  ;;  %v686_v53 = vld [vmem:[#allocation2 + $0x8a8] sm:$0xff]  ;;  %v1459_v54 = vrot.slane %v5215_v19, %v1458_v40  ;;  %v692_v19 = vld [vmem:[#allocation2 + $0x8d8] sm:$0xff] }
 0x133   : > { %4022 = vmatprep.subr.bf16.mxu1 %v4021_v58  ;;  %v4039_v58 = vpack.c.bf16 %v679_v51, %v675_v49  ;;  %v3529_v60 = vpack.c.bf16 %v686_v53, %v682_v52  ;;  %v4045_v13 = vpack.c.bf16 %v696_v4, %v692_v19  ;;  %v717_v51 = vld [vmem:[#allocation2 + $0x9a0] sm:$0xff]  ;;  %v715_v52 = vld [vmem:[#allocation2 + $0x990] sm:$0xff]  ;;  %v730_v19 = vld [vmem:[#allocation2 + $0xa08] sm:$0xff] }
 0x134   : > { %v734_v4 = vld [vmem:[#allocation2 + $0xa28] sm:$0xff] }
 0x135   : > { %3512 = vmatpush1.bf16.msra.mxu0 %v3511_v1  ;;  %v687_v1 = vld [vmem:[#allocation2 + $0x8b0] sm:$0xff]  ;;  %v3553_v11 = vpack.c.bf16 %v734_v4, %v730_v19 }
 0x136   : > { %4024 = vmatpush1.bf16.msra.mxu1 %v4023_v2  ;;  %3514 = vmatprep.subr.bf16.mxu0 %v3513_v3  ;;  %v690_v2 = vld [vmem:[#allocation2 + $0x8c8] sm:$0xff]  ;;  %v4043_v6 = vpack.c.bf16 %v687_v1, %v683_v63  ;;  %v721_v63 = vld [vmem:[#allocation2 + $0x9c0] sm:$0xff]  ;;  %v723_v1 = vld [vmem:[#allocation2 + $0x9d0] sm:$0xff] }
 0x137   : > { %4026 = vmatprep.subr.bf16.mxu1 %v4025_v7  ;;  %v694_v3 = vld [vmem:[#allocation2 + $0x8e8] sm:$0xff]  ;;  %v767_v4 = vld [vmem:[#allocation2 + $0xb30] sm:$0xff] }
 0x138   : > { %v3533_v7 = vpack.c.bf16 %v694_v3, %v690_v2  ;;  %v727_v3 = vld [vmem:[#allocation2 + $0x9f0] sm:$0xff] }
 0x139   : > { %3516 = vmatpush1.bf16.msra.mxu0 %v3515_v15  ;;  %v698_v15 = vld [vmem:[#allocation2 + $0x908] sm:$0xff]  ;;  %v4063_v10 = vpack.c.bf16 %v727_v3, %v723_v1  ;;  %v761_v1 = vld [vmem:[#allocation2 + $0xb00] sm:$0xff]  ;;  %v763_v3 = vld [vmem:[#allocation2 + $0xb10] sm:$0xff] }
 0x13a   : > { %4028 = vmatpush1.bf16.msra.mxu1 %v4027_v16  ;;  %3518 = vmatprep.subr.bf16.mxu0 %v3517_v17  ;;  %v702_v16 = vld [vmem:[#allocation2 + $0x928] sm:$0xff]  ;;  %v700_v17 = vld [vmem:[#allocation2 + $0x918] sm:$0xff] }
 0x13b   : > { %4030 = vmatprep.subr.bf16.mxu1 %v4029_v23  ;;  %v3537_v23 = vpack.c.bf16 %v702_v16, %v698_v15  ;;  %v4049_v27 = vpack.c.bf16 %v704_v18, %v700_v17  ;;  %v735_v16 = vld [vmem:[#allocation2 + $0xa30] sm:$0xff]  ;;  %v738_v17 = vld [vmem:[#allocation2 + $0xa48] sm:$0xff] }
 0x13c   : > { %v742_v18 = vld [vmem:[#allocation2 + $0xa68] sm:$0xff]  ;;  %v4067_v24 = vpack.c.bf16 %v735_v16, %v731_v14  ;;  %v769_v14 = vld [vmem:[#allocation2 + $0xb40] sm:$0xff]  ;;  %v771_v16 = vld [vmem:[#allocation2 + $0xb50] sm:$0xff] }
 0x13d   : > { %3520 = vmatpush1.bf16.msra.mxu0 %v3519_v30  ;;  %v706_v30 = vld [vmem:[#allocation2 + $0x948] sm:$0xff]  ;;  %v3557_v25 = vpack.c.bf16 %v742_v18, %v738_v17  ;;  %v775_v18 = vld [vmem:[#allocation2 + $0xb70] sm:$0xff] }
 0x13e   : > { %4032 = vmatpush1.bf16.msra.mxu1 %v4031_v31  ;;  %3522 = vmatprep.subr.bf16.mxu0 %v3521_v32  ;;  %v710_v31 = vld [vmem:[#allocation2 + $0x968] sm:$0xff]  ;;  %v708_v32 = vld [vmem:[#allocation2 + $0x958] sm:$0xff] }
 0x13f   : > { %4034 = vmatprep.subr.bf16.mxu1 %v4033_v36  ;;  %v3541_v36 = vpack.c.bf16 %v710_v31, %v706_v30  ;;  %v743_v31 = vld [vmem:[#allocation2 + $0xa70] sm:$0xff] }
 0x140   : > { %1673 = vmatmul.mubr.f32.vlgmr.msra.gmra.mrb[0].mxu0 %v1447_v41  ;;  %v4071_v37 = vpack.c.bf16 %v743_v31, %v739_v28  ;;  %v777_v28 = vld [vmem:[#allocation2 + $0xb80] sm:$0xff]  ;;  %v779_v31 = vld [vmem:[#allocation2 + $0xb90] sm:$0xff] }
 0x141   : > { %3524 = vmatpush1.bf16.msra.mxu0 %v3523_v44  ;;  %2241 = vmatmul.mubr.f32.vlgmr.msra.gmra.mrb[0].mxu1 %v1447_v41  ;;  %v4053_v41 = vpack.c.bf16 %v712_v33, %v708_v32  ;;  %v718_v44 = vld [vmem:[#allocation2 + $0x9a8] sm:$0xff] }
 0x142   : > { %4036 = vmatpush1.bf16.msra.mxu1 %v4035_v45  ;;  %3526 = vmatprep.subr.bf16.mxu0 %v3525_v46  ;;  %v716_v45 = vld [vmem:[#allocation2 + $0x998] sm:$0xff]  ;;  %v3545_v49 = vpack.c.bf16 %v718_v44, %v714_v43  ;;  %v746_v32 = vld [vmem:[#allocation2 + $0xa88] sm:$0xff]  ;;  %v751_v44 = vld [vmem:[#allocation2 + $0xab0] sm:$0xff] }
 0x143   : > { %4038 = vmatprep.subr.bf16.mxu1 %v4037_v50  ;;  %1743 = vmatprep.mubr.f32.mxu0 %v1459_v54  ;;  %v720_v46 = vld [vmem:[#allocation2 + $0x9b8] sm:$0xff]  ;;  %v713_v50 = vld [vmem:[#allocation2 + $0x980] sm:$0xff]  ;;  %v750_v33 = vld [vmem:[#allocation2 + $0xaa8] sm:$0xff] }
 0x144   : > { %2311 = vmatprep.mubr.f32.mxu1 %v1459_v54  ;;  %v4057_v53 = vpack.c.bf16 %v720_v46, %v716_v45  ;;  %v719_v54 = vld [vmem:[#allocation2 + $0x9b0] sm:$0xff]  ;;  %v3561_v38 = vpack.c.bf16 %v750_v33, %v746_v32  ;;  %v754_v45 = vld [vmem:[#allocation2 + $0xac8] sm:$0xff] }
 0x145   : > { %3528 = vmatpush1.bf16.msra.mxu0 %v3527_v57  ;;  %v724_v57 = vld [vmem:[#allocation2 + $0x9d8] sm:$0xff]  ;;  %v4059_v61 = vpack.c.bf16 %v719_v54, %v715_v52  ;;  %v758_v46 = vld [vmem:[#allocation2 + $0xae8] sm:$0xff]  ;;  %v753_v52 = vld [vmem:[#allocation2 + $0xac0] sm:$0xff] }
 0x146   : > { %4040 = vmatpush1.bf16.msra.mxu1 %v4039_v58  ;;  %3530 = vmatprep.subr.bf16.mxu0 %v3529_v60  ;;  %v728_v58 = vld [vmem:[#allocation2 + $0x9f8] sm:$0xff]  ;;  %v3547_v60 = vpack.c.bf16 %v717_v51, %v713_v50  ;;  %v4075_v50 = vpack.c.bf16 %v751_v44, %v747_v42  ;;  %v3565_v51 = vpack.c.bf16 %v758_v46, %v754_v45  ;;  %v755_v54 = vld [vmem:[#allocation2 + $0xad0] sm:$0xff]  ;;  %v785_v42 = vld [vmem:[#allocation2 + $0xbc0] sm:$0xff] }
 0x147   : > { %4042 = vmatprep.subr.bf16.mxu1 %v4041_v0  ;;  %v725_v0 = vld [vmem:[#allocation2 + $0x9e0] sm:$0xff]  ;;  %v4061_v2 = vpack.c.bf16 %v728_v58, %v724_v57  ;;  %v762_v57 = vld [vmem:[#allocation2 + $0xb08] sm:$0xff]  ;;  %v783_v33 = vld [vmem:[#allocation2 + $0xbb0] sm:$0xff] }
 0x148   : > { %v766_v58 = vld [vmem:[#allocation2 + $0xb28] sm:$0xff]  ;;  %v787_v44 = vld [vmem:[#allocation2 + $0xbd0] sm:$0xff] }
 0x149   : > { %3532 = vmatpush1.bf16.msra.mxu0 %v3531_v5  ;;  %v732_v5 = vld [vmem:[#allocation2 + $0xa18] sm:$0xff]  ;;  %v791_v46 = vld [vmem:[#allocation2 + $0xbf0] sm:$0xff] }
 0x14a   : > { %4044 = vmatpush1.bf16.msra.mxu1 %v4043_v6  ;;  %3534 = vmatprep.subr.bf16.mxu0 %v3533_v7  ;;  %v736_v6 = vld [vmem:[#allocation2 + $0xa38] sm:$0xff]  ;;  %v3551_v7 = vpack.c.bf16 %v725_v0, %v721_v63  ;;  %v4079_v63 = vpack.c.bf16 %v759_v56, %v755_v54  ;;  %v3569_v0 = vpack.c.bf16 %v766_v58, %v762_v57  ;;  %v797_v56 = vld [vmem:[#allocation2 + $0xc20] sm:$0xff]  ;;  %v795_v57 = vld [vmem:[#allocation2 + $0xc10] sm:$0xff] }
 0x14b   : > { %4046 = vmatprep.subr.bf16.mxu1 %v4045_v13  ;;  %v733_v13 = vld [vmem:[#allocation2 + $0xa20] sm:$0xff]  ;;  %v4065_v15 = vpack.c.bf16 %v736_v6, %v732_v5  ;;  %v770_v5 = vld [vmem:[#allocation2 + $0xb48] sm:$0xff] }
 0x14c   : > { %v774_v6 = vld [vmem:[#allocation2 + $0xb68] sm:$0xff] }
 0x14d   : > { %3536 = vmatpush1.bf16.msra.mxu0 %v3535_v20  ;;  %v740_v20 = vld [vmem:[#allocation2 + $0xa58] sm:$0xff] }
 0x14e   : > { %4048 = vmatpush1.bf16.msra.mxu1 %v4047_v22  ;;  %3538 = vmatprep.subr.bf16.mxu0 %v3537_v23  ;;  %v744_v22 = vld [vmem:[#allocation2 + $0xa78] sm:$0xff]  ;;  %v3555_v23 = vpack.c.bf16 %v733_v13, %v729_v12  ;;  %v4083_v12 = vpack.c.bf16 %v767_v4, %v763_v3  ;;  %v3573_v13 = vpack.c.bf16 %v774_v6, %v770_v5  ;;  %v801_v6 = vld [vmem:[#allocation2 + $0xc40] sm:$0xff] }
 0x14f   : > { %4050 = vmatprep.subr.bf16.mxu1 %v4049_v27  ;;  %v741_v27 = vld [vmem:[#allocation2 + $0xa60] sm:$0xff]  ;;  %v4069_v30 = vpack.c.bf16 %v744_v22, %v740_v20  ;;  %v778_v20 = vld [vmem:[#allocation2 + $0xb88] sm:$0xff]  ;;  %v808_v3 = vld [vmem:[#allocation2 + $0xc78] sm:$0xff] }
 0x150   : > { %v782_v22 = vld [vmem:[#allocation2 + $0xba8] sm:$0xff] }
 0x151   : > { %3540 = vmatpush1.bf16.msra.mxu0 %v3539_v34  ;;  %v748_v34 = vld [vmem:[#allocation2 + $0xa98] sm:$0xff] }
 0x152   : > { %4052 = vmatpush1.bf16.msra.mxu1 %v4051_v35  ;;  %3542 = vmatprep.subr.bf16.mxu0 %v3541_v36  ;;  %v752_v35 = vld [vmem:[#allocation2 + $0xab8] sm:$0xff]  ;;  %v3559_v36 = vpack.c.bf16 %v741_v27, %v737_v26  ;;  %v4087_v26 = vpack.c.bf16 %v775_v18, %v771_v16  ;;  %v3577_v27 = vpack.c.bf16 %v782_v22, %v778_v20 }
 0x153   : > { %4054 = vmatprep.subr.bf16.mxu1 %v4053_v41  ;;  %v749_v41 = vld [vmem:[#allocation2 + $0xaa0] sm:$0xff]  ;;  %v4073_v43 = vpack.c.bf16 %v752_v35, %v748_v34  ;;  %v786_v34 = vld [vmem:[#allocation2 + $0xbc8] sm:$0xff]  ;;  %v812_v16 = vld [vmem:[#allocation2 + $0xc98] sm:$0xff] }
 0x154   : > { %v790_v35 = vld [vmem:[#allocation2 + $0xbe8] sm:$0xff] }
 0x155   : > { %3544 = vmatpush1.bf16.msra.mxu0 %v3543_v47  ;;  %v756_v47 = vld [vmem:[#allocation2 + $0xad8] sm:$0xff] }
 0x156   : > { %4056 = vmatpush1.bf16.msra.mxu1 %v4055_v48  ;;  %3546 = vmatprep.subr.bf16.mxu0 %v3545_v49  ;;  %v760_v48 = vld [vmem:[#allocation2 + $0xaf8] sm:$0xff]  ;;  %v3563_v49 = vpack.c.bf16 %v749_v41, %v745_v39  ;;  %v4091_v39 = vpack.c.bf16 %v783_v33, %v779_v31  ;;  %v3581_v41 = vpack.c.bf16 %v790_v35, %v786_v34 }
 0x157   : > { %4058 = vmatprep.subr.bf16.mxu1 %v4057_v53  ;;  %v757_v53 = vld [vmem:[#allocation2 + $0xae0] sm:$0xff]  ;;  %v4077_v55 = vpack.c.bf16 %v760_v48, %v756_v47  ;;  %v794_v47 = vld [vmem:[#allocation2 + $0xc08] sm:$0xff]  ;;  %v820_v31 = vld [vmem:[#allocation2 + $0xcd8] sm:$0xff] }
 0x158   : > { %v798_v48 = vld [vmem:[#allocation2 + $0xc28] sm:$0xff] }
 0x159   : > { %3548 = vmatpush1.bf16.msra.mxu0 %v3547_v60  ;;  %v764_v60 = vld [vmem:[#allocation2 + $0xb18] sm:$0xff]  ;;  %v3585_v54 = vpack.c.bf16 %v798_v48, %v794_v47 }
 0x15a   : > { %4060 = vmatpush1.bf16.msra.mxu1 %v4059_v61  ;;  %3550 = vmatprep.subr.bf16.mxu0 %v3549_v62  ;;  %v768_v61 = vld [vmem:[#allocation2 + $0xb38] sm:$0xff]  ;;  %v3567_v62 = vpack.c.bf16 %v757_v53, %v753_v52  ;;  %v4095_v53 = vpack.c.bf16 %v791_v46, %v787_v44 }
 0x15b   : > { %4062 = vmatprep.subr.bf16.mxu1 %v4061_v2  ;;  %v765_v2 = vld [vmem:[#allocation2 + $0xb20] sm:$0xff]  ;;  %v4081_v19 = vpack.c.bf16 %v768_v61, %v764_v60  ;;  %v799_v60 = vld [vmem:[#allocation2 + $0xc30] sm:$0xff]  ;;  %v802_v61 = vld [vmem:[#allocation2 + $0xc48] sm:$0xff] }
 0x15c   : > { %v4099_v4 = vpack.c.bf16 %v799_v60, %v795_v57  ;;  %v828_v44 = vld [vmem:[#allocation2 + $0xd18] sm:$0xff] }
 0x15d   : > { %3552 = vmatpush1.bf16.msra.mxu0 %v3551_v7  ;;  %v772_v7 = vld [vmem:[#allocation2 + $0xb58] sm:$0xff] }
 0x15e   : > { %4064 = vmatpush1.bf16.msra.mxu1 %v4063_v10  ;;  %3554 = vmatprep.subr.bf16.mxu0 %v3553_v11  ;;  %v776_v10 = vld [vmem:[#allocation2 + $0xb78] sm:$0xff]  ;;  %v3571_v11 = vpack.c.bf16 %v765_v2, %v761_v1 }
 0x15f   : > { %4066 = vmatprep.subr.bf16.mxu1 %v4065_v15  ;;  %v773_v15 = vld [vmem:[#allocation2 + $0xb60] sm:$0xff]  ;;  %v4085_v17 = vpack.c.bf16 %v776_v10, %v772_v7  ;;  %v804_v2 = vld [vmem:[#allocation2 + $0xc58] sm:$0xff]  ;;  %v803_v10 = vld [vmem:[#allocation2 + $0xc50] sm:$0xff] }
 0x160   : > { %v805_v7 = vld [vmem:[#allocation2 + $0xc60] sm:$0xff]  ;;  %v836_v57 = vld [vmem:[#allocation2 + $0xd58] sm:$0xff] }
 0x161   : > { %3556 = vmatpush1.bf16.msra.mxu0 %v3555_v23  ;;  %v780_v23 = vld [vmem:[#allocation2 + $0xb98] sm:$0xff]  ;;  %v3591_v18 = vpack.c.bf16 %v805_v7, %v801_v6  ;;  %v846_v6 = vld [vmem:[#allocation2 + $0xda8] sm:$0xff] }
 0x162   : > { %4068 = vmatpush1.bf16.msra.mxu1 %v4067_v24  ;;  %3558 = vmatprep.subr.bf16.mxu0 %v3557_v25  ;;  %v784_v24 = vld [vmem:[#allocation2 + $0xbb8] sm:$0xff]  ;;  %v3575_v25 = vpack.c.bf16 %v773_v15, %v769_v14  ;;  %v814_v14 = vld [vmem:[#allocation2 + $0xca8] sm:$0xff] }
 0x163   : > { %4070 = vmatprep.subr.bf16.mxu1 %v4069_v30  ;;  %v781_v30 = vld [vmem:[#allocation2 + $0xba0] sm:$0xff]  ;;  %v4089_v32 = vpack.c.bf16 %v784_v24, %v780_v23  ;;  %v844_v7 = vld [vmem:[#allocation2 + $0xd98] sm:$0xff] }
 0x164   : > { %v809_v23 = vld [vmem:[#allocation2 + $0xc80] sm:$0xff] }
 0x165   : > { %3560 = vmatpush1.bf16.msra.mxu0 %v3559_v36  ;;  %v788_v36 = vld [vmem:[#allocation2 + $0xbd8] sm:$0xff]  ;;  %v813_v24 = vld [vmem:[#allocation2 + $0xca0] sm:$0xff] }
 0x166   : > { %4072 = vmatpush1.bf16.msra.mxu1 %v4071_v37  ;;  %3562 = vmatprep.subr.bf16.mxu0 %v3561_v38  ;;  %v792_v37 = vld [vmem:[#allocation2 + $0xbf8] sm:$0xff]  ;;  %v3579_v38 = vpack.c.bf16 %v781_v30, %v777_v28  ;;  %v818_v28 = vld [vmem:[#allocation2 + $0xcc8] sm:$0xff]  ;;  %v3595_v33 = vpack.c.bf16 %v813_v24, %v809_v23 }
 0x167   : > { %4074 = vmatprep.subr.bf16.mxu1 %v4073_v43  ;;  %v789_v43 = vld [vmem:[#allocation2 + $0xbe0] sm:$0xff]  ;;  %v4093_v45 = vpack.c.bf16 %v792_v37, %v788_v36  ;;  %v822_v30 = vld [vmem:[#allocation2 + $0xce8] sm:$0xff]  ;;  %v852_v23 = vld [vmem:[#allocation2 + $0xdd8] sm:$0xff] }
 0x168   : > { %v3583_v52 = vpack.c.bf16 %v789_v43, %v785_v42  ;;  %v3597_v35 = vpack.c.bf16 %v822_v30, %v818_v28  ;;  %v817_v36 = vld [vmem:[#allocation2 + $0xcc0] sm:$0xff]  ;;  %v826_v42 = vld [vmem:[#allocation2 + $0xd08] sm:$0xff]  ;;  %v856_v24 = vld [vmem:[#allocation2 + $0xdf8] sm:$0xff] }
 0x169   : > { %3564 = vmatpush1.bf16.msra.mxu0 %v3563_v49  ;;  %v796_v49 = vld [vmem:[#allocation2 + $0xc18] sm:$0xff]  ;;  %v821_v37 = vld [vmem:[#allocation2 + $0xce0] sm:$0xff]  ;;  %v830_v43 = vld [vmem:[#allocation2 + $0xd28] sm:$0xff] }
 0x16a   : > { %4076 = vmatpush1.bf16.msra.mxu1 %v4075_v50  ;;  %3566 = vmatprep.subr.bf16.mxu0 %v3565_v51  ;;  %v800_v50 = vld [vmem:[#allocation2 + $0xc38] sm:$0xff]  ;;  %v1454_v51 = vsub.s32 4, %v5203_v59  ;;  %v3599_v46 = vpack.c.bf16 %v821_v37, %v817_v36  ;;  %v3601_v48 = vpack.c.bf16 %v830_v43, %v826_v42  ;;  %v849_v28 = vld [vmem:[#allocation2 + $0xdc0] sm:$0xff] }
 0x16b   : > { %4078 = vmatprep.subr.bf16.mxu1 %v4077_v55  ;;  %v793_v55 = vld [vmem:[#allocation2 + $0xc00] sm:$0xff]  ;;  %v4097_v58 = vpack.c.bf16 %v800_v50, %v796_v49  ;;  %v860_v36 = vld [vmem:[#allocation2 + $0xe18] sm:$0xff] }
 0x16c   : > { %v825_v49 = vld [vmem:[#allocation2 + $0xd00] sm:$0xff]  ;;  %v864_v37 = vld [vmem:[#allocation2 + $0xe38] sm:$0xff] }
 0x16d   : > { %3568 = vmatpush1.bf16.msra.mxu0 %v3567_v62  ;;  %v806_v62 = vld [vmem:[#allocation2 + $0xc68] sm:$0xff]  ;;  %v829_v50 = vld [vmem:[#allocation2 + $0xd20] sm:$0xff] }
 0x16e   : > { %4080 = vmatpush1.bf16.msra.mxu1 %v4079_v63  ;;  %3570 = vmatprep.subr.bf16.mxu0 %v3569_v0  ;;  %v1466_v63 = vsub.s32 7, %v5203_v59  ;;  %v5241_v0 = vld [vmem:[%s5209_s4] sm:$0xff]  ;;  %v3589_v5 = vpack.c.bf16 %v806_v62, %v802_v61  ;;  %v3603_v60 = vpack.c.bf16 %v829_v50, %v825_v49  ;;  %v868_v49 = vld [vmem:[#allocation2 + $0xe58] sm:$0xff] }
 0x16f   : > { %4082 = vmatprep.subr.bf16.mxu1 %v4081_v19  ;;  %v1455_v1 = vrot.slane %v5241_v0, %v1454_v51  ;;  %v3587_v19 = vpack.c.bf16 %v797_v56, %v793_v55  ;;  %v834_v55 = vld [vmem:[#allocation2 + $0xd48] sm:$0xff]  ;;  %v853_v30 = vld [vmem:[#allocation2 + $0xde0] sm:$0xff]  ;;  %v872_v50 = vld [vmem:[#allocation2 + $0xe78] sm:$0xff] }
 0x170   : > { %v1467_v15 = vrot.slane %v5241_v0, %v1466_v63  ;;  %v838_v56 = vld [vmem:[#allocation2 + $0xd68] sm:$0xff]  ;;  %v857_v42 = vld [vmem:[#allocation2 + $0xe00] sm:$0xff] }
 0x171   : > { %3572 = vmatpush1.bf16.msra.mxu0 %v3571_v11  ;;  %v4101_v11 = vpack.c.bf16 %v808_v3, %v804_v2  ;;  %v3605_v62 = vpack.c.bf16 %v838_v56, %v834_v55  ;;  %v837_v2 = vld [vmem:[#allocation2 + $0xd60] sm:$0xff]  ;;  %v835_v3 = vld [vmem:[#allocation2 + $0xd50] sm:$0xff] }
 0x172   : > { %4084 = vmatpush1.bf16.msra.mxu1 %v4083_v12  ;;  %3574 = vmatprep.subr.bf16.mxu0 %v3573_v13  ;;  %v807_v12 = vld [vmem:[#allocation2 + $0xc70] sm:$0xff]  ;;  %v810_v13 = vld [vmem:[#allocation2 + $0xc88] sm:$0xff]  ;;  %v861_v43 = vld [vmem:[#allocation2 + $0xe20] sm:$0xff] }
 0x173   : > { %4086 = vmatprep.subr.bf16.mxu1 %v4085_v17  ;;  %v816_v17 = vld [vmem:[#allocation2 + $0xcb8] sm:$0xff]  ;;  %v4103_v20 = vpack.c.bf16 %v807_v12, %v803_v10  ;;  %v3593_v22 = vpack.c.bf16 %v814_v14, %v810_v13  ;;  %v841_v14 = vld [vmem:[#allocation2 + $0xd80] sm:$0xff] }
 0x174   : > { %v848_v10 = vld [vmem:[#allocation2 + $0xdb8] sm:$0xff]  ;;  %v865_v55 = vld [vmem:[#allocation2 + $0xe40] sm:$0xff] }
 0x175   : > { %3576 = vmatpush1.bf16.msra.mxu0 %v3575_v25  ;;  %v811_v25 = vld [vmem:[#allocation2 + $0xc90] sm:$0xff]  ;;  %v869_v56 = vld [vmem:[#allocation2 + $0xe60] sm:$0xff] }
 0x176   : > { %4088 = vmatpush1.bf16.msra.mxu1 %v4087_v26  ;;  %3578 = vmatprep.subr.bf16.mxu0 %v3577_v27  ;;  %v4105_v26 = vpack.c.bf16 %v816_v17, %v812_v16  ;;  %v815_v27 = vld [vmem:[#allocation2 + $0xcb0] sm:$0xff]  ;;  %v4121_v17 = vpack.c.bf16 %v848_v10, %v844_v7 }
 0x177   : > { %4090 = vmatprep.subr.bf16.mxu1 %v4089_v32  ;;  %v824_v32 = vld [vmem:[#allocation2 + $0xcf8] sm:$0xff]  ;;  %v4107_v34 = vpack.c.bf16 %v815_v27, %v811_v25  ;;  %v843_v16 = vld [vmem:[#allocation2 + $0xd90] sm:$0xff] }
 0x178   : > { %v875_v7 = vld [vmem:[#allocation2 + $0xe90] sm:$0xff] }
 0x179   : > { %3580 = vmatpush1.bf16.msra.mxu0 %v3579_v38  ;;  %v819_v38 = vld [vmem:[#allocation2 + $0xcd0] sm:$0xff] }
 0x17a   : > { %4092 = vmatpush1.bf16.msra.mxu1 %v4091_v39  ;;  %3582 = vmatprep.subr.bf16.mxu0 %v3581_v41  ;;  %v4109_v39 = vpack.c.bf16 %v824_v32, %v820_v31  ;;  %v823_v41 = vld [vmem:[#allocation2 + $0xcf0] sm:$0xff]  ;;  %v4125_v32 = vpack.c.bf16 %v856_v24, %v852_v23 }
 0x17b   : > { %4094 = vmatprep.subr.bf16.mxu1 %v4093_v45  ;;  %v832_v45 = vld [vmem:[#allocation2 + $0xd38] sm:$0xff]  ;;  %v4111_v47 = vpack.c.bf16 %v823_v41, %v819_v38  ;;  %v851_v31 = vld [vmem:[#allocation2 + $0xdd0] sm:$0xff]  ;;  %v3615_v38 = vpack.c.bf16 %v853_v30, %v849_v28 }
 0x17c   : > { %v883_v23 = vld [vmem:[#allocation2 + $0xed0] sm:$0xff]  ;;  %v892_v28 = vld [vmem:[#allocation2 + $0xf18] sm:$0xff] }
 0x17d   : > { %3584 = vmatpush1.bf16.msra.mxu0 %v3583_v52  ;;  %v827_v52 = vld [vmem:[#allocation2 + $0xd10] sm:$0xff]  ;;  %v896_v30 = vld [vmem:[#allocation2 + $0xf38] sm:$0xff] }
 0x17e   : > { %4096 = vmatpush1.bf16.msra.mxu1 %v4095_v53  ;;  %3586 = vmatprep.subr.bf16.mxu0 %v3585_v54  ;;  %v4113_v53 = vpack.c.bf16 %v832_v45, %v828_v44  ;;  %v831_v54 = vld [vmem:[#allocation2 + $0xd30] sm:$0xff]  ;;  %v4129_v45 = vpack.c.bf16 %v864_v37, %v860_v36  ;;  %v4145_v37 = vpack.c.bf16 %v896_v30, %v892_v28  ;;  %v925_v28 = vld [vmem:[#allocation2 + $0x1020] sm:$0xff] }
 0x17f   : > { %4098 = vmatprep.subr.bf16.mxu1 %v4097_v58  ;;  %v840_v58 = vld [vmem:[#allocation2 + $0xd78] sm:$0xff]  ;;  %v4115_v61 = vpack.c.bf16 %v831_v54, %v827_v52  ;;  %v859_v44 = vld [vmem:[#allocation2 + $0xe10] sm:$0xff]  ;;  %v3619_v52 = vpack.c.bf16 %v861_v43, %v857_v42 }
 0x180   : > { %1744 = vmatmul.mubr.f32.vlgmr.msra.gmra.mrb[0].mxu0 %v1455_v1  ;;  %v891_v36 = vld [vmem:[#allocation2 + $0xf10] sm:$0xff]  ;;  %v900_v42 = vld [vmem:[#allocation2 + $0xf58] sm:$0xff] }
 0x181   : > { %3588 = vmatpush1.bf16.msra.mxu0 %v3587_v19  ;;  %2312 = vmatmul.mubr.f32.vlgmr.msra.gmra.mrb[0].mxu1 %v1455_v1  ;;  %v833_v1 = vld [vmem:[#allocation2 + $0xd40] sm:$0xff]  ;;  %v4117_v19 = vpack.c.bf16 %v840_v58, %v836_v57  ;;  %v867_v57 = vld [vmem:[#allocation2 + $0xe50] sm:$0xff]  ;;  %v4133_v58 = vpack.c.bf16 %v872_v50, %v868_v49  ;;  %v904_v43 = vld [vmem:[#allocation2 + $0xf78] sm:$0xff] }
 0x182   : > { %4100 = vmatpush1.bf16.msra.mxu1 %v4099_v4  ;;  %3590 = vmatprep.subr.bf16.mxu0 %v3589_v5  ;;  %v839_v4 = vld [vmem:[#allocation2 + $0xd70] sm:$0xff]  ;;  %v842_v5 = vld [vmem:[#allocation2 + $0xd88] sm:$0xff]  ;;  %v4149_v50 = vpack.c.bf16 %v904_v43, %v900_v42  ;;  %v929_v43 = vld [vmem:[#allocation2 + $0x1040] sm:$0xff] }
 0x183   : > { %4102 = vmatprep.subr.bf16.mxu1 %v4101_v11  ;;  %1814 = vmatprep.mubr.f32.mxu0 %v1467_v15  ;;  %v3607_v11 = vpack.c.bf16 %v837_v2, %v833_v1  ;;  %v4119_v12 = vpack.c.bf16 %v839_v4, %v835_v3  ;;  %v3609_v13 = vpack.c.bf16 %v846_v6, %v842_v5  ;;  %v876_v1 = vld [vmem:[#allocation2 + $0xe98] sm:$0xff]  ;;  %v873_v5 = vld [vmem:[#allocation2 + $0xe80] sm:$0xff]  ;;  %v899_v49 = vld [vmem:[#allocation2 + $0xf50] sm:$0xff] }
 0x184   : > { %2382 = vmatprep.mubr.f32.mxu1 %v1467_v15  ;;  %v845_v15 = vld [vmem:[#allocation2 + $0xda0] sm:$0xff]  ;;  %v880_v2 = vld [vmem:[#allocation2 + $0xeb8] sm:$0xff]  ;;  %v3623_v3 = vpack.c.bf16 %v869_v56, %v865_v55  ;;  %v923_v30 = vld [vmem:[#allocation2 + $0x1010] sm:$0xff] }
 0x185   : > { %3592 = vmatpush1.bf16.msra.mxu0 %v3591_v18  ;;  %v847_v18 = vld [vmem:[#allocation2 + $0xdb0] sm:$0xff]  ;;  %v3611_v25 = vpack.c.bf16 %v845_v15, %v841_v14  ;;  %v877_v6 = vld [vmem:[#allocation2 + $0xea0] sm:$0xff]  ;;  %v4137_v10 = vpack.c.bf16 %v880_v2, %v876_v1  ;;  %v884_v14 = vld [vmem:[#allocation2 + $0xed8] sm:$0xff] }
 0x186   : > { %4104 = vmatpush1.bf16.msra.mxu1 %v4103_v20  ;;  %3594 = vmatprep.subr.bf16.mxu0 %v3593_v22  ;;  %v850_v20 = vld [vmem:[#allocation2 + $0xdc8] sm:$0xff]  ;;  %v888_v15 = vld [vmem:[#allocation2 + $0xef8] sm:$0xff]  ;;  %v907_v1 = vld [vmem:[#allocation2 + $0xf90] sm:$0xff] }
 0x187   : > { %4106 = vmatprep.subr.bf16.mxu1 %v4105_v26  ;;  %v854_v22 = vld [vmem:[#allocation2 + $0xde8] sm:$0xff]  ;;  %v4123_v26 = vpack.c.bf16 %v847_v18, %v843_v16  ;;  %v3627_v16 = vpack.c.bf16 %v877_v6, %v873_v5  ;;  %v4141_v24 = vpack.c.bf16 %v888_v15, %v884_v14  ;;  %v908_v55 = vld [vmem:[#allocation2 + $0xf98] sm:$0xff]  ;;  %v915_v14 = vld [vmem:[#allocation2 + $0xfd0] sm:$0xff] }
 0x188   : > { %v3613_v27 = vpack.c.bf16 %v854_v22, %v850_v20  ;;  %v881_v20 = vld [vmem:[#allocation2 + $0xec0] sm:$0xff]  ;;  %v912_v56 = vld [vmem:[#allocation2 + $0xfb8] sm:$0xff] }
 0x189   : > { %3596 = vmatpush1.bf16.msra.mxu0 %v3595_v33  ;;  %v855_v33 = vld [vmem:[#allocation2 + $0xdf0] sm:$0xff]  ;;  %v885_v22 = vld [vmem:[#allocation2 + $0xee0] sm:$0xff]  ;;  %v4153_v2 = vpack.c.bf16 %v912_v56, %v908_v55  ;;  %v916_v5 = vld [vmem:[#allocation2 + $0xfd8] sm:$0xff] }
 0x18a   : > { %4108 = vmatpush1.bf16.msra.mxu1 %v4107_v34  ;;  %3598 = vmatprep.subr.bf16.mxu0 %v3597_v35  ;;  %v858_v34 = vld [vmem:[#allocation2 + $0xe08] sm:$0xff]  ;;  %v920_v6 = vld [vmem:[#allocation2 + $0xff8] sm:$0xff]  ;;  %v937_v56 = vld [vmem:[#allocation2 + $0x1080] sm:$0xff] }
 0x18b   : > { %4110 = vmatprep.subr.bf16.mxu1 %v4109_v39  ;;  %v862_v35 = vld [vmem:[#allocation2 + $0xe28] sm:$0xff]  ;;  %v4127_v39 = vpack.c.bf16 %v855_v33, %v851_v31  ;;  %v3631_v31 = vpack.c.bf16 %v885_v22, %v881_v20  ;;  %v4157_v15 = vpack.c.bf16 %v920_v6, %v916_v5  ;;  %v924_v20 = vld [vmem:[#allocation2 + $0x1018] sm:$0xff]  ;;  %v945_v6 = vld [vmem:[#allocation2 + $0x10c0] sm:$0xff] }
 0x18c   : > { %v3617_v41 = vpack.c.bf16 %v862_v35, %v858_v34  ;;  %v889_v34 = vld [vmem:[#allocation2 + $0xf00] sm:$0xff]  ;;  %v928_v22 = vld [vmem:[#allocation2 + $0x1038] sm:$0xff] }
 0x18d   : > { %3600 = vmatpush1.bf16.msra.mxu0 %v3599_v46  ;;  %v863_v46 = vld [vmem:[#allocation2 + $0xe30] sm:$0xff]  ;;  %v893_v35 = vld [vmem:[#allocation2 + $0xf20] sm:$0xff] }
 0x18e   : > { %4112 = vmatpush1.bf16.msra.mxu1 %v4111_v47  ;;  %3602 = vmatprep.subr.bf16.mxu0 %v3601_v48  ;;  %v866_v47 = vld [vmem:[#allocation2 + $0xe48] sm:$0xff] }
 0x18f   : > { %4114 = vmatprep.subr.bf16.mxu1 %v4113_v53  ;;  %v870_v48 = vld [vmem:[#allocation2 + $0xe68] sm:$0xff]  ;;  %v4131_v53 = vpack.c.bf16 %v863_v46, %v859_v44  ;;  %v3635_v44 = vpack.c.bf16 %v893_v35, %v889_v34 }
 0x190   : > { %v3621_v54 = vpack.c.bf16 %v870_v48, %v866_v47  ;;  %v897_v47 = vld [vmem:[#allocation2 + $0xf40] sm:$0xff]  ;;  %v934_v34 = vld [vmem:[#allocation2 + $0x1068] sm:$0xff] }
 0x191   : > { %3604 = vmatpush1.bf16.msra.mxu0 %v3603_v60  ;;  %v871_v60 = vld [vmem:[#allocation2 + $0xe70] sm:$0xff]  ;;  %v901_v48 = vld [vmem:[#allocation2 + $0xf60] sm:$0xff]  ;;  %v5251_v35 = vld [vmem:[%s5209_s4 + $0x8] sm:$0xff] }
 0x192   : > { %4116 = vmatpush1.bf16.msra.mxu1 %v4115_v61  ;;  %3606 = vmatprep.subr.bf16.mxu0 %v3605_v62  ;;  %v874_v61 = vld [vmem:[#allocation2 + $0xe88] sm:$0xff] }
 0x193   : > { %4118 = vmatprep.subr.bf16.mxu1 %v4117_v19  ;;  %v878_v62 = vld [vmem:[#allocation2 + $0xea8] sm:$0xff]  ;;  %v4135_v19 = vpack.c.bf16 %v871_v60, %v867_v57  ;;  %v3639_v57 = vpack.c.bf16 %v901_v48, %v897_v47  ;;  %v935_v47 = vld [vmem:[#allocation2 + $0x1070] sm:$0xff] }
 0x194   : > { %v3625_v4 = vpack.c.bf16 %v878_v62, %v874_v61  ;;  %v905_v61 = vld [vmem:[#allocation2 + $0xf80] sm:$0xff]  ;;  %v938_v48 = vld [vmem:[#allocation2 + $0x1088] sm:$0xff] }
 0x195   : > { %3608 = vmatpush1.bf16.msra.mxu0 %v3607_v11  ;;  %v879_v11 = vld [vmem:[#allocation2 + $0xeb0] sm:$0xff]  ;;  %v909_v62 = vld [vmem:[#allocation2 + $0xfa0] sm:$0xff] }
 0x196   : > { %4120 = vmatpush1.bf16.msra.mxu1 %v4119_v12  ;;  %3610 = vmatprep.subr.bf16.mxu0 %v3609_v13  ;;  %v882_v12 = vld [vmem:[#allocation2 + $0xec8] sm:$0xff] }
 0x197   : > { %4122 = vmatprep.subr.bf16.mxu1 %v4121_v17  ;;  %v886_v13 = vld [vmem:[#allocation2 + $0xee8] sm:$0xff]  ;;  %v4139_v17 = vpack.c.bf16 %v879_v11, %v875_v7  ;;  %v3643_v7 = vpack.c.bf16 %v909_v62, %v905_v61  ;;  %v943_v61 = vld [vmem:[#allocation2 + $0x10b0] sm:$0xff] }
 0x198   : > { %v3629_v18 = vpack.c.bf16 %v886_v13, %v882_v12  ;;  %v913_v12 = vld [vmem:[#allocation2 + $0xfc0] sm:$0xff]  ;;  %v946_v62 = vld [vmem:[#allocation2 + $0x10c8] sm:$0xff] }
 0x199   : > { %3612 = vmatpush1.bf16.msra.mxu0 %v3611_v25  ;;  %v887_v25 = vld [vmem:[#allocation2 + $0xef0] sm:$0xff]  ;;  %v917_v13 = vld [vmem:[#allocation2 + $0xfe0] sm:$0xff] }
 0x19a   : > { %4124 = vmatpush1.bf16.msra.mxu1 %v4123_v26  ;;  %3614 = vmatprep.subr.bf16.mxu0 %v3613_v27  ;;  %v890_v26 = vld [vmem:[#allocation2 + $0xf08] sm:$0xff] }
 0x19b   : > { %4126 = vmatprep.subr.bf16.mxu1 %v4125_v32  ;;  %v894_v27 = vld [vmem:[#allocation2 + $0xf28] sm:$0xff]  ;;  %v4143_v32 = vpack.c.bf16 %v887_v25, %v883_v23  ;;  %v1462_v23 = vsub.s32 6, %v5203_v59 }
 0x19c   : > { %v3633_v33 = vpack.c.bf16 %v894_v27, %v890_v26  ;;  %v921_v27 = vld [vmem:[#allocation2 + $0x1000] sm:$0xff]  ;;  %v2750_v59 = vld [vmem:[#allocation7 + $0x1a8] sm:$0xff] }
 0x19d   : > { %3616 = vmatpush1.bf16.msra.mxu0 %v3615_v38  ;;  %v895_v38 = vld [vmem:[#allocation2 + $0xf30] sm:$0xff] }
 0x19e   : > { %4128 = vmatpush1.bf16.msra.mxu1 %v4127_v39  ;;  %3618 = vmatprep.subr.bf16.mxu0 %v3617_v41  ;;  %v898_v39 = vld [vmem:[#allocation2 + $0xf48] sm:$0xff] }
 0x19f   : > { %4130 = vmatprep.subr.bf16.mxu1 %v4129_v45  ;;  %v902_v41 = vld [vmem:[#allocation2 + $0xf68] sm:$0xff]  ;;  %v4147_v45 = vpack.c.bf16 %v895_v38, %v891_v36  ;;  %v1463_v36 = vrot.slane %v5241_v0, %v1462_v23  ;;  %v936_v38 = vld [vmem:[#allocation2 + $0x1078] sm:$0xff] }
 0x1a0   : > { %v3637_v46 = vpack.c.bf16 %v902_v41, %v898_v39  ;;  %v3651_v39 = vpack.c.bf16 %v925_v28, %v921_v27  ;;  %v940_v0 = vld [vmem:[#allocation2 + $0x1098] sm:$0xff]  ;;  %v959_v27 = vld [vmem:[#allocation2 + $0x1130] sm:$0xff]  ;;  %v962_v28 = vld [vmem:[#allocation2 + $0x1148] sm:$0xff] }
 0x1a1   : > { %3620 = vmatpush1.bf16.msra.mxu0 %v3619_v52  ;;  %v903_v52 = vld [vmem:[#allocation2 + $0xf70] sm:$0xff] }
 0x1a2   : > { %4132 = vmatpush1.bf16.msra.mxu1 %v4131_v53  ;;  %3622 = vmatprep.subr.bf16.mxu0 %v3621_v54  ;;  %v906_v53 = vld [vmem:[#allocation2 + $0xf88] sm:$0xff] }
 0x1a3   : > { %4134 = vmatprep.subr.bf16.mxu1 %v4133_v58  ;;  %v910_v54 = vld [vmem:[#allocation2 + $0xfa8] sm:$0xff]  ;;  %v4151_v58 = vpack.c.bf16 %v903_v52, %v899_v49  ;;  %v944_v52 = vld [vmem:[#allocation2 + $0x10b8] sm:$0xff] }
 0x1a4   : > { %v3641_v60 = vpack.c.bf16 %v910_v54, %v906_v53  ;;  %v942_v49 = vld [vmem:[#allocation2 + $0x10a8] sm:$0xff] }
 0x1a5   : > { %3624 = vmatpush1.bf16.msra.mxu0 %v3623_v3  ;;  %v911_v3 = vld [vmem:[#allocation2 + $0xfb0] sm:$0xff]  ;;  %v3657_v55 = vpack.c.bf16 %v942_v49, %v938_v48 }
 0x1a6   : > { %4136 = vmatpush1.bf16.msra.mxu1 %v4135_v19  ;;  %3626 = vmatprep.subr.bf16.mxu0 %v3625_v4  ;;  %v914_v19 = vld [vmem:[#allocation2 + $0xfc8] sm:$0xff] }
 0x1a7   : > { %4138 = vmatprep.subr.bf16.mxu1 %v4137_v10  ;;  %v918_v4 = vld [vmem:[#allocation2 + $0xfe8] sm:$0xff]  ;;  %v4155_v10 = vpack.c.bf16 %v911_v3, %v907_v1  ;;  %v952_v3 = vld [vmem:[#allocation2 + $0x10f8] sm:$0xff] }
 0x1a8   : > { %v3645_v11 = vpack.c.bf16 %v918_v4, %v914_v19  ;;  %v950_v1 = vld [vmem:[#allocation2 + $0x10e8] sm:$0xff] }
 0x1a9   : > { %3628 = vmatpush1.bf16.msra.mxu0 %v3627_v16  ;;  %v919_v16 = vld [vmem:[#allocation2 + $0xff0] sm:$0xff]  ;;  %v3661_v5 = vpack.c.bf16 %v950_v1, %v946_v62  ;;  %v977_v1 = vld [vmem:[#allocation2 + $0x11c0] sm:$0xff] }
 0x1aa   : > { %4140 = vmatpush1.bf16.msra.mxu1 %v4139_v17  ;;  %3630 = vmatprep.subr.bf16.mxu0 %v3629_v18  ;;  %v922_v17 = vld [vmem:[#allocation2 + $0x1008] sm:$0xff]  ;;  %v4159_v25 = vpack.c.bf16 %v919_v16, %v915_v14  ;;  %v960_v16 = vld [vmem:[#allocation2 + $0x1138] sm:$0xff] }
 0x1ab   : > { %4142 = vmatprep.subr.bf16.mxu1 %v4141_v24  ;;  %v926_v18 = vld [vmem:[#allocation2 + $0x1028] sm:$0xff]  ;;  %v3647_v24 = vpack.c.bf16 %v917_v13, %v913_v12  ;;  %v951_v12 = vld [vmem:[#allocation2 + $0x10f0] sm:$0xff] }
 0x1ac   : > { %v3649_v26 = vpack.c.bf16 %v926_v18, %v922_v17  ;;  %v954_v13 = vld [vmem:[#allocation2 + $0x1108] sm:$0xff] }
 0x1ad   : > { %3632 = vmatpush1.bf16.msra.mxu0 %v3631_v31  ;;  %v4161_v31 = vpack.c.bf16 %v928_v22, %v924_v20  ;;  %v958_v14 = vld [vmem:[#allocation2 + $0x1128] sm:$0xff]  ;;  %v953_v22 = vld [vmem:[#allocation2 + $0x1100] sm:$0xff] }
 0x1ae   : > { %4144 = vmatpush1.bf16.msra.mxu1 %v4143_v32  ;;  %3634 = vmatprep.subr.bf16.mxu0 %v3633_v33  ;;  %v927_v32 = vld [vmem:[#allocation2 + $0x1030] sm:$0xff]  ;;  %v930_v33 = vld [vmem:[#allocation2 + $0x1048] sm:$0xff]  ;;  %v3665_v20 = vpack.c.bf16 %v958_v14, %v954_v13  ;;  %v985_v14 = vld [vmem:[#allocation2 + $0x1200] sm:$0xff] }
 0x1af   : > { %4146 = vmatprep.subr.bf16.mxu1 %v4145_v37  ;;  %v932_v37 = vld [vmem:[#allocation2 + $0x1058] sm:$0xff]  ;;  %v4163_v41 = vpack.c.bf16 %v927_v32, %v923_v30  ;;  %v3653_v42 = vpack.c.bf16 %v934_v34, %v930_v33  ;;  %v966_v30 = vld [vmem:[#allocation2 + $0x1168] sm:$0xff] }
 0x1b0   : > { %v968_v32 = vld [vmem:[#allocation2 + $0x1178] sm:$0xff] }
 0x1b1   : > { %3636 = vmatpush1.bf16.msra.mxu0 %v3635_v44  ;;  %v933_v44 = vld [vmem:[#allocation2 + $0x1060] sm:$0xff] }
 0x1b2   : > { %4148 = vmatpush1.bf16.msra.mxu1 %v4147_v45  ;;  %3638 = vmatprep.subr.bf16.mxu0 %v3637_v46  ;;  %v931_v45 = vld [vmem:[#allocation2 + $0x1050] sm:$0xff]  ;;  %v4165_v46 = vpack.c.bf16 %v936_v38, %v932_v37  ;;  %v3655_v53 = vpack.c.bf16 %v933_v44, %v929_v43  ;;  %v961_v37 = vld [vmem:[#allocation2 + $0x1140] sm:$0xff]  ;;  %v970_v43 = vld [vmem:[#allocation2 + $0x1188] sm:$0xff] }
 0x1b3   : > { %4150 = vmatprep.subr.bf16.mxu1 %v4149_v50  ;;  %v1475_v50 = vrot.slane %v5251_v35, %v5212_v8  ;;  %v4167_v54 = vpack.c.bf16 %v935_v47, %v931_v45  ;;  %v965_v38 = vld [vmem:[#allocation2 + $0x1160] sm:$0xff]  ;;  %v974_v44 = vld [vmem:[#allocation2 + $0x11a8] sm:$0xff]  ;;  %v972_v45 = vld [vmem:[#allocation2 + $0x1198] sm:$0xff] }
 0x1b4   : > { %v3671_v47 = vpack.c.bf16 %v965_v38, %v961_v37  ;;  %v3673_v49 = vpack.c.bf16 %v974_v44, %v970_v43  ;;  %v1006_v37 = vld [vmem:[#allocation2 + $0x12a8] sm:$0xff]  ;;  %v1004_v38 = vld [vmem:[#allocation2 + $0x1298] sm:$0xff]  ;;  %v1001_v44 = vld [vmem:[#allocation2 + $0x1280] sm:$0xff] }
 0x1b5   : > { %3640 = vmatpush1.bf16.msra.mxu0 %v3639_v57  ;;  %v941_v57 = vld [vmem:[#allocation2 + $0x10a0] sm:$0xff] }
 0x1b6   : > { %4152 = vmatpush1.bf16.msra.mxu1 %v4151_v58  ;;  %3642 = vmatprep.subr.bf16.mxu0 %v3641_v60  ;;  %v939_v58 = vld [vmem:[#allocation2 + $0x1090] sm:$0xff]  ;;  %v4169_v60 = vpack.c.bf16 %v944_v52, %v940_v0  ;;  %v3659_v19 = vpack.c.bf16 %v941_v57, %v937_v56  ;;  %v973_v0 = vld [vmem:[#allocation2 + $0x11a0] sm:$0xff]  ;;  %v982_v56 = vld [vmem:[#allocation2 + $0x11e8] sm:$0xff] }
 0x1b7   : > { %4154 = vmatprep.subr.bf16.mxu1 %v4153_v2  ;;  %v948_v2 = vld [vmem:[#allocation2 + $0x10d8] sm:$0xff]  ;;  %v4171_v4 = vpack.c.bf16 %v943_v61, %v939_v58  ;;  %v971_v52 = vld [vmem:[#allocation2 + $0x1190] sm:$0xff] }
 0x1b8   : > { %v980_v57 = vld [vmem:[#allocation2 + $0x11d8] sm:$0xff] }
 0x1b9   : > { %3644 = vmatpush1.bf16.msra.mxu0 %v3643_v7  ;;  %v949_v7 = vld [vmem:[#allocation2 + $0x10e0] sm:$0xff]  ;;  %v984_v58 = vld [vmem:[#allocation2 + $0x11f8] sm:$0xff] }
 0x1ba   : > { %4156 = vmatpush1.bf16.msra.mxu1 %v4155_v10  ;;  %3646 = vmatprep.subr.bf16.mxu0 %v3645_v11  ;;  %v947_v10 = vld [vmem:[#allocation2 + $0x10d0] sm:$0xff]  ;;  %v4173_v11 = vpack.c.bf16 %v952_v3, %v948_v2  ;;  %v3663_v17 = vpack.c.bf16 %v949_v7, %v945_v6  ;;  %v981_v2 = vld [vmem:[#allocation2 + $0x11e0] sm:$0xff]  ;;  %v990_v6 = vld [vmem:[#allocation2 + $0x1228] sm:$0xff] }
 0x1bb   : > { %4158 = vmatprep.subr.bf16.mxu1 %v4157_v15  ;;  %v956_v15 = vld [vmem:[#allocation2 + $0x1118] sm:$0xff]  ;;  %v4175_v18 = vpack.c.bf16 %v951_v12, %v947_v10  ;;  %v979_v3 = vld [vmem:[#allocation2 + $0x11d0] sm:$0xff] }
 0x1bc   : > { %v988_v7 = vld [vmem:[#allocation2 + $0x1218] sm:$0xff] }
 0x1bd   : > { %3648 = vmatpush1.bf16.msra.mxu0 %v3647_v24  ;;  %v957_v24 = vld [vmem:[#allocation2 + $0x1120] sm:$0xff]  ;;  %v992_v10 = vld [vmem:[#allocation2 + $0x1238] sm:$0xff] }
 0x1be   : > { %4160 = vmatpush1.bf16.msra.mxu1 %v4159_v25  ;;  %3650 = vmatprep.subr.bf16.mxu0 %v3649_v26  ;;  %v955_v25 = vld [vmem:[#allocation2 + $0x1110] sm:$0xff]  ;;  %v4177_v26 = vpack.c.bf16 %v960_v16, %v956_v15  ;;  %v3667_v33 = vpack.c.bf16 %v957_v24, %v953_v22  ;;  %v989_v15 = vld [vmem:[#allocation2 + $0x1220] sm:$0xff]  ;;  %v998_v22 = vld [vmem:[#allocation2 + $0x1268] sm:$0xff] }
 0x1bf   : > { %4162 = vmatprep.subr.bf16.mxu1 %v4161_v31  ;;  %v964_v31 = vld [vmem:[#allocation2 + $0x1158] sm:$0xff]  ;;  %v4179_v34 = vpack.c.bf16 %v959_v27, %v955_v25  ;;  %v987_v16 = vld [vmem:[#allocation2 + $0x1210] sm:$0xff] }
 0x1c0   : > { %1815 = vmatmul.mubr.f32.vlgmr.msra.gmra.mrb[0].mxu0 %v1463_v36  ;;  %v996_v24 = vld [vmem:[#allocation2 + $0x1258] sm:$0xff] }
 0x1c1   : > { %3652 = vmatpush1.bf16.msra.mxu0 %v3651_v39  ;;  %2383 = vmatmul.mubr.f32.vlgmr.msra.gmra.mrb[0].mxu1 %v1463_v36  ;;  %v3669_v36 = vpack.c.bf16 %v966_v30, %v962_v28  ;;  %v963_v39 = vld [vmem:[#allocation2 + $0x1150] sm:$0xff]  ;;  %v1000_v25 = vld [vmem:[#allocation2 + $0x1278] sm:$0xff]  ;;  %v993_v30 = vld [vmem:[#allocation2 + $0x1240] sm:$0xff] }
 0x1c2   : > { %4164 = vmatpush1.bf16.msra.mxu1 %v4163_v41  ;;  %3654 = vmatprep.subr.bf16.mxu0 %v3653_v42  ;;  %v4181_v41 = vpack.c.bf16 %v968_v32, %v964_v31  ;;  %v967_v42 = vld [vmem:[#allocation2 + $0x1170] sm:$0xff]  ;;  %v997_v31 = vld [vmem:[#allocation2 + $0x1260] sm:$0xff] }
 0x1c3   : > { %4166 = vmatprep.subr.bf16.mxu1 %v4165_v46  ;;  %1885 = vmatprep.mubr.f32.mxu0 %v1475_v50  ;;  %v976_v46 = vld [vmem:[#allocation2 + $0x11b8] sm:$0xff]  ;;  %v4183_v48 = vpack.c.bf16 %v967_v42, %v963_v39  ;;  %v995_v32 = vld [vmem:[#allocation2 + $0x1250] sm:$0xff] }
 0x1c4   : > { %2453 = vmatprep.mubr.f32.mxu1 %v1475_v50  ;;  %v969_v50 = vld [vmem:[#allocation2 + $0x1180] sm:$0xff]  ;;  %v1008_v39 = vld [vmem:[#allocation2 + $0x12b8] sm:$0xff] }
 0x1c5   : > { %3656 = vmatpush1.bf16.msra.mxu0 %v3655_v53  ;;  %v4185_v53 = vpack.c.bf16 %v976_v46, %v972_v45  ;;  %v1005_v45 = vld [vmem:[#allocation2 + $0x12a0] sm:$0xff]  ;;  %v1003_v46 = vld [vmem:[#allocation2 + $0x1290] sm:$0xff] }
 0x1c6   : > { %4168 = vmatpush1.bf16.msra.mxu1 %v4167_v54  ;;  %3658 = vmatprep.subr.bf16.mxu0 %v3657_v55  ;;  %v975_v54 = vld [vmem:[#allocation2 + $0x11b0] sm:$0xff]  ;;  %v978_v55 = vld [vmem:[#allocation2 + $0x11c8] sm:$0xff] }
 0x1c7   : > { %4170 = vmatprep.subr.bf16.mxu1 %v4169_v60  ;;  %v3675_v60 = vpack.c.bf16 %v973_v0, %v969_v50  ;;  %v4187_v61 = vpack.c.bf16 %v975_v54, %v971_v52  ;;  %v3677_v62 = vpack.c.bf16 %v982_v56, %v978_v55  ;;  %v1014_v50 = vld [vmem:[#allocation2 + $0x12e8] sm:$0xff]  ;;  %v1012_v0 = vld [vmem:[#allocation2 + $0x12d8] sm:$0xff]  ;;  %v1009_v56 = vld [vmem:[#allocation2 + $0x12c0] sm:$0xff] }
 0x1c8   : > { %v1016_v52 = vld [vmem:[#allocation2 + $0x12f8] sm:$0xff] }
 0x1c9   : > { %3660 = vmatpush1.bf16.msra.mxu0 %v3659_v19  ;;  %v4189_v19 = vpack.c.bf16 %v984_v58, %v980_v57  ;;  %v1013_v57 = vld [vmem:[#allocation2 + $0x12e0] sm:$0xff]  ;;  %v1011_v58 = vld [vmem:[#allocation2 + $0x12d0] sm:$0xff] }
 0x1ca   : > { %4172 = vmatpush1.bf16.msra.mxu1 %v4171_v4  ;;  %3662 = vmatprep.subr.bf16.mxu0 %v3661_v5  ;;  %v983_v4 = vld [vmem:[#allocation2 + $0x11f0] sm:$0xff]  ;;  %v986_v5 = vld [vmem:[#allocation2 + $0x1208] sm:$0xff] }
 0x1cb   : > { %4174 = vmatprep.subr.bf16.mxu1 %v4173_v11  ;;  %v3679_v11 = vpack.c.bf16 %v981_v2, %v977_v1  ;;  %v4191_v12 = vpack.c.bf16 %v983_v4, %v979_v3  ;;  %v3681_v13 = vpack.c.bf16 %v990_v6, %v986_v5  ;;  %v1022_v1 = vld [vmem:[#allocation2 + $0x1328] sm:$0xff]  ;;  %v1020_v2 = vld [vmem:[#allocation2 + $0x1318] sm:$0xff]  ;;  %v1017_v6 = vld [vmem:[#allocation2 + $0x1300] sm:$0xff] }
 0x1cc   : > { %v1024_v3 = vld [vmem:[#allocation2 + $0x1338] sm:$0xff] }
 0x1cd   : > { %3664 = vmatpush1.bf16.msra.mxu0 %v3663_v17  ;;  %v4193_v17 = vpack.c.bf16 %v992_v10, %v988_v7  ;;  %v1021_v7 = vld [vmem:[#allocation2 + $0x1320] sm:$0xff]  ;;  %v1019_v10 = vld [vmem:[#allocation2 + $0x1310] sm:$0xff] }
 0x1ce   : > { %4176 = vmatpush1.bf16.msra.mxu1 %v4175_v18  ;;  %3666 = vmatprep.subr.bf16.mxu0 %v3665_v20  ;;  %v991_v18 = vld [vmem:[#allocation2 + $0x1230] sm:$0xff]  ;;  %v994_v20 = vld [vmem:[#allocation2 + $0x1248] sm:$0xff] }
 0x1cf   : > { %4178 = vmatprep.subr.bf16.mxu1 %v4177_v26  ;;  %v3683_v26 = vpack.c.bf16 %v989_v15, %v985_v14  ;;  %v4195_v27 = vpack.c.bf16 %v991_v18, %v987_v16  ;;  %v3685_v28 = vpack.c.bf16 %v998_v22, %v994_v20  ;;  %v1030_v14 = vld [vmem:[#allocation2 + $0x1368] sm:$0xff]  ;;  %v1028_v15 = vld [vmem:[#allocation2 + $0x1358] sm:$0xff]  ;;  %v1025_v22 = vld [vmem:[#allocation2 + $0x1340] sm:$0xff] }
 0x1d0   : > { %v1032_v16 = vld [vmem:[#allocation2 + $0x1378] sm:$0xff] }
 0x1d1   : > { %3668 = vmatpush1.bf16.msra.mxu0 %v3667_v33  ;;  %v4197_v33 = vpack.c.bf16 %v1000_v25, %v996_v24  ;;  %v1029_v24 = vld [vmem:[#allocation2 + $0x1360] sm:$0xff]  ;;  %v1027_v25 = vld [vmem:[#allocation2 + $0x1350] sm:$0xff] }
 0x1d2   : > { %4180 = vmatpush1.bf16.msra.mxu1 %v4179_v34  ;;  %3670 = vmatprep.subr.bf16.mxu0 %v3669_v36  ;;  %v999_v34 = vld [vmem:[#allocation2 + $0x1270] sm:$0xff]  ;;  %v1002_v36 = vld [vmem:[#allocation2 + $0x1288] sm:$0xff] }
 0x1d3   : > { %4182 = vmatprep.subr.bf16.mxu1 %v4181_v41  ;;  %v3687_v41 = vpack.c.bf16 %v997_v31, %v993_v30  ;;  %v4199_v42 = vpack.c.bf16 %v999_v34, %v995_v32  ;;  %v3689_v43 = vpack.c.bf16 %v1006_v37, %v1002_v36  ;;  %v1038_v30 = vld [vmem:[#allocation2 + $0x13a8] sm:$0xff]  ;;  %v1036_v31 = vld [vmem:[#allocation2 + $0x1398] sm:$0xff]  ;;  %v1033_v37 = vld [vmem:[#allocation2 + $0x1380] sm:$0xff] }
 0x1d4   : > { %v1040_v32 = vld [vmem:[#allocation2 + $0x13b8] sm:$0xff] }
 0x1d5   : > { %3672 = vmatpush1.bf16.msra.mxu0 %v3671_v47  ;;  %v4201_v47 = vpack.c.bf16 %v1008_v39, %v1004_v38  ;;  %v1037_v38 = vld [vmem:[#allocation2 + $0x13a0] sm:$0xff]  ;;  %v1035_v39 = vld [vmem:[#allocation2 + $0x1390] sm:$0xff] }
 0x1d6   : > { %4184 = vmatpush1.bf16.msra.mxu1 %v4183_v48  ;;  %3674 = vmatprep.subr.bf16.mxu0 %v3673_v49  ;;  %v1007_v48 = vld [vmem:[#allocation2 + $0x12b0] sm:$0xff]  ;;  %v1010_v49 = vld [vmem:[#allocation2 + $0x12c8] sm:$0xff] }
 0x1d7   : > { %4186 = vmatprep.subr.bf16.mxu1 %v4185_v53  ;;  %v3691_v53 = vpack.c.bf16 %v1005_v45, %v1001_v44  ;;  %v4203_v54 = vpack.c.bf16 %v1007_v48, %v1003_v46  ;;  %v3693_v55 = vpack.c.bf16 %v1014_v50, %v1010_v49  ;;  %v1046_v44 = vld [vmem:[#allocation2 + $0x13e8] sm:$0xff]  ;;  %v1044_v45 = vld [vmem:[#allocation2 + $0x13d8] sm:$0xff]  ;;  %v1041_v50 = vld [vmem:[#allocation2 + $0x13c0] sm:$0xff] }
 0x1d8   : > { %v1048_v46 = vld [vmem:[#allocation2 + $0x13f8] sm:$0xff] }
 0x1d9   : > { %3676 = vmatpush1.bf16.msra.mxu0 %v3675_v60  ;;  %v4205_v60 = vpack.c.bf16 %v1016_v52, %v1012_v0  ;;  %v1045_v0 = vld [vmem:[#allocation2 + $0x13e0] sm:$0xff]  ;;  %v1043_v52 = vld [vmem:[#allocation2 + $0x13d0] sm:$0xff] }
 0x1da   : > { %4188 = vmatpush1.bf16.msra.mxu1 %v4187_v61  ;;  %3678 = vmatprep.subr.bf16.mxu0 %v3677_v62  ;;  %v1015_v61 = vld [vmem:[#allocation2 + $0x12f0] sm:$0xff]  ;;  %v1018_v62 = vld [vmem:[#allocation2 + $0x1308] sm:$0xff] }
 0x1db   : > { %4190 = vmatprep.subr.bf16.mxu1 %v4189_v19  ;;  %v3695_v19 = vpack.c.bf16 %v1013_v57, %v1009_v56  ;;  %v4207_v4 = vpack.c.bf16 %v1015_v61, %v1011_v58  ;;  %v3697_v5 = vpack.c.bf16 %v1022_v1, %v1018_v62  ;;  %v1054_v56 = vld [vmem:[#allocation2 + $0x1428] sm:$0xff]  ;;  %v1052_v57 = vld [vmem:[#allocation2 + $0x1418] sm:$0xff]  ;;  %v1049_v1 = vld [vmem:[#allocation2 + $0x1400] sm:$0xff] }
 0x1dc   : > { %v1056_v58 = vld [vmem:[#allocation2 + $0x1438] sm:$0xff] }
 0x1dd   : > { %3680 = vmatpush1.bf16.msra.mxu0 %v3679_v11  ;;  %v4209_v11 = vpack.c.bf16 %v1024_v3, %v1020_v2  ;;  %v1053_v2 = vld [vmem:[#allocation2 + $0x1420] sm:$0xff]  ;;  %v1051_v3 = vld [vmem:[#allocation2 + $0x1410] sm:$0xff] }
 0x1de   : > { %4192 = vmatpush1.bf16.msra.mxu1 %v4191_v12  ;;  %3682 = vmatprep.subr.bf16.mxu0 %v3681_v13  ;;  %v1023_v12 = vld [vmem:[#allocation2 + $0x1330] sm:$0xff]  ;;  %v1026_v13 = vld [vmem:[#allocation2 + $0x1348] sm:$0xff] }
 0x1df   : > { %4194 = vmatprep.subr.bf16.mxu1 %v4193_v17  ;;  %v3699_v17 = vpack.c.bf16 %v1021_v7, %v1017_v6  ;;  %v4211_v18 = vpack.c.bf16 %v1023_v12, %v1019_v10  ;;  %v3701_v20 = vpack.c.bf16 %v1030_v14, %v1026_v13  ;;  %v1062_v6 = vld [vmem:[#allocation2 + $0x1468] sm:$0xff]  ;;  %v1471_v7 = vrot.slane %v5251_v35, %v5220_v9  ;;  %v1060_v10 = vld [vmem:[#allocation2 + $0x1458] sm:$0xff] }
 0x1e0   : > { %v3715_v12 = vpack.c.bf16 %v1053_v2, %v1049_v1  ;;  %v1090_v1 = vld [vmem:[#allocation2 + $0x1548] sm:$0xff] }
 0x1e1   : > { %3684 = vmatpush1.bf16.msra.mxu0 %v3683_v26  ;;  %v4213_v26 = vpack.c.bf16 %v1032_v16, %v1028_v15  ;;  %v1057_v15 = vld [vmem:[#allocation2 + $0x1440] sm:$0xff]  ;;  %v1094_v2 = vld [vmem:[#allocation2 + $0x1568] sm:$0xff] }
 0x1e2   : > { %4196 = vmatpush1.bf16.msra.mxu1 %v4195_v27  ;;  %3686 = vmatprep.subr.bf16.mxu0 %v3685_v28  ;;  %v1031_v27 = vld [vmem:[#allocation2 + $0x1370] sm:$0xff]  ;;  %v1034_v28 = vld [vmem:[#allocation2 + $0x1388] sm:$0xff]  ;;  %v1061_v16 = vld [vmem:[#allocation2 + $0x1460] sm:$0xff] }
 0x1e3   : > { %4198 = vmatprep.subr.bf16.mxu1 %v4197_v33  ;;  %v3703_v33 = vpack.c.bf16 %v1029_v24, %v1025_v22  ;;  %v4215_v34 = vpack.c.bf16 %v1031_v27, %v1027_v25  ;;  %v3705_v36 = vpack.c.bf16 %v1038_v30, %v1034_v28  ;;  %v1066_v22 = vld [vmem:[#allocation2 + $0x1488] sm:$0xff]  ;;  %v1483_v25 = vrot.slane %v5251_v35, %v5223_v21  ;;  %v1072_v27 = vld [vmem:[#allocation2 + $0x14b8] sm:$0xff] }
 0x1e4   : > { %v1070_v24 = vld [vmem:[#allocation2 + $0x14a8] sm:$0xff]  ;;  %v3719_v28 = vpack.c.bf16 %v1061_v16, %v1057_v15  ;;  %v1076_v35 = vld [vmem:[#allocation2 + $0x14d8] sm:$0xff] }
 0x1e5   : > { %3688 = vmatpush1.bf16.msra.mxu0 %v3687_v41  ;;  %v4217_v41 = vpack.c.bf16 %v1040_v32, %v1036_v31  ;;  %v3721_v31 = vpack.c.bf16 %v1070_v24, %v1066_v22  ;;  %v1065_v32 = vld [vmem:[#allocation2 + $0x1480] sm:$0xff]  ;;  %v1102_v15 = vld [vmem:[#allocation2 + $0x15a8] sm:$0xff]  ;;  %v1100_v16 = vld [vmem:[#allocation2 + $0x1598] sm:$0xff] }
 0x1e6   : > { %4200 = vmatpush1.bf16.msra.mxu1 %v4199_v42  ;;  %3690 = vmatprep.subr.bf16.mxu0 %v3689_v43  ;;  %v1039_v42 = vld [vmem:[#allocation2 + $0x13b0] sm:$0xff]  ;;  %v1042_v43 = vld [vmem:[#allocation2 + $0x13c8] sm:$0xff]  ;;  %v1097_v24 = vld [vmem:[#allocation2 + $0x1580] sm:$0xff] }
 0x1e7   : > { %4202 = vmatprep.subr.bf16.mxu1 %v4201_v47  ;;  %v3707_v47 = vpack.c.bf16 %v1037_v38, %v1033_v37  ;;  %v4219_v48 = vpack.c.bf16 %v1039_v42, %v1035_v39  ;;  %v3709_v49 = vpack.c.bf16 %v1046_v44, %v1042_v43  ;;  %v1071_v37 = vld [vmem:[#allocation2 + $0x14b0] sm:$0xff]  ;;  %v1074_v38 = vld [vmem:[#allocation2 + $0x14c8] sm:$0xff] }
 0x1e8   : > { %v1078_v39 = vld [vmem:[#allocation2 + $0x14e8] sm:$0xff] }
 0x1e9   : > { %3692 = vmatpush1.bf16.msra.mxu0 %v3691_v53  ;;  %v4221_v53 = vpack.c.bf16 %v1048_v46, %v1044_v45  ;;  %v3725_v44 = vpack.c.bf16 %v1078_v39, %v1074_v38  ;;  %v1073_v45 = vld [vmem:[#allocation2 + $0x14c0] sm:$0xff] }
 0x1ea   : > { %4204 = vmatpush1.bf16.msra.mxu1 %v4203_v54  ;;  %3694 = vmatprep.subr.bf16.mxu0 %v3693_v55  ;;  %v1047_v54 = vld [vmem:[#allocation2 + $0x13f0] sm:$0xff]  ;;  %v1050_v55 = vld [vmem:[#allocation2 + $0x1408] sm:$0xff]  ;;  %v1077_v46 = vld [vmem:[#allocation2 + $0x14e0] sm:$0xff] }
 0x1eb   : > { %4206 = vmatprep.subr.bf16.mxu1 %v4205_v60  ;;  %v3711_v60 = vpack.c.bf16 %v1045_v0, %v1041_v50  ;;  %v4223_v61 = vpack.c.bf16 %v1047_v54, %v1043_v52  ;;  %v3713_v62 = vpack.c.bf16 %v1054_v56, %v1050_v55  ;;  %v1082_v50 = vld [vmem:[#allocation2 + $0x1508] sm:$0xff]  ;;  %v1084_v52 = vld [vmem:[#allocation2 + $0x1518] sm:$0xff]  ;;  %v3727_v54 = vpack.c.bf16 %v1077_v46, %v1073_v45  ;;  %v1105_v38 = vld [vmem:[#allocation2 + $0x15c0] sm:$0xff] }
 0x1ec   : > { %v1086_v0 = vld [vmem:[#allocation2 + $0x1528] sm:$0xff]  ;;  %v1109_v39 = vld [vmem:[#allocation2 + $0x15e0] sm:$0xff]  ;;  %v1116_v45 = vld [vmem:[#allocation2 + $0x1618] sm:$0xff] }
 0x1ed   : > { %3696 = vmatpush1.bf16.msra.mxu0 %v3695_v19  ;;  %v4225_v19 = vpack.c.bf16 %v1056_v58, %v1052_v57  ;;  %v3729_v56 = vpack.c.bf16 %v1086_v0, %v1082_v50  ;;  %v1081_v57 = vld [vmem:[#allocation2 + $0x1500] sm:$0xff]  ;;  %v1120_v46 = vld [vmem:[#allocation2 + $0x1638] sm:$0xff] }
 0x1ee   : > { %4208 = vmatpush1.bf16.msra.mxu1 %v4207_v4  ;;  %3698 = vmatprep.subr.bf16.mxu0 %v3697_v5  ;;  %v1055_v4 = vld [vmem:[#allocation2 + $0x1430] sm:$0xff]  ;;  %v1058_v5 = vld [vmem:[#allocation2 + $0x1448] sm:$0xff]  ;;  %v1085_v58 = vld [vmem:[#allocation2 + $0x1520] sm:$0xff] }
 0x1ef   : > { %4210 = vmatprep.subr.bf16.mxu1 %v4209_v11  ;;  %v1064_v11 = vld [vmem:[#allocation2 + $0x1478] sm:$0xff]  ;;  %v4227_v13 = vpack.c.bf16 %v1055_v4, %v1051_v3  ;;  %v3717_v14 = vpack.c.bf16 %v1062_v6, %v1058_v5  ;;  %v3731_v4 = vpack.c.bf16 %v1085_v58, %v1081_v57  ;;  %v3733_v6 = vpack.c.bf16 %v1094_v2, %v1090_v1  ;;  %v1113_v50 = vld [vmem:[#allocation2 + $0x1600] sm:$0xff] }
 0x1f0   : > { %v1092_v3 = vld [vmem:[#allocation2 + $0x1558] sm:$0xff]  ;;  %v1117_v0 = vld [vmem:[#allocation2 + $0x1620] sm:$0xff] }
 0x1f1   : > { %3700 = vmatpush1.bf16.msra.mxu0 %v3699_v17  ;;  %v1059_v17 = vld [vmem:[#allocation2 + $0x1450] sm:$0xff]  ;;  %v1124_v57 = vld [vmem:[#allocation2 + $0x1658] sm:$0xff]  ;;  %v1121_v1 = vld [vmem:[#allocation2 + $0x1640] sm:$0xff] }
 0x1f2   : > { %4212 = vmatpush1.bf16.msra.mxu1 %v4211_v18  ;;  %3702 = vmatprep.subr.bf16.mxu0 %v3701_v20  ;;  %v4229_v18 = vpack.c.bf16 %v1064_v11, %v1060_v10  ;;  %v1063_v20 = vld [vmem:[#allocation2 + $0x1470] sm:$0xff]  ;;  %v1093_v10 = vld [vmem:[#allocation2 + $0x1560] sm:$0xff]  ;;  %v1128_v58 = vld [vmem:[#allocation2 + $0x1678] sm:$0xff] }
 0x1f3   : > { %4214 = vmatprep.subr.bf16.mxu1 %v4213_v26  ;;  %v1068_v26 = vld [vmem:[#allocation2 + $0x1498] sm:$0xff]  ;;  %v4231_v30 = vpack.c.bf16 %v1063_v20, %v1059_v17  ;;  %v1091_v11 = vld [vmem:[#allocation2 + $0x1550] sm:$0xff]  ;;  %v1125_v2 = vld [vmem:[#allocation2 + $0x1660] sm:$0xff] }
 0x1f4   : > { %v1104_v17 = vld [vmem:[#allocation2 + $0x15b8] sm:$0xff] }
 0x1f5   : > { %3704 = vmatpush1.bf16.msra.mxu0 %v3703_v33  ;;  %v1069_v33 = vld [vmem:[#allocation2 + $0x14a0] sm:$0xff] }
 0x1f6   : > { %4216 = vmatpush1.bf16.msra.mxu1 %v4215_v34  ;;  %3706 = vmatprep.subr.bf16.mxu0 %v3705_v36  ;;  %v1067_v34 = vld [vmem:[#allocation2 + $0x1490] sm:$0xff]  ;;  %v4233_v36 = vpack.c.bf16 %v1072_v27, %v1068_v26  ;;  %v3723_v42 = vpack.c.bf16 %v1069_v33, %v1065_v32  ;;  %v4249_v27 = vpack.c.bf16 %v1104_v17, %v1100_v16  ;;  %v1108_v32 = vld [vmem:[#allocation2 + $0x15d8] sm:$0xff] }
 0x1f7   : > { %4218 = vmatprep.subr.bf16.mxu1 %v4217_v41  ;;  %v1080_v41 = vld [vmem:[#allocation2 + $0x14f8] sm:$0xff]  ;;  %v4235_v43 = vpack.c.bf16 %v1071_v37, %v1067_v34  ;;  %v1099_v26 = vld [vmem:[#allocation2 + $0x1590] sm:$0xff] }
 0x1f8   : > { %v1112_v33 = vld [vmem:[#allocation2 + $0x15f8] sm:$0xff]  ;;  %v1131_v16 = vld [vmem:[#allocation2 + $0x1690] sm:$0xff] }
 0x1f9   : > { %3708 = vmatpush1.bf16.msra.mxu0 %v3707_v47  ;;  %v1075_v47 = vld [vmem:[#allocation2 + $0x14d0] sm:$0xff] }
 0x1fa   : > { %4220 = vmatpush1.bf16.msra.mxu1 %v4219_v48  ;;  %3710 = vmatprep.subr.bf16.mxu0 %v3709_v49  ;;  %v4237_v48 = vpack.c.bf16 %v1080_v41, %v1076_v35  ;;  %v1079_v49 = vld [vmem:[#allocation2 + $0x14f0] sm:$0xff]  ;;  %v4253_v41 = vpack.c.bf16 %v1112_v33, %v1108_v32 }
 0x1fb   : > { %4222 = vmatprep.subr.bf16.mxu1 %v4221_v53  ;;  %v1088_v53 = vld [vmem:[#allocation2 + $0x1538] sm:$0xff]  ;;  %v4239_v55 = vpack.c.bf16 %v1079_v49, %v1075_v47  ;;  %v1107_v35 = vld [vmem:[#allocation2 + $0x15d0] sm:$0xff]  ;;  %v3743_v47 = vpack.c.bf16 %v1109_v39, %v1105_v38 }
 0x1fc   : > { %v1139_v32 = vld [vmem:[#allocation2 + $0x16d0] sm:$0xff]  ;;  %v1148_v38 = vld [vmem:[#allocation2 + $0x1718] sm:$0xff] }
 0x1fd   : > { %3712 = vmatpush1.bf16.msra.mxu0 %v3711_v60  ;;  %v1083_v60 = vld [vmem:[#allocation2 + $0x1510] sm:$0xff]  ;;  %v1152_v39 = vld [vmem:[#allocation2 + $0x1738] sm:$0xff] }
 0x1fe   : > { %4224 = vmatpush1.bf16.msra.mxu1 %v4223_v61  ;;  %3714 = vmatprep.subr.bf16.mxu0 %v3713_v62  ;;  %v4241_v61 = vpack.c.bf16 %v1088_v53, %v1084_v52  ;;  %v1087_v62 = vld [vmem:[#allocation2 + $0x1530] sm:$0xff]  ;;  %v4257_v53 = vpack.c.bf16 %v1120_v46, %v1116_v45  ;;  %v4273_v46 = vpack.c.bf16 %v1152_v39, %v1148_v38 }
 0x1ff   : > { %4226 = vmatprep.subr.bf16.mxu1 %v4225_v19  ;;  %v1096_v19 = vld [vmem:[#allocation2 + $0x1578] sm:$0xff]  ;;  %v4243_v5 = vpack.c.bf16 %v1087_v62, %v1083_v60  ;;  %v1115_v52 = vld [vmem:[#allocation2 + $0x1610] sm:$0xff]  ;;  %v3747_v60 = vpack.c.bf16 %v1117_v0, %v1113_v50 }
 0x200   : > { %1886 = vmatmul.mubr.f32.vlgmr.msra.gmra.mrb[0].mxu0 %v1471_v7  ;;  %v1147_v45 = vld [vmem:[#allocation2 + $0x1710] sm:$0xff]  ;;  %v1156_v50 = vld [vmem:[#allocation2 + $0x1758] sm:$0xff] }
 0x201   : > { %3716 = vmatpush1.bf16.msra.mxu0 %v3715_v12  ;;  %2454 = vmatmul.mubr.f32.vlgmr.msra.gmra.mrb[0].mxu1 %v1471_v7  ;;  %v1089_v7 = vld [vmem:[#allocation2 + $0x1540] sm:$0xff]  ;;  %v4245_v12 = vpack.c.bf16 %v1096_v19, %v1092_v3  ;;  %v1123_v3 = vld [vmem:[#allocation2 + $0x1650] sm:$0xff]  ;;  %v4261_v19 = vpack.c.bf16 %v1128_v58, %v1124_v57  ;;  %v1160_v0 = vld [vmem:[#allocation2 + $0x1778] sm:$0xff] }
 0x202   : > { %4228 = vmatpush1.bf16.msra.mxu1 %v4227_v13  ;;  %3718 = vmatprep.subr.bf16.mxu0 %v3717_v14  ;;  %v1095_v13 = vld [vmem:[#allocation2 + $0x1570] sm:$0xff]  ;;  %v1098_v14 = vld [vmem:[#allocation2 + $0x1588] sm:$0xff]  ;;  %v4277_v58 = vpack.c.bf16 %v1160_v0, %v1156_v50  ;;  %v1185_v50 = vld [vmem:[#allocation2 + $0x1840] sm:$0xff] }
 0x203   : > { %4230 = vmatprep.subr.bf16.mxu1 %v4229_v18  ;;  %1956 = vmatprep.mubr.f32.mxu0 %v1483_v25  ;;  %v3735_v18 = vpack.c.bf16 %v1093_v10, %v1089_v7  ;;  %v4247_v20 = vpack.c.bf16 %v1095_v13, %v1091_v11  ;;  %v3737_v22 = vpack.c.bf16 %v1102_v15, %v1098_v14  ;;  %v1132_v7 = vld [vmem:[#allocation2 + $0x1698] sm:$0xff]  ;;  %v1129_v14 = vld [vmem:[#allocation2 + $0x1680] sm:$0xff]  ;;  %v1155_v57 = vld [vmem:[#allocation2 + $0x1750] sm:$0xff] }
 0x204   : > { %2524 = vmatprep.mubr.f32.mxu1 %v1483_v25  ;;  %v1101_v25 = vld [vmem:[#allocation2 + $0x15a0] sm:$0xff]  ;;  %v1136_v10 = vld [vmem:[#allocation2 + $0x16b8] sm:$0xff]  ;;  %v3751_v11 = vpack.c.bf16 %v1125_v2, %v1121_v1  ;;  %v1179_v38 = vld [vmem:[#allocation2 + $0x1810] sm:$0xff] }
 0x205   : > { %3720 = vmatpush1.bf16.msra.mxu0 %v3719_v28  ;;  %v1103_v28 = vld [vmem:[#allocation2 + $0x15b0] sm:$0xff]  ;;  %v3739_v34 = vpack.c.bf16 %v1101_v25, %v1097_v24  ;;  %v1133_v15 = vld [vmem:[#allocation2 + $0x16a0] sm:$0xff]  ;;  %v4265_v17 = vpack.c.bf16 %v1136_v10, %v1132_v7  ;;  %v1140_v24 = vld [vmem:[#allocation2 + $0x16d8] sm:$0xff] }
 0x206   : > { %4232 = vmatpush1.bf16.msra.mxu1 %v4231_v30  ;;  %3722 = vmatprep.subr.bf16.mxu0 %v3721_v31  ;;  %v1106_v30 = vld [vmem:[#allocation2 + $0x15c8] sm:$0xff]  ;;  %v1144_v25 = vld [vmem:[#allocation2 + $0x16f8] sm:$0xff]  ;;  %v1163_v7 = vld [vmem:[#allocation2 + $0x1790] sm:$0xff] }
 0x207   : > { %4234 = vmatprep.subr.bf16.mxu1 %v4233_v36  ;;  %v1110_v31 = vld [vmem:[#allocation2 + $0x15e8] sm:$0xff]  ;;  %v4251_v36 = vpack.c.bf16 %v1103_v28, %v1099_v26  ;;  %v3755_v26 = vpack.c.bf16 %v1133_v15, %v1129_v14  ;;  %v4269_v33 = vpack.c.bf16 %v1144_v25, %v1140_v24  ;;  %v1164_v1 = vld [vmem:[#allocation2 + $0x1798] sm:$0xff]  ;;  %v1171_v24 = vld [vmem:[#allocation2 + $0x17d0] sm:$0xff] }
 0x208   : > { %v3741_v37 = vpack.c.bf16 %v1110_v31, %v1106_v30  ;;  %v1137_v30 = vld [vmem:[#allocation2 + $0x16c0] sm:$0xff]  ;;  %v1168_v2 = vld [vmem:[#allocation2 + $0x17b8] sm:$0xff] }
 0x209   : > { %3724 = vmatpush1.bf16.msra.mxu0 %v3723_v42  ;;  %v1111_v42 = vld [vmem:[#allocation2 + $0x15f0] sm:$0xff]  ;;  %v1141_v31 = vld [vmem:[#allocation2 + $0x16e0] sm:$0xff]  ;;  %v4281_v10 = vpack.c.bf16 %v1168_v2, %v1164_v1  ;;  %v1172_v14 = vld [vmem:[#allocation2 + $0x17d8] sm:$0xff] }
 0x20a   : > { %4236 = vmatpush1.bf16.msra.mxu1 %v4235_v43  ;;  %3726 = vmatprep.subr.bf16.mxu0 %v3725_v44  ;;  %v1114_v43 = vld [vmem:[#allocation2 + $0x1608] sm:$0xff]  ;;  %v1176_v15 = vld [vmem:[#allocation2 + $0x17f8] sm:$0xff]  ;;  %v1189_v0 = vld [vmem:[#allocation2 + $0x1860] sm:$0xff] }
 0x20b   : > { %4238 = vmatprep.subr.bf16.mxu1 %v4237_v48  ;;  %v1118_v44 = vld [vmem:[#allocation2 + $0x1628] sm:$0xff]  ;;  %v4255_v48 = vpack.c.bf16 %v1111_v42, %v1107_v35  ;;  %v3759_v35 = vpack.c.bf16 %v1141_v31, %v1137_v30  ;;  %v4285_v25 = vpack.c.bf16 %v1176_v15, %v1172_v14  ;;  %v1180_v30 = vld [vmem:[#allocation2 + $0x1818] sm:$0xff]  ;;  %v1193_v2 = vld [vmem:[#allocation2 + $0x1880] sm:$0xff] }
 0x20c   : > { %v3745_v49 = vpack.c.bf16 %v1118_v44, %v1114_v43  ;;  %v1145_v43 = vld [vmem:[#allocation2 + $0x1700] sm:$0xff]  ;;  %v1184_v31 = vld [vmem:[#allocation2 + $0x1838] sm:$0xff] }
 0x20d   : > { %3728 = vmatpush1.bf16.msra.mxu0 %v3727_v54  ;;  %v1119_v54 = vld [vmem:[#allocation2 + $0x1630] sm:$0xff]  ;;  %v1149_v44 = vld [vmem:[#allocation2 + $0x1720] sm:$0xff]  ;;  %v4289_v39 = vpack.c.bf16 %v1184_v31, %v1180_v30 }
 0x20e   : > { %4240 = vmatpush1.bf16.msra.mxu1 %v4239_v55  ;;  %3730 = vmatprep.subr.bf16.mxu0 %v3729_v56  ;;  %v1122_v55 = vld [vmem:[#allocation2 + $0x1648] sm:$0xff]  ;;  %v1201_v14 = vld [vmem:[#allocation2 + $0x18c0] sm:$0xff] }
 0x20f   : > { %4242 = vmatprep.subr.bf16.mxu1 %v4241_v61  ;;  %v1126_v56 = vld [vmem:[#allocation2 + $0x1668] sm:$0xff]  ;;  %v4259_v61 = vpack.c.bf16 %v1119_v54, %v1115_v52  ;;  %v3763_v52 = vpack.c.bf16 %v1149_v44, %v1145_v43  ;;  %v1205_v15 = vld [vmem:[#allocation2 + $0x18e0] sm:$0xff] }
 0x210   : > { %v3749_v62 = vpack.c.bf16 %v1126_v56, %v1122_v55  ;;  %v1153_v55 = vld [vmem:[#allocation2 + $0x1740] sm:$0xff]  ;;  %v5263_v43 = vld [vmem:[%s5209_s4 + $0x8] sm:$0xff] }
 0x211   : > { %3732 = vmatpush1.bf16.msra.mxu0 %v3731_v4  ;;  %v1127_v4 = vld [vmem:[#allocation2 + $0x1670] sm:$0xff]  ;;  %v1157_v56 = vld [vmem:[#allocation2 + $0x1760] sm:$0xff]  ;;  %v1479_v44 = vrot.slane %v5263_v43, %v5230_v29 }
 0x212   : > { %4244 = vmatpush1.bf16.msra.mxu1 %v4243_v5  ;;  %3734 = vmatprep.subr.bf16.mxu0 %v3733_v6  ;;  %v1130_v5 = vld [vmem:[#allocation2 + $0x1688] sm:$0xff]  ;;  %v1209_v30 = vld [vmem:[#allocation2 + $0x1900] sm:$0xff] }
 0x213   : > { %4246 = vmatprep.subr.bf16.mxu1 %v4245_v12  ;;  %v1134_v6 = vld [vmem:[#allocation2 + $0x16a8] sm:$0xff]  ;;  %v4263_v12 = vpack.c.bf16 %v1127_v4, %v1123_v3  ;;  %v3767_v3 = vpack.c.bf16 %v1157_v56, %v1153_v55  ;;  %v1213_v31 = vld [vmem:[#allocation2 + $0x1920] sm:$0xff] }
 0x214   : > { %v3753_v13 = vpack.c.bf16 %v1134_v6, %v1130_v5  ;;  %v1161_v5 = vld [vmem:[#allocation2 + $0x1780] sm:$0xff]  ;;  %v1194_v55 = vld [vmem:[#allocation2 + $0x1888] sm:$0xff] }
 0x215   : > { %3736 = vmatpush1.bf16.msra.mxu0 %v3735_v18  ;;  %v1135_v18 = vld [vmem:[#allocation2 + $0x16b0] sm:$0xff]  ;;  %v1165_v6 = vld [vmem:[#allocation2 + $0x17a0] sm:$0xff]  ;;  %v1198_v56 = vld [vmem:[#allocation2 + $0x18a8] sm:$0xff] }
 0x216   : > { %4248 = vmatpush1.bf16.msra.mxu1 %v4247_v20  ;;  %3738 = vmatprep.subr.bf16.mxu0 %v3737_v22  ;;  %v1138_v20 = vld [vmem:[#allocation2 + $0x16c8] sm:$0xff]  ;;  %v3785_v1 = vpack.c.bf16 %v1198_v56, %v1194_v55  ;;  %v1225_v56 = vld [vmem:[#allocation2 + $0x1980] sm:$0xff] }
 0x217   : > { %4250 = vmatprep.subr.bf16.mxu1 %v4249_v27  ;;  %v1142_v22 = vld [vmem:[#allocation2 + $0x16e8] sm:$0xff]  ;;  %v4267_v27 = vpack.c.bf16 %v1135_v18, %v1131_v16  ;;  %v3771_v16 = vpack.c.bf16 %v1165_v6, %v1161_v5  ;;  %v1199_v5 = vld [vmem:[#allocation2 + $0x18b0] sm:$0xff] }
 0x218   : > { %v3757_v28 = vpack.c.bf16 %v1142_v22, %v1138_v20  ;;  %v1169_v20 = vld [vmem:[#allocation2 + $0x17c0] sm:$0xff]  ;;  %v1202_v6 = vld [vmem:[#allocation2 + $0x18c8] sm:$0xff] }
 0x219   : > { %3740 = vmatpush1.bf16.msra.mxu0 %v3739_v34  ;;  %v1143_v34 = vld [vmem:[#allocation2 + $0x16f0] sm:$0xff]  ;;  %v1173_v22 = vld [vmem:[#allocation2 + $0x17e0] sm:$0xff] }
 0x21a   : > { %4252 = vmatpush1.bf16.msra.mxu1 %v4251_v36  ;;  %3742 = vmatprep.subr.bf16.mxu0 %v3741_v37  ;;  %v1146_v36 = vld [vmem:[#allocation2 + $0x1708] sm:$0xff] }
 0x21b   : > { %4254 = vmatprep.subr.bf16.mxu1 %v4253_v41  ;;  %v1150_v37 = vld [vmem:[#allocation2 + $0x1728] sm:$0xff]  ;;  %v4271_v41 = vpack.c.bf16 %v1143_v34, %v1139_v32  ;;  %v3775_v32 = vpack.c.bf16 %v1173_v22, %v1169_v20 }
 0x21c   : > { %v3761_v42 = vpack.c.bf16 %v1150_v37, %v1146_v36  ;;  %v1177_v36 = vld [vmem:[#allocation2 + $0x1800] sm:$0xff]  ;;  %v1210_v20 = vld [vmem:[#allocation2 + $0x1908] sm:$0xff] }
 0x21d   : > { %3744 = vmatpush1.bf16.msra.mxu0 %v3743_v47  ;;  %v1151_v47 = vld [vmem:[#allocation2 + $0x1730] sm:$0xff]  ;;  %v1181_v37 = vld [vmem:[#allocation2 + $0x1820] sm:$0xff]  ;;  %v1214_v22 = vld [vmem:[#allocation2 + $0x1928] sm:$0xff] }
 0x21e   : > { %4256 = vmatpush1.bf16.msra.mxu1 %v4255_v48  ;;  %3746 = vmatprep.subr.bf16.mxu0 %v3745_v49  ;;  %v1154_v48 = vld [vmem:[#allocation2 + $0x1748] sm:$0xff] }
 0x21f   : > { %4258 = vmatprep.subr.bf16.mxu1 %v4257_v53  ;;  %v1158_v49 = vld [vmem:[#allocation2 + $0x1768] sm:$0xff]  ;;  %v4275_v53 = vpack.c.bf16 %v1151_v47, %v1147_v45  ;;  %v1188_v45 = vld [vmem:[#allocation2 + $0x1858] sm:$0xff]  ;;  %v3779_v47 = vpack.c.bf16 %v1181_v37, %v1177_v36 }
 0x220   : > { %v3765_v54 = vpack.c.bf16 %v1158_v49, %v1154_v48  ;;  %v1218_v36 = vld [vmem:[#allocation2 + $0x1948] sm:$0xff] }
 0x221   : > { %3748 = vmatpush1.bf16.msra.mxu0 %v3747_v60  ;;  %v1159_v60 = vld [vmem:[#allocation2 + $0x1770] sm:$0xff]  ;;  %v1222_v37 = vld [vmem:[#allocation2 + $0x1968] sm:$0xff] }
 0x222   : > { %4260 = vmatpush1.bf16.msra.mxu1 %v4259_v61  ;;  %3750 = vmatprep.subr.bf16.mxu0 %v3749_v62  ;;  %v1162_v61 = vld [vmem:[#allocation2 + $0x1788] sm:$0xff] }
 0x223   : > { %4262 = vmatprep.subr.bf16.mxu1 %v4261_v19  ;;  %v1166_v62 = vld [vmem:[#allocation2 + $0x17a8] sm:$0xff]  ;;  %v4279_v19 = vpack.c.bf16 %v1159_v60, %v1155_v57  ;;  %v1491_v57 = vrot.slane %v5263_v43, %v1458_v40  ;;  %v1200_v60 = vld [vmem:[#allocation2 + $0x18b8] sm:$0xff] }
 0x224   : > { %v3769_v4 = vpack.c.bf16 %v1166_v62, %v1162_v61  ;;  %v3783_v61 = vpack.c.bf16 %v1189_v0, %v1185_v50  ;;  %v1204_v40 = vld [vmem:[#allocation2 + $0x18d8] sm:$0xff]  ;;  %v1230_v50 = vld [vmem:[#allocation2 + $0x19a8] sm:$0xff] }
 0x225   : > { %3752 = vmatpush1.bf16.msra.mxu0 %v3751_v11  ;;  %v1167_v11 = vld [vmem:[#allocation2 + $0x17b0] sm:$0xff]  ;;  %v1228_v0 = vld [vmem:[#allocation2 + $0x1998] sm:$0xff] }
 0x226   : > { %4264 = vmatpush1.bf16.msra.mxu1 %v4263_v12  ;;  %3754 = vmatprep.subr.bf16.mxu0 %v3753_v13  ;;  %v1170_v12 = vld [vmem:[#allocation2 + $0x17c8] sm:$0xff] }
 0x227   : > { %4266 = vmatprep.subr.bf16.mxu1 %v4265_v17  ;;  %v1174_v13 = vld [vmem:[#allocation2 + $0x17e8] sm:$0xff]  ;;  %v4283_v17 = vpack.c.bf16 %v1167_v11, %v1163_v7 }
 0x228   : > { %v3773_v18 = vpack.c.bf16 %v1174_v13, %v1170_v12  ;;  %v1206_v7 = vld [vmem:[#allocation2 + $0x18e8] sm:$0xff] }
 0x229   : > { %3756 = vmatpush1.bf16.msra.mxu0 %v3755_v26  ;;  %v1175_v26 = vld [vmem:[#allocation2 + $0x17f0] sm:$0xff]  ;;  %v3789_v13 = vpack.c.bf16 %v1206_v7, %v1202_v6  ;;  %v1233_v6 = vld [vmem:[#allocation2 + $0x19c0] sm:$0xff] }
 0x22a   : > { %4268 = vmatpush1.bf16.msra.mxu1 %v4267_v27  ;;  %3758 = vmatprep.subr.bf16.mxu0 %v3757_v28  ;;  %v1178_v27 = vld [vmem:[#allocation2 + $0x1808] sm:$0xff]  ;;  %v1237_v7 = vld [vmem:[#allocation2 + $0x19e0] sm:$0xff] }
 0x22b   : > { %4270 = vmatprep.subr.bf16.mxu1 %v4269_v33  ;;  %v1182_v28 = vld [vmem:[#allocation2 + $0x1828] sm:$0xff]  ;;  %v4287_v33 = vpack.c.bf16 %v1175_v26, %v1171_v24  ;;  %v1212_v24 = vld [vmem:[#allocation2 + $0x1918] sm:$0xff]  ;;  %v3791_v26 = vpack.c.bf16 %v1205_v15, %v1201_v14 }
 0x22c   : > { %v3777_v34 = vpack.c.bf16 %v1182_v28, %v1178_v27  ;;  %v3793_v28 = vpack.c.bf16 %v1214_v22, %v1210_v20  ;;  %v1244_v14 = vld [vmem:[#allocation2 + $0x1a18] sm:$0xff]  ;;  %v1241_v20 = vld [vmem:[#allocation2 + $0x1a00] sm:$0xff] }
 0x22d   : > { %3760 = vmatpush1.bf16.msra.mxu0 %v3759_v35  ;;  %v1183_v35 = vld [vmem:[#allocation2 + $0x1830] sm:$0xff]  ;;  %v1248_v15 = vld [vmem:[#allocation2 + $0x1a38] sm:$0xff]  ;;  %v1245_v22 = vld [vmem:[#allocation2 + $0x1a20] sm:$0xff] }
 0x22e   : > { %4272 = vmatpush1.bf16.msra.mxu1 %v4271_v41  ;;  %3762 = vmatprep.subr.bf16.mxu0 %v3761_v42  ;;  %v1186_v41 = vld [vmem:[#allocation2 + $0x1848] sm:$0xff]  ;;  %v4291_v48 = vpack.c.bf16 %v1183_v35, %v1179_v38  ;;  %v1220_v38 = vld [vmem:[#allocation2 + $0x1958] sm:$0xff]  ;;  %v3795_v35 = vpack.c.bf16 %v1213_v31, %v1209_v30 }
 0x22f   : > { %4274 = vmatprep.subr.bf16.mxu1 %v4273_v46  ;;  %v1190_v42 = vld [vmem:[#allocation2 + $0x1868] sm:$0xff]  ;;  %v1192_v46 = vld [vmem:[#allocation2 + $0x1878] sm:$0xff] }
 0x230   : > { %v3781_v49 = vpack.c.bf16 %v1190_v42, %v1186_v41  ;;  %v3797_v42 = vpack.c.bf16 %v1222_v37, %v1218_v36  ;;  %v1252_v30 = vld [vmem:[#allocation2 + $0x1a58] sm:$0xff]  ;;  %v1249_v36 = vld [vmem:[#allocation2 + $0x1a40] sm:$0xff] }
 0x231   : > { %3764 = vmatpush1.bf16.msra.mxu0 %v3763_v52  ;;  %v1187_v52 = vld [vmem:[#allocation2 + $0x1850] sm:$0xff]  ;;  %v1256_v31 = vld [vmem:[#allocation2 + $0x1a78] sm:$0xff]  ;;  %v1253_v37 = vld [vmem:[#allocation2 + $0x1a60] sm:$0xff] }
 0x232   : > { %4276 = vmatpush1.bf16.msra.mxu1 %v4275_v53  ;;  %3766 = vmatprep.subr.bf16.mxu0 %v3765_v54  ;;  %v4293_v53 = vpack.c.bf16 %v1192_v46, %v1188_v45  ;;  %v1191_v54 = vld [vmem:[#allocation2 + $0x1870] sm:$0xff]  ;;  %v1221_v45 = vld [vmem:[#allocation2 + $0x1960] sm:$0xff] }
 0x233   : > { %4278 = vmatprep.subr.bf16.mxu1 %v4277_v58  ;;  %v1196_v58 = vld [vmem:[#allocation2 + $0x1898] sm:$0xff]  ;;  %v4295_v62 = vpack.c.bf16 %v1191_v54, %v1187_v52  ;;  %v1219_v46 = vld [vmem:[#allocation2 + $0x1950] sm:$0xff] }
 0x234   : > { %v1232_v52 = vld [vmem:[#allocation2 + $0x19b8] sm:$0xff] }
 0x235   : > { %3768 = vmatpush1.bf16.msra.mxu0 %v3767_v3  ;;  %v1197_v3 = vld [vmem:[#allocation2 + $0x18a0] sm:$0xff] }
 0x236   : > { %4280 = vmatpush1.bf16.msra.mxu1 %v4279_v19  ;;  %3770 = vmatprep.subr.bf16.mxu0 %v3769_v4  ;;  %v1195_v19 = vld [vmem:[#allocation2 + $0x1890] sm:$0xff]  ;;  %v4297_v4 = vpack.c.bf16 %v1200_v60, %v1196_v58  ;;  %v3787_v11 = vpack.c.bf16 %v1197_v3, %v1193_v2  ;;  %v4313_v60 = vpack.c.bf16 %v1232_v52, %v1228_v0  ;;  %v1236_v2 = vld [vmem:[#allocation2 + $0x19d8] sm:$0xff] }
 0x237   : > { %4282 = vmatprep.subr.bf16.mxu1 %v4281_v10  ;;  %v1208_v10 = vld [vmem:[#allocation2 + $0x18f8] sm:$0xff]  ;;  %v4299_v12 = vpack.c.bf16 %v1199_v5, %v1195_v19  ;;  %v1227_v58 = vld [vmem:[#allocation2 + $0x1990] sm:$0xff] }
 0x238   : > { %v1240_v3 = vld [vmem:[#allocation2 + $0x19f8] sm:$0xff]  ;;  %v1259_v0 = vld [vmem:[#allocation2 + $0x1a90] sm:$0xff] }
 0x239   : > { %3772 = vmatpush1.bf16.msra.mxu0 %v3771_v16  ;;  %v1203_v16 = vld [vmem:[#allocation2 + $0x18d0] sm:$0xff] }
 0x23a   : > { %4284 = vmatpush1.bf16.msra.mxu1 %v4283_v17  ;;  %3774 = vmatprep.subr.bf16.mxu0 %v3773_v18  ;;  %v4301_v17 = vpack.c.bf16 %v1208_v10, %v1204_v40  ;;  %v1207_v18 = vld [vmem:[#allocation2 + $0x18f0] sm:$0xff]  ;;  %v4317_v10 = vpack.c.bf16 %v1240_v3, %v1236_v2 }
 0x23b   : > { %4286 = vmatprep.subr.bf16.mxu1 %v4285_v25  ;;  %v1216_v25 = vld [vmem:[#allocation2 + $0x1938] sm:$0xff]  ;;  %v4303_v27 = vpack.c.bf16 %v1207_v18, %v1203_v16  ;;  %v1235_v40 = vld [vmem:[#allocation2 + $0x19d0] sm:$0xff]  ;;  %v3807_v16 = vpack.c.bf16 %v1237_v7, %v1233_v6 }
 0x23c   : > { %v1267_v2 = vld [vmem:[#allocation2 + $0x1ad0] sm:$0xff]  ;;  %v1276_v6 = vld [vmem:[#allocation2 + $0x1b18] sm:$0xff] }
 0x23d   : > { %3776 = vmatpush1.bf16.msra.mxu0 %v3775_v32  ;;  %v1211_v32 = vld [vmem:[#allocation2 + $0x1910] sm:$0xff]  ;;  %v1280_v7 = vld [vmem:[#allocation2 + $0x1b38] sm:$0xff] }
 0x23e   : > { %4288 = vmatpush1.bf16.msra.mxu1 %v4287_v33  ;;  %3778 = vmatprep.subr.bf16.mxu0 %v3777_v34  ;;  %v4305_v33 = vpack.c.bf16 %v1216_v25, %v1212_v24  ;;  %v1215_v34 = vld [vmem:[#allocation2 + $0x1930] sm:$0xff]  ;;  %v4321_v25 = vpack.c.bf16 %v1248_v15, %v1244_v14  ;;  %v4337_v15 = vpack.c.bf16 %v1280_v7, %v1276_v6 }
 0x23f   : > { %4290 = vmatprep.subr.bf16.mxu1 %v4289_v39  ;;  %v1224_v39 = vld [vmem:[#allocation2 + $0x1978] sm:$0xff]  ;;  %v4307_v41 = vpack.c.bf16 %v1215_v34, %v1211_v32  ;;  %v1243_v24 = vld [vmem:[#allocation2 + $0x1a10] sm:$0xff]  ;;  %v3811_v32 = vpack.c.bf16 %v1245_v22, %v1241_v20 }
 0x240   : > { %1957 = vmatmul.mubr.f32.vlgmr.msra.gmra.mrb[0].mxu0 %v1479_v44  ;;  %v1275_v14 = vld [vmem:[#allocation2 + $0x1b10] sm:$0xff]  ;;  %v1284_v20 = vld [vmem:[#allocation2 + $0x1b58] sm:$0xff] }
 0x241   : > { %3780 = vmatpush1.bf16.msra.mxu0 %v3779_v47  ;;  %2525 = vmatmul.mubr.f32.vlgmr.msra.gmra.mrb[0].mxu1 %v1479_v44  ;;  %v1217_v44 = vld [vmem:[#allocation2 + $0x1940] sm:$0xff]  ;;  %v4309_v47 = vpack.c.bf16 %v1224_v39, %v1220_v38  ;;  %v1251_v38 = vld [vmem:[#allocation2 + $0x1a50] sm:$0xff]  ;;  %v4325_v39 = vpack.c.bf16 %v1256_v31, %v1252_v30  ;;  %v1288_v22 = vld [vmem:[#allocation2 + $0x1b78] sm:$0xff] }
 0x242   : > { %4292 = vmatpush1.bf16.msra.mxu1 %v4291_v48  ;;  %3782 = vmatprep.subr.bf16.mxu0 %v3781_v49  ;;  %v1223_v48 = vld [vmem:[#allocation2 + $0x1970] sm:$0xff]  ;;  %v1226_v49 = vld [vmem:[#allocation2 + $0x1988] sm:$0xff]  ;;  %v4341_v31 = vpack.c.bf16 %v1288_v22, %v1284_v20  ;;  %v1317_v20 = vld [vmem:[#allocation2 + $0x1c60] sm:$0xff] }
 0x243   : > { %4294 = vmatprep.subr.bf16.mxu1 %v4293_v53  ;;  %2027 = vmatprep.mubr.f32.mxu0 %v1491_v57  ;;  %v3799_v53 = vpack.c.bf16 %v1221_v45, %v1217_v44  ;;  %v4311_v54 = vpack.c.bf16 %v1223_v48, %v1219_v46  ;;  %v3801_v55 = vpack.c.bf16 %v1230_v50, %v1226_v49  ;;  %v1260_v44 = vld [vmem:[#allocation2 + $0x1a98] sm:$0xff]  ;;  %v1257_v49 = vld [vmem:[#allocation2 + $0x1a80] sm:$0xff]  ;;  %v1283_v30 = vld [vmem:[#allocation2 + $0x1b50] sm:$0xff] }
 0x244   : > { %2595 = vmatprep.mubr.f32.mxu1 %v1491_v57  ;;  %v1229_v57 = vld [vmem:[#allocation2 + $0x19a0] sm:$0xff]  ;;  %v1264_v45 = vld [vmem:[#allocation2 + $0x1ab8] sm:$0xff]  ;;  %v3815_v46 = vpack.c.bf16 %v1253_v37, %v1249_v36  ;;  %v1307_v6 = vld [vmem:[#allocation2 + $0x1c10] sm:$0xff] }
 0x245   : > { %3784 = vmatpush1.bf16.msra.mxu0 %v3783_v61  ;;  %v1231_v61 = vld [vmem:[#allocation2 + $0x19b0] sm:$0xff]  ;;  %v3803_v19 = vpack.c.bf16 %v1229_v57, %v1225_v56  ;;  %v1261_v50 = vld [vmem:[#allocation2 + $0x1aa0] sm:$0xff]  ;;  %v4329_v52 = vpack.c.bf16 %v1264_v45, %v1260_v44  ;;  %v1268_v56 = vld [vmem:[#allocation2 + $0x1ad8] sm:$0xff] }
 0x246   : > { %4296 = vmatpush1.bf16.msra.mxu1 %v4295_v62  ;;  %3786 = vmatprep.subr.bf16.mxu0 %v3785_v1  ;;  %v1234_v62 = vld [vmem:[#allocation2 + $0x19c8] sm:$0xff]  ;;  %v1272_v57 = vld [vmem:[#allocation2 + $0x1af8] sm:$0xff]  ;;  %v1291_v44 = vld [vmem:[#allocation2 + $0x1b90] sm:$0xff] }
 0x247   : > { %4298 = vmatprep.subr.bf16.mxu1 %v4297_v4  ;;  %v1238_v1 = vld [vmem:[#allocation2 + $0x19e8] sm:$0xff]  ;;  %v4315_v4 = vpack.c.bf16 %v1231_v61, %v1227_v58  ;;  %v3819_v58 = vpack.c.bf16 %v1261_v50, %v1257_v49  ;;  %v4333_v3 = vpack.c.bf16 %v1272_v57, %v1268_v56  ;;  %v1292_v36 = vld [vmem:[#allocation2 + $0x1b98] sm:$0xff]  ;;  %v1299_v56 = vld [vmem:[#allocation2 + $0x1bd0] sm:$0xff] }
 0x248   : > { %v3805_v5 = vpack.c.bf16 %v1238_v1, %v1234_v62  ;;  %v1265_v62 = vld [vmem:[#allocation2 + $0x1ac0] sm:$0xff]  ;;  %v1296_v37 = vld [vmem:[#allocation2 + $0x1bb8] sm:$0xff]  ;;  %v1315_v22 = vld [vmem:[#allocation2 + $0x1c50] sm:$0xff] }
 0x249   : > { %3788 = vmatpush1.bf16.msra.mxu0 %v3787_v11  ;;  %v1239_v11 = vld [vmem:[#allocation2 + $0x19f0] sm:$0xff]  ;;  %v1269_v1 = vld [vmem:[#allocation2 + $0x1ae0] sm:$0xff]  ;;  %v4345_v45 = vpack.c.bf16 %v1296_v37, %v1292_v36  ;;  %v1300_v49 = vld [vmem:[#allocation2 + $0x1bd8] sm:$0xff] }
 0x24a   : > { %4300 = vmatpush1.bf16.msra.mxu1 %v4299_v12  ;;  %3790 = vmatprep.subr.bf16.mxu0 %v3789_v13  ;;  %v1242_v12 = vld [vmem:[#allocation2 + $0x1a08] sm:$0xff]  ;;  %v1304_v50 = vld [vmem:[#allocation2 + $0x1bf8] sm:$0xff]  ;;  %v1325_v36 = vld [vmem:[#allocation2 + $0x1ca0] sm:$0xff] }
 0x24b   : > { %4302 = vmatprep.subr.bf16.mxu1 %v4301_v17  ;;  %v1246_v13 = vld [vmem:[#allocation2 + $0x1a28] sm:$0xff]  ;;  %v4319_v17 = vpack.c.bf16 %v1239_v11, %v1235_v40  ;;  %v3823_v40 = vpack.c.bf16 %v1269_v1, %v1265_v62  ;;  %v4349_v57 = vpack.c.bf16 %v1304_v50, %v1300_v49  ;;  %v1308_v62 = vld [vmem:[#allocation2 + $0x1c18] sm:$0xff]  ;;  %v1323_v37 = vld [vmem:[#allocation2 + $0x1c90] sm:$0xff] }
 0x24c   : > { %v3809_v18 = vpack.c.bf16 %v1246_v13, %v1242_v12  ;;  %v1273_v12 = vld [vmem:[#allocation2 + $0x1b00] sm:$0xff]  ;;  %v1312_v1 = vld [vmem:[#allocation2 + $0x1c38] sm:$0xff]  ;;  %v1335_v50 = vld [vmem:[#allocation2 + $0x1cf0] sm:$0xff] }
 0x24d   : > { %3792 = vmatpush1.bf16.msra.mxu0 %v3791_v26  ;;  %v1247_v26 = vld [vmem:[#allocation2 + $0x1a30] sm:$0xff]  ;;  %v1277_v13 = vld [vmem:[#allocation2 + $0x1b20] sm:$0xff]  ;;  %v4353_v7 = vpack.c.bf16 %v1312_v1, %v1308_v62 }
 0x24e   : > { %4304 = vmatpush1.bf16.msra.mxu1 %v4303_v27  ;;  %3794 = vmatprep.subr.bf16.mxu0 %v3793_v28  ;;  %v1250_v27 = vld [vmem:[#allocation2 + $0x1a48] sm:$0xff]  ;;  %v1343_v1 = vld [vmem:[#allocation2 + $0x1d30] sm:$0xff] }
 0x24f   : > { %4306 = vmatprep.subr.bf16.mxu1 %v4305_v33  ;;  %v1254_v28 = vld [vmem:[#allocation2 + $0x1a68] sm:$0xff]  ;;  %v4323_v33 = vpack.c.bf16 %v1247_v26, %v1243_v24  ;;  %v3827_v24 = vpack.c.bf16 %v1277_v13, %v1273_v12  ;;  %v1487_v12 = vrot.slane %v5263_v43, %v1454_v51  ;;  %v1316_v13 = vld [vmem:[#allocation2 + $0x1c58] sm:$0xff]  ;;  %v1499_v51 = vrot.slane %v5263_v43, %v1466_v63 }
 0x250   : > { %v3813_v34 = vpack.c.bf16 %v1254_v28, %v1250_v27  ;;  %v1281_v27 = vld [vmem:[#allocation2 + $0x1b40] sm:$0xff]  ;;  %v1332_v63 = vld [vmem:[#allocation2 + $0x1cd8] sm:$0xff] }
 0x251   : > { %3796 = vmatpush1.bf16.msra.mxu0 %v3795_v35  ;;  %v1255_v35 = vld [vmem:[#allocation2 + $0x1a70] sm:$0xff]  ;;  %v1285_v28 = vld [vmem:[#allocation2 + $0x1b60] sm:$0xff]  ;;  %v1336_v43 = vld [vmem:[#allocation2 + $0x1cf8] sm:$0xff] }
 0x252   : > { %4308 = vmatpush1.bf16.msra.mxu1 %v4307_v41  ;;  %3798 = vmatprep.subr.bf16.mxu0 %v3797_v42  ;;  %v1258_v41 = vld [vmem:[#allocation2 + $0x1a88] sm:$0xff]  ;;  %v4365_v49 = vpack.c.bf16 %v1336_v43, %v1332_v63 }
 0x253   : > { %4310 = vmatprep.subr.bf16.mxu1 %v4309_v47  ;;  %v1262_v42 = vld [vmem:[#allocation2 + $0x1aa8] sm:$0xff]  ;;  %v4327_v47 = vpack.c.bf16 %v1255_v35, %v1251_v38  ;;  %v3831_v38 = vpack.c.bf16 %v1285_v28, %v1281_v27  ;;  %v1324_v28 = vld [vmem:[#allocation2 + $0x1c98] sm:$0xff] }
 0x254   : > { %v3817_v48 = vpack.c.bf16 %v1262_v42, %v1258_v41  ;;  %v1289_v41 = vld [vmem:[#allocation2 + $0x1b80] sm:$0xff]  ;;  %v1326_v27 = vld [vmem:[#allocation2 + $0x1ca8] sm:$0xff] }
 0x255   : > { %3800 = vmatpush1.bf16.msra.mxu0 %v3799_v53  ;;  %v1263_v53 = vld [vmem:[#allocation2 + $0x1ab0] sm:$0xff]  ;;  %v1293_v42 = vld [vmem:[#allocation2 + $0x1ba0] sm:$0xff]  ;;  %v1370_v63 = vld [vmem:[#allocation2 + $0x1e08] sm:$0xff] }
 0x256   : > { %4312 = vmatpush1.bf16.msra.mxu1 %v4311_v54  ;;  %3802 = vmatprep.subr.bf16.mxu0 %v3801_v55  ;;  %v1266_v54 = vld [vmem:[#allocation2 + $0x1ac8] sm:$0xff] }
 0x257   : > { %4314 = vmatprep.subr.bf16.mxu1 %v4313_v60  ;;  %v1270_v55 = vld [vmem:[#allocation2 + $0x1ae8] sm:$0xff]  ;;  %v4331_v60 = vpack.c.bf16 %v1263_v53, %v1259_v0  ;;  %v3835_v0 = vpack.c.bf16 %v1293_v42, %v1289_v41 }
 0x258   : > { %v3821_v61 = vpack.c.bf16 %v1270_v55, %v1266_v54  ;;  %v1297_v54 = vld [vmem:[#allocation2 + $0x1bc0] sm:$0xff]  ;;  %v1334_v41 = vld [vmem:[#allocation2 + $0x1ce8] sm:$0xff] }
 0x259   : > { %3804 = vmatpush1.bf16.msra.mxu0 %v3803_v19  ;;  %v1271_v19 = vld [vmem:[#allocation2 + $0x1af0] sm:$0xff]  ;;  %v1301_v55 = vld [vmem:[#allocation2 + $0x1be0] sm:$0xff]  ;;  %v1374_v43 = vld [vmem:[#allocation2 + $0x1e28] sm:$0xff] }
 0x25a   : > { %4316 = vmatpush1.bf16.msra.mxu1 %v4315_v4  ;;  %3806 = vmatprep.subr.bf16.mxu0 %v3805_v5  ;;  %v1274_v4 = vld [vmem:[#allocation2 + $0x1b08] sm:$0xff] }
 0x25b   : > { %4318 = vmatprep.subr.bf16.mxu1 %v4317_v10  ;;  %v1278_v5 = vld [vmem:[#allocation2 + $0x1b28] sm:$0xff]  ;;  %v4335_v10 = vpack.c.bf16 %v1271_v19, %v1267_v2  ;;  %v3839_v2 = vpack.c.bf16 %v1301_v55, %v1297_v54  ;;  %v1344_v54 = vld [vmem:[#allocation2 + $0x1d38] sm:$0xff] }
 0x25c   : > { %v3825_v11 = vpack.c.bf16 %v1278_v5, %v1274_v4  ;;  %v1305_v4 = vld [vmem:[#allocation2 + $0x1c00] sm:$0xff] }
 0x25d   : > { %3808 = vmatpush1.bf16.msra.mxu0 %v3807_v16  ;;  %v1279_v16 = vld [vmem:[#allocation2 + $0x1b30] sm:$0xff]  ;;  %v1309_v5 = vld [vmem:[#allocation2 + $0x1c20] sm:$0xff] }
 0x25e   : > { %4320 = vmatpush1.bf16.msra.mxu1 %v4319_v17  ;;  %3810 = vmatprep.subr.bf16.mxu0 %v3809_v18  ;;  %v1282_v17 = vld [vmem:[#allocation2 + $0x1b48] sm:$0xff] }
 0x25f   : > { %4322 = vmatprep.subr.bf16.mxu1 %v4321_v25  ;;  %v1286_v18 = vld [vmem:[#allocation2 + $0x1b68] sm:$0xff]  ;;  %v4339_v25 = vpack.c.bf16 %v1279_v16, %v1275_v14  ;;  %v1320_v14 = vld [vmem:[#allocation2 + $0x1c78] sm:$0xff] }
 0x260   : > { %v3829_v26 = vpack.c.bf16 %v1286_v18, %v1282_v17  ;;  %v1313_v18 = vld [vmem:[#allocation2 + $0x1c40] sm:$0xff] }
 0x261   : > { %3812 = vmatpush1.bf16.msra.mxu0 %v3811_v32  ;;  %v1287_v32 = vld [vmem:[#allocation2 + $0x1b70] sm:$0xff] }
 0x262   : > { %4324 = vmatpush1.bf16.msra.mxu1 %v4323_v33  ;;  %3814 = vmatprep.subr.bf16.mxu0 %v3813_v34  ;;  %v1290_v33 = vld [vmem:[#allocation2 + $0x1b88] sm:$0xff] }
 0x263   : > { %4326 = vmatprep.subr.bf16.mxu1 %v4325_v39  ;;  %v1294_v34 = vld [vmem:[#allocation2 + $0x1ba8] sm:$0xff]  ;;  %v4343_v39 = vpack.c.bf16 %v1287_v32, %v1283_v30  ;;  %v1328_v30 = vld [vmem:[#allocation2 + $0x1cb8] sm:$0xff] }
 0x264   : > { %v3833_v35 = vpack.c.bf16 %v1294_v34, %v1290_v33  ;;  %v1321_v34 = vld [vmem:[#allocation2 + $0x1c80] sm:$0xff] }
 0x265   : > { %3816 = vmatpush1.bf16.msra.mxu0 %v3815_v46  ;;  %v1295_v46 = vld [vmem:[#allocation2 + $0x1bb0] sm:$0xff]  ;;  %v3851_v42 = vpack.c.bf16 %v1325_v36, %v1321_v34 }
 0x266   : > { %4328 = vmatpush1.bf16.msra.mxu1 %v4327_v47  ;;  %3818 = vmatprep.subr.bf16.mxu0 %v3817_v48  ;;  %v1298_v47 = vld [vmem:[#allocation2 + $0x1bc8] sm:$0xff] }
 0x267   : > { %4330 = vmatprep.subr.bf16.mxu1 %v4329_v52  ;;  %v1302_v48 = vld [vmem:[#allocation2 + $0x1be8] sm:$0xff]  ;;  %v4347_v52 = vpack.c.bf16 %v1295_v46, %v1291_v44  ;;  %v1329_v46 = vld [vmem:[#allocation2 + $0x1cc0] sm:$0xff] }
 0x268   : > { %v3837_v53 = vpack.c.bf16 %v1302_v48, %v1298_v47  ;;  %v1333_v47 = vld [vmem:[#allocation2 + $0x1ce0] sm:$0xff]  ;;  %v1331_v48 = vld [vmem:[#allocation2 + $0x1cd0] sm:$0xff] }
 0x269   : > { %3820 = vmatpush1.bf16.msra.mxu0 %v3819_v58  ;;  %v1303_v58 = vld [vmem:[#allocation2 + $0x1bf0] sm:$0xff]  ;;  %v3855_v55 = vpack.c.bf16 %v1333_v47, %v1329_v46  ;;  %v3873_v47 = vpack.c.bf16 %v1374_v43, %v1370_v63 }
 0x26a   : > { %4332 = vmatpush1.bf16.msra.mxu1 %v4331_v60  ;;  %3822 = vmatprep.subr.bf16.mxu0 %v3821_v61  ;;  %v1306_v60 = vld [vmem:[#allocation2 + $0x1c08] sm:$0xff]  ;;  %v1407_v43 = vld [vmem:[#allocation2 + $0x1f30] sm:$0xff] }
 0x26b   : > { %4334 = vmatprep.subr.bf16.mxu1 %v4333_v3  ;;  %v1310_v61 = vld [vmem:[#allocation2 + $0x1c28] sm:$0xff]  ;;  %v4351_v3 = vpack.c.bf16 %v1303_v58, %v1299_v56  ;;  %v4367_v56 = vpack.c.bf16 %v1335_v50, %v1331_v48  ;;  %v1337_v58 = vld [vmem:[#allocation2 + $0x1d00] sm:$0xff]  ;;  %v1371_v50 = vld [vmem:[#allocation2 + $0x1e10] sm:$0xff] }
 0x26c   : > { %v3841_v19 = vpack.c.bf16 %v1310_v61, %v1306_v60  ;;  %v1341_v60 = vld [vmem:[#allocation2 + $0x1d20] sm:$0xff]  ;;  %v1339_v61 = vld [vmem:[#allocation2 + $0x1d10] sm:$0xff] }
 0x26d   : > { %3824 = vmatpush1.bf16.msra.mxu0 %v3823_v40  ;;  %v1311_v40 = vld [vmem:[#allocation2 + $0x1c30] sm:$0xff]  ;;  %v1369_v48 = vld [vmem:[#allocation2 + $0x1e00] sm:$0xff] }
 0x26e   : > { %4336 = vmatpush1.bf16.msra.mxu1 %v4335_v10  ;;  %3826 = vmatprep.subr.bf16.mxu0 %v3825_v11  ;;  %v1314_v10 = vld [vmem:[#allocation2 + $0x1c48] sm:$0xff]  ;;  %v4355_v16 = vpack.c.bf16 %v1311_v40, %v1307_v6  ;;  %v4371_v6 = vpack.c.bf16 %v1343_v1, %v1339_v61  ;;  %v1345_v40 = vld [vmem:[#allocation2 + $0x1d40] sm:$0xff]  ;;  %v1379_v1 = vld [vmem:[#allocation2 + $0x1e50] sm:$0xff] }
 0x26f   : > { %4338 = vmatprep.subr.bf16.mxu1 %v4337_v15  ;;  %v1318_v11 = vld [vmem:[#allocation2 + $0x1c68] sm:$0xff]  ;;  %v3843_v15 = vpack.c.bf16 %v1309_v5, %v1305_v4  ;;  %v1352_v4 = vld [vmem:[#allocation2 + $0x1d78] sm:$0xff]  ;;  %v3859_v5 = vpack.c.bf16 %v1341_v60, %v1337_v58  ;;  %v1377_v61 = vld [vmem:[#allocation2 + $0x1e40] sm:$0xff] }
 0x270   : > { %v3845_v17 = vpack.c.bf16 %v1318_v11, %v1314_v10  ;;  %v1349_v10 = vld [vmem:[#allocation2 + $0x1d60] sm:$0xff]  ;;  %v1347_v11 = vld [vmem:[#allocation2 + $0x1d50] sm:$0xff] }
 0x271   : > { %3828 = vmatpush1.bf16.msra.mxu0 %v3827_v24  ;;  %v4357_v24 = vpack.c.bf16 %v1320_v14, %v1316_v13  ;;  %v1351_v13 = vld [vmem:[#allocation2 + $0x1d70] sm:$0xff]  ;;  %v1354_v14 = vld [vmem:[#allocation2 + $0x1d88] sm:$0xff] }
 0x272   : > { %4340 = vmatpush1.bf16.msra.mxu1 %v4339_v25  ;;  %3830 = vmatprep.subr.bf16.mxu0 %v3829_v26  ;;  %v1319_v25 = vld [vmem:[#allocation2 + $0x1c70] sm:$0xff]  ;;  %v1322_v26 = vld [vmem:[#allocation2 + $0x1c88] sm:$0xff] }
 0x273   : > { %4342 = vmatprep.subr.bf16.mxu1 %v4341_v31  ;;  %v3847_v31 = vpack.c.bf16 %v1317_v20, %v1313_v18  ;;  %v4359_v32 = vpack.c.bf16 %v1319_v25, %v1315_v22  ;;  %v3849_v33 = vpack.c.bf16 %v1326_v27, %v1322_v26  ;;  %v3863_v18 = vpack.c.bf16 %v1349_v10, %v1345_v40  ;;  %v1357_v25 = vld [vmem:[#allocation2 + $0x1da0] sm:$0xff]  ;;  %v1355_v26 = vld [vmem:[#allocation2 + $0x1d90] sm:$0xff] }
 0x274   : > { %v4375_v20 = vpack.c.bf16 %v1351_v13, %v1347_v11  ;;  %v1385_v11 = vld [vmem:[#allocation2 + $0x1e80] sm:$0xff]  ;;  %v1387_v13 = vld [vmem:[#allocation2 + $0x1e90] sm:$0xff] }
 0x275   : > { %3832 = vmatpush1.bf16.msra.mxu0 %v3831_v38  ;;  %v4361_v38 = vpack.c.bf16 %v1328_v30, %v1324_v28  ;;  %v1362_v28 = vld [vmem:[#allocation2 + $0x1dc8] sm:$0xff] }
 0x276   : > { %4344 = vmatpush1.bf16.msra.mxu1 %v4343_v39  ;;  %3834 = vmatprep.subr.bf16.mxu0 %v3833_v35  ;;  %v1327_v39 = vld [vmem:[#allocation2 + $0x1cb0] sm:$0xff]  ;;  %v1330_v35 = vld [vmem:[#allocation2 + $0x1cc8] sm:$0xff] }
 0x277   : > { %4346 = vmatprep.subr.bf16.mxu1 %v4345_v45  ;;  %v4363_v44 = vpack.c.bf16 %v1327_v39, %v1323_v37  ;;  %v3853_v45 = vpack.c.bf16 %v1334_v41, %v1330_v35  ;;  %v1366_v30 = vld [vmem:[#allocation2 + $0x1de8] sm:$0xff]  ;;  %v1361_v37 = vld [vmem:[#allocation2 + $0x1dc0] sm:$0xff]  ;;  %v1363_v39 = vld [vmem:[#allocation2 + $0x1dd0] sm:$0xff] }
 0x278   : > { %v3869_v36 = vpack.c.bf16 %v1366_v30, %v1362_v28  ;;  %v1367_v41 = vld [vmem:[#allocation2 + $0x1df0] sm:$0xff] }
 0x279   : > { %3836 = vmatpush1.bf16.msra.mxu0 %v3835_v0  ;;  %v1338_v0 = vld [vmem:[#allocation2 + $0x1d08] sm:$0xff]  ;;  %v4383_v46 = vpack.c.bf16 %v1367_v41, %v1363_v39  ;;  %v1399_v30 = vld [vmem:[#allocation2 + $0x1ef0] sm:$0xff]  ;;  %v1401_v39 = vld [vmem:[#allocation2 + $0x1f00] sm:$0xff] }
 0x27a   : > { %4348 = vmatpush1.bf16.msra.mxu1 %v4347_v52  ;;  %3838 = vmatprep.subr.bf16.mxu0 %v3837_v53  ;;  %v1342_v52 = vld [vmem:[#allocation2 + $0x1d28] sm:$0xff]  ;;  %v1340_v53 = vld [vmem:[#allocation2 + $0x1d18] sm:$0xff]  ;;  %v1403_v41 = vld [vmem:[#allocation2 + $0x1f10] sm:$0xff] }
 0x27b   : > { %4350 = vmatprep.subr.bf16.mxu1 %v4349_v57  ;;  %v3857_v57 = vpack.c.bf16 %v1342_v52, %v1338_v0  ;;  %v4369_v62 = vpack.c.bf16 %v1344_v54, %v1340_v53  ;;  %v1375_v52 = vld [vmem:[#allocation2 + $0x1e30] sm:$0xff]  ;;  %v1378_v53 = vld [vmem:[#allocation2 + $0x1e48] sm:$0xff] }
 0x27c   : > { %v1382_v54 = vld [vmem:[#allocation2 + $0x1e68] sm:$0xff]  ;;  %v4387_v58 = vpack.c.bf16 %v1375_v52, %v1371_v50  ;;  %v1409_v50 = vld [vmem:[#allocation2 + $0x1f40] sm:$0xff]  ;;  %v1411_v52 = vld [vmem:[#allocation2 + $0x1f50] sm:$0xff] }
 0x27d   : > { %3840 = vmatpush1.bf16.msra.mxu0 %v3839_v2  ;;  %v1346_v2 = vld [vmem:[#allocation2 + $0x1d48] sm:$0xff]  ;;  %v3877_v60 = vpack.c.bf16 %v1382_v54, %v1378_v53  ;;  %v1415_v54 = vld [vmem:[#allocation2 + $0x1f70] sm:$0xff] }
 0x27e   : > { %4352 = vmatpush1.bf16.msra.mxu1 %v4351_v3  ;;  %3842 = vmatprep.subr.bf16.mxu0 %v3841_v19  ;;  %v1350_v3 = vld [vmem:[#allocation2 + $0x1d68] sm:$0xff]  ;;  %v1348_v19 = vld [vmem:[#allocation2 + $0x1d58] sm:$0xff] }
 0x27f   : > { %4354 = vmatprep.subr.bf16.mxu1 %v4353_v7  ;;  %v3861_v7 = vpack.c.bf16 %v1350_v3, %v1346_v2  ;;  %v1383_v3 = vld [vmem:[#allocation2 + $0x1e70] sm:$0xff] }
 0x280   : > { %2028 = vmatmul.mubr.f32.vlgmr.msra.gmra.mrb[0].mxu0 %v1487_v12  ;;  %v4391_v40 = vpack.c.bf16 %v1383_v3, %v1379_v1  ;;  %v1417_v1 = vld [vmem:[#allocation2 + $0x1f80] sm:$0xff]  ;;  %v1419_v3 = vld [vmem:[#allocation2 + $0x1f90] sm:$0xff] }
 0x281   : > { %3844 = vmatpush1.bf16.msra.mxu0 %v3843_v15  ;;  %2596 = vmatmul.mubr.f32.vlgmr.msra.gmra.mrb[0].mxu1 %v1487_v12  ;;  %v4373_v12 = vpack.c.bf16 %v1352_v4, %v1348_v19  ;;  %v1358_v15 = vld [vmem:[#allocation2 + $0x1da8] sm:$0xff] }
 0x282   : > { %4356 = vmatpush1.bf16.msra.mxu1 %v4355_v16  ;;  %3846 = vmatprep.subr.bf16.mxu0 %v3845_v17  ;;  %v1356_v16 = vld [vmem:[#allocation2 + $0x1d98] sm:$0xff]  ;;  %v3865_v22 = vpack.c.bf16 %v1358_v15, %v1354_v14  ;;  %v1386_v19 = vld [vmem:[#allocation2 + $0x1e88] sm:$0xff]  ;;  %v1391_v15 = vld [vmem:[#allocation2 + $0x1eb0] sm:$0xff] }
 0x283   : > { %4358 = vmatprep.subr.bf16.mxu1 %v4357_v24  ;;  %2098 = vmatprep.mubr.f32.mxu0 %v1499_v51  ;;  %v1360_v17 = vld [vmem:[#allocation2 + $0x1db8] sm:$0xff]  ;;  %v1353_v24 = vld [vmem:[#allocation2 + $0x1d80] sm:$0xff]  ;;  %v1390_v4 = vld [vmem:[#allocation2 + $0x1ea8] sm:$0xff] }
 0x284   : > { %2666 = vmatprep.mubr.f32.mxu1 %v1499_v51  ;;  %v4377_v27 = vpack.c.bf16 %v1360_v17, %v1356_v16  ;;  %v1359_v51 = vld [vmem:[#allocation2 + $0x1db0] sm:$0xff]  ;;  %v3881_v10 = vpack.c.bf16 %v1390_v4, %v1386_v19  ;;  %v1394_v16 = vld [vmem:[#allocation2 + $0x1ec8] sm:$0xff] }
 0x285   : > { %3848 = vmatpush1.bf16.msra.mxu0 %v3847_v31  ;;  %v1364_v31 = vld [vmem:[#allocation2 + $0x1dd8] sm:$0xff]  ;;  %v4379_v34 = vpack.c.bf16 %v1359_v51, %v1355_v26  ;;  %v1398_v17 = vld [vmem:[#allocation2 + $0x1ee8] sm:$0xff]  ;;  %v1393_v26 = vld [vmem:[#allocation2 + $0x1ec0] sm:$0xff] }
 0x286   : > { %4360 = vmatpush1.bf16.msra.mxu1 %v4359_v32  ;;  %3850 = vmatprep.subr.bf16.mxu0 %v3849_v33  ;;  %v1368_v32 = vld [vmem:[#allocation2 + $0x1df8] sm:$0xff]  ;;  %v3867_v33 = vpack.c.bf16 %v1357_v25, %v1353_v24  ;;  %v4395_v24 = vpack.c.bf16 %v1391_v15, %v1387_v13  ;;  %v3885_v25 = vpack.c.bf16 %v1398_v17, %v1394_v16  ;;  %v1395_v51 = vld [vmem:[#allocation2 + $0x1ed0] sm:$0xff]  ;;  %v1425_v13 = vld [vmem:[#allocation2 + $0x1fc0] sm:$0xff] }
 0x287   : > { %4362 = vmatprep.subr.bf16.mxu1 %v4361_v38  ;;  %v1365_v38 = vld [vmem:[#allocation2 + $0x1de0] sm:$0xff]  ;;  %v4381_v35 = vpack.c.bf16 %v1368_v32, %v1364_v31  ;;  %v1402_v31 = vld [vmem:[#allocation2 + $0x1f08] sm:$0xff]  ;;  %v1423_v4 = vld [vmem:[#allocation2 + $0x1fb0] sm:$0xff] }
 0x288   : > { %v1406_v32 = vld [vmem:[#allocation2 + $0x1f28] sm:$0xff]  ;;  %v1427_v15 = vld [vmem:[#allocation2 + $0x1fd0] sm:$0xff] }
 0x289   : > { %3852 = vmatpush1.bf16.msra.mxu0 %v3851_v42  ;;  %v1372_v42 = vld [vmem:[#allocation2 + $0x1e18] sm:$0xff]  ;;  %v1431_v17 = vld [vmem:[#allocation2 + $0x1ff0] sm:$0xff] }
 0x28a   : > { %4364 = vmatpush1.bf16.msra.mxu1 %v4363_v44  ;;  %3854 = vmatprep.subr.bf16.mxu0 %v3853_v45  ;;  %v1376_v44 = vld [vmem:[#allocation2 + $0x1e38] sm:$0xff]  ;;  %v3871_v45 = vpack.c.bf16 %v1365_v38, %v1361_v37  ;;  %v4399_v37 = vpack.c.bf16 %v1399_v30, %v1395_v51  ;;  %v3889_v38 = vpack.c.bf16 %v1406_v32, %v1402_v31  ;;  %v2697_v51 = vld [vmem:[#allocation7] sm:$0xff]  ;;  %v2730_v32 = vld [vmem:[#allocation7 + $0x108] sm:$0xff] }
 0x28b   : > { %4366 = vmatprep.subr.bf16.mxu1 %v4365_v49  ;;  %v1373_v49 = vld [vmem:[#allocation2 + $0x1e20] sm:$0xff]  ;;  %v4385_v0 = vpack.c.bf16 %v1376_v44, %v1372_v42  ;;  %v1410_v42 = vld [vmem:[#allocation2 + $0x1f48] sm:$0xff] }
 0x28c   : > { %v1414_v44 = vld [vmem:[#allocation2 + $0x1f68] sm:$0xff] }
 0x28d   : > { %3856 = vmatpush1.bf16.msra.mxu0 %v3855_v55  ;;  %v1380_v55 = vld [vmem:[#allocation2 + $0x1e58] sm:$0xff]  ;;  %v2729_v30 = vld [vmem:[#allocation7 + $0x100] sm:$0xff] }
 0x28e   : > { %4368 = vmatpush1.bf16.msra.mxu1 %v4367_v56  ;;  %3858 = vmatprep.subr.bf16.mxu0 %v3857_v57  ;;  %v1384_v56 = vld [vmem:[#allocation2 + $0x1e78] sm:$0xff]  ;;  %v3875_v57 = vpack.c.bf16 %v1373_v49, %v1369_v48  ;;  %v4403_v48 = vpack.c.bf16 %v1407_v43, %v1403_v41  ;;  %v3893_v49 = vpack.c.bf16 %v1414_v44, %v1410_v42 }
 0x28f   : > { %4370 = vmatprep.subr.bf16.mxu1 %v4369_v62  ;;  %v1381_v62 = vld [vmem:[#allocation2 + $0x1e60] sm:$0xff]  ;;  %v4389_v2 = vpack.c.bf16 %v1384_v56, %v1380_v55  ;;  %v1418_v55 = vld [vmem:[#allocation2 + $0x1f88] sm:$0xff]  ;;  %v4451_v41 = vpack.c.bf16 %v2730_v32, %v2729_v30  ;;  %v2699_v43 = vld [vmem:[#allocation7 + $0x10] sm:$0xff] }
 0x290   : > { %v1422_v56 = vld [vmem:[#allocation2 + $0x1fa8] sm:$0xff]  ;;  %v2700_v42 = vld [vmem:[#allocation7 + $0x18] sm:$0xff]  ;;  %v2731_v44 = vld [vmem:[#allocation7 + $0x110] sm:$0xff] }
 0x291   : > { %3860 = vmatpush1.bf16.msra.mxu0 %v3859_v5  ;;  %v1388_v5 = vld [vmem:[#allocation2 + $0x1e98] sm:$0xff] }
 0x292   : > { %4372 = vmatpush1.bf16.msra.mxu1 %v4371_v6  ;;  %3862 = vmatprep.subr.bf16.mxu0 %v3861_v7  ;;  %v1392_v6 = vld [vmem:[#allocation2 + $0x1eb8] sm:$0xff]  ;;  %v3879_v7 = vpack.c.bf16 %v1381_v62, %v1377_v61  ;;  %v4407_v61 = vpack.c.bf16 %v1415_v54, %v1411_v52  ;;  %v3897_v62 = vpack.c.bf16 %v1422_v56, %v1418_v55  ;;  %v2702_v54 = vld [vmem:[#allocation7 + $0x28] sm:$0xff]  ;;  %v2733_v55 = vld [vmem:[#allocation7 + $0x120] sm:$0xff] }
 0x293   : > { %4374 = vmatprep.subr.bf16.mxu1 %v4373_v12  ;;  %v1389_v12 = vld [vmem:[#allocation2 + $0x1ea0] sm:$0xff]  ;;  %v4393_v14 = vpack.c.bf16 %v1392_v6, %v1388_v5  ;;  %v1426_v5 = vld [vmem:[#allocation2 + $0x1fc8] sm:$0xff]  ;;  %v2707_v30 = vld [vmem:[#allocation7 + $0x50] sm:$0xff] }
 0x294   : > { %v1430_v6 = vld [vmem:[#allocation2 + $0x1fe8] sm:$0xff] }
 0x295   : > { %3864 = vmatpush1.bf16.msra.mxu0 %v3863_v18  ;;  %v1396_v18 = vld [vmem:[#allocation2 + $0x1ed8] sm:$0xff] }
 0x296   : > { %4376 = vmatpush1.bf16.msra.mxu1 %v4375_v20  ;;  %3866 = vmatprep.subr.bf16.mxu0 %v3865_v22  ;;  %v1400_v20 = vld [vmem:[#allocation2 + $0x1ef8] sm:$0xff]  ;;  %v3883_v22 = vpack.c.bf16 %v1389_v12, %v1385_v11  ;;  %v4411_v11 = vpack.c.bf16 %v1423_v4, %v1419_v3  ;;  %v3901_v12 = vpack.c.bf16 %v1430_v6, %v1426_v5 }
 0x297   : > { %4378 = vmatprep.subr.bf16.mxu1 %v4377_v27  ;;  %v1397_v27 = vld [vmem:[#allocation2 + $0x1ee0] sm:$0xff]  ;;  %v4397_v28 = vpack.c.bf16 %v1400_v20, %v1396_v18  ;;  %v2714_v20 = vld [vmem:[#allocation7 + $0x88] sm:$0xff]  ;;  %v2703_v3 = vld [vmem:[#allocation7 + $0x30] sm:$0xff] }
 0x298   : > { %v2713_v18 = vld [vmem:[#allocation7 + $0x80] sm:$0xff]  ;;  %v2735_v6 = vld [vmem:[#allocation7 + $0x130] sm:$0xff] }
 0x299   : > { %3868 = vmatpush1.bf16.msra.mxu0 %v3867_v33  ;;  %v1404_v33 = vld [vmem:[#allocation2 + $0x1f18] sm:$0xff] }
 0x29a   : > { %4380 = vmatpush1.bf16.msra.mxu1 %v4379_v34  ;;  %3870 = vmatprep.subr.bf16.mxu0 %v3869_v36  ;;  %v1408_v34 = vld [vmem:[#allocation2 + $0x1f38] sm:$0xff]  ;;  %v3887_v36 = vpack.c.bf16 %v1397_v27, %v1393_v26  ;;  %v4415_v26 = vpack.c.bf16 %v1431_v17, %v1427_v15  ;;  %v4417_v27 = vpack.c.bf16 %v2714_v20, %v2713_v18  ;;  %v2705_v15 = vld [vmem:[#allocation7 + $0x40] sm:$0xff] }
 0x29b   : > { %4382 = vmatprep.subr.bf16.mxu1 %v4381_v35  ;;  %v1405_v35 = vld [vmem:[#allocation2 + $0x1f20] sm:$0xff]  ;;  %v4401_v63 = vpack.c.bf16 %v1408_v34, %v1404_v33  ;;  %v2715_v33 = vld [vmem:[#allocation7 + $0x90] sm:$0xff] }
 0x29c   : > { %v2716_v34 = vld [vmem:[#allocation7 + $0x98] sm:$0xff]  ;;  %v2737_v20 = vld [vmem:[#allocation7 + $0x140] sm:$0xff] }
 0x29d   : > { %3872 = vmatpush1.bf16.msra.mxu0 %v3871_v45  ;;  %v1412_v45 = vld [vmem:[#allocation2 + $0x1f58] sm:$0xff] }
 0x29e   : > { %4384 = vmatpush1.bf16.msra.mxu1 %v4383_v46  ;;  %3874 = vmatprep.subr.bf16.mxu0 %v3873_v47  ;;  %v1416_v46 = vld [vmem:[#allocation2 + $0x1f78] sm:$0xff]  ;;  %v3891_v47 = vpack.c.bf16 %v1405_v35, %v1401_v39 }
 0x29f   : > { %4386 = vmatprep.subr.bf16.mxu1 %v4385_v0  ;;  %v1413_v0 = vld [vmem:[#allocation2 + $0x1f60] sm:$0xff]  ;;  %v4405_v53 = vpack.c.bf16 %v1416_v46, %v1412_v45 }
 0x2a0   : > { %v2748_v39 = vld [vmem:[#allocation7 + $0x198] sm:$0xff] }
 0x2a1   : > { %3876 = vmatpush1.bf16.msra.mxu0 %v3875_v57  ;;  %v1420_v57 = vld [vmem:[#allocation2 + $0x1f98] sm:$0xff] }
 0x2a2   : > { %4388 = vmatpush1.bf16.msra.mxu1 %v4387_v58  ;;  %3878 = vmatprep.subr.bf16.mxu0 %v3877_v60  ;;  %v1424_v58 = vld [vmem:[#allocation2 + $0x1fb8] sm:$0xff]  ;;  %v3895_v60 = vpack.c.bf16 %v1413_v0, %v1409_v50 }
 0x2a3   : > { %4390 = vmatprep.subr.bf16.mxu1 %v4389_v2  ;;  %v1421_v2 = vld [vmem:[#allocation2 + $0x1fa0] sm:$0xff]  ;;  %v4409_v19 = vpack.c.bf16 %v1424_v58, %v1420_v57  ;;  %v2734_v57 = vld [vmem:[#allocation7 + $0x128] sm:$0xff] }
 0x2a4   : > { %v2732_v46 = vld [vmem:[#allocation7 + $0x118] sm:$0xff]  ;;  %v4459_v58 = vpack.c.bf16 %v2734_v57, %v2733_v55 }
 0x2a5   : > { %3880 = vmatpush1.bf16.msra.mxu0 %v3879_v7  ;;  %v1428_v7 = vld [vmem:[#allocation2 + $0x1fd8] sm:$0xff]  ;;  %v4455_v50 = vpack.c.bf16 %v2732_v46, %v2731_v44  ;;  %v2710_v44 = vld [vmem:[#allocation7 + $0x68] sm:$0xff] }
 0x2a6   : > { %4392 = vmatpush1.bf16.msra.mxu1 %v4391_v40  ;;  %3882 = vmatprep.subr.bf16.mxu0 %v3881_v10  ;;  %v1432_v40 = vld [vmem:[#allocation2 + $0x1ff8] sm:$0xff]  ;;  %v3899_v10 = vpack.c.bf16 %v1421_v2, %v1417_v1 }
 0x2a7   : > { %4394 = vmatprep.subr.bf16.mxu1 %v4393_v14  ;;  %v1429_v14 = vld [vmem:[#allocation2 + $0x1fe0] sm:$0xff]  ;;  %v4413_v16 = vpack.c.bf16 %v1432_v40, %v1428_v7 }
 0x2a8   : > { %v2752_v2 = vld [vmem:[#allocation7 + $0x1b8] sm:$0xff] }
 0x2a9   : > { %3884 = vmatpush1.bf16.msra.mxu0 %v3883_v22  ;;  %v2745_v22 = vld [vmem:[#allocation7 + $0x180] sm:$0xff]  ;;  %v2736_v7 = vld [vmem:[#allocation7 + $0x138] sm:$0xff] }
 0x2aa   : > { %4396 = vmatpush1.bf16.msra.mxu1 %v4395_v24  ;;  %3886 = vmatprep.subr.bf16.mxu0 %v3885_v25  ;;  %v2746_v24 = vld [vmem:[#allocation7 + $0x188] sm:$0xff]  ;;  %v3903_v25 = vpack.c.bf16 %v1429_v14, %v1425_v13  ;;  %v4463_v40 = vpack.c.bf16 %v2736_v7, %v2735_v6  ;;  %v2712_v55 = vld [vmem:[#allocation7 + $0x78] sm:$0xff] }
 0x2ab   : > { %4398 = vmatprep.subr.bf16.mxu1 %v4397_v28  ;;  %v2698_v28 = vld [vmem:[#allocation7 + $0x8] sm:$0xff]  ;;  %v4449_v31 = vpack.c.bf16 %v2746_v24, %v2745_v22 }
 0x2ac   : > { %v4419_v35 = vpack.c.bf16 %v2698_v28, %v2697_v51  ;;  %v2754_v14 = vld [vmem:[#allocation7 + $0x1c8] sm:$0xff]  ;;  %v2756_v28 = vld [vmem:[#allocation7 + $0x1d8] sm:$0xff] }
 0x2ad   : > { %3888 = vmatpush1.bf16.msra.mxu0 %v3887_v36  ;;  %v4667_v36 = vld [vmem:[%s5209_s4 + $0x8] sm:$0xff]  ;;  %s4842_s4 = scalar_lea.vmem %s4841_s22, 32 }
 0x2ae   : > { %4400 = vmatpush1.bf16.msra.mxu1 %v4399_v37  ;;  %3890 = vmatprep.subr.bf16.mxu0 %v3889_v38  ;;  %v1495_v37 = vrot.slane %v4667_v36, %v1462_v23  ;;  %v2747_v38 = vld [vmem:[#allocation7 + $0x190] sm:$0xff]  ;;  %v4423_v23 = vpack.c.bf16 %v2700_v42, %v2699_v43  ;;  %v2738_v22 = vld [vmem:[#allocation7 + $0x148] sm:$0xff]  ;;  %v2740_v36 = vld [vmem:[#allocation7 + $0x158] sm:$0xff]  ;;  %p4844_p0 = scmp.lt.s32.totalorder %s4842_s4, %s4836_s24 }
 0x2af   : > { %4402 = vmatprep.subr.bf16.mxu1 %v4401_v63  ;;  %v4421_v63 = vpack.c.bf16 %v2716_v34, %v2715_v33  ;;  %v4453_v45 = vpack.c.bf16 %v2748_v39, %v2747_v38  ;;  %v4467_v24 = vpack.c.bf16 %v2738_v22, %v2737_v20  ;;  %v2739_v34 = vld [vmem:[#allocation7 + $0x150] sm:$0xff]  ;;  %v2726_v39 = vld [vmem:[#allocation7 + $0xe8] sm:$0xff]  ;;  %v2709_v42 = vld [vmem:[#allocation7 + $0x60] sm:$0xff] }
 0x2b0   : > { %v4471_v38 = vpack.c.bf16 %v2740_v36, %v2739_v34  ;;  %v4443_v46 = vpack.c.bf16 %v2710_v44, %v2709_v42  ;;  %v2916_v20 = vld [vmem:[%s5416_s5] sm:$0xff]  ;;  %v2917_v22 = vld [vmem:[%s5416_s5 + $0x8] sm:$0xff]  ;;  %p4845_p1 = por %p4844_p0, %p4843_p13 }
 0x2b1   : > { %3892 = vmatpush1.bf16.msra.mxu0 %v3891_v47  ;;  %v2717_v47 = vld [vmem:[#allocation7 + $0xa0] sm:$0xff] }
 0x2b2   : > { %4404 = vmatpush1.bf16.msra.mxu1 %v4403_v48  ;;  %3894 = vmatprep.subr.bf16.mxu0 %v3893_v49  ;;  %v2718_v48 = vld [vmem:[#allocation7 + $0xa8] sm:$0xff]  ;;  %v2749_v49 = vld [vmem:[#allocation7 + $0x1a0] sm:$0xff]  ;;  %p4846_p6 = pnand %p4845_p1, %p4839_p11 }
 0x2b3   : > { %4406 = vmatprep.subr.bf16.mxu1 %v4405_v53  ;;  %v4425_v0 = vpack.c.bf16 %v2718_v48, %v2717_v47  ;;  %v4457_v52 = vpack.c.bf16 %v2750_v59, %v2749_v49  ;;  %v2701_v53 = vld [vmem:[#allocation7 + $0x20] sm:$0xff]  ;;  %v2742_v47 = vld [vmem:[#allocation7 + $0x168] sm:$0xff]  ;;  %v2727_v48 = vld [vmem:[#allocation7 + $0xf0] sm:$0xff] }
 0x2b4   : > { %v4427_v56 = vpack.c.bf16 %v2702_v54, %v2701_v53  ;;  %v2728_v49 = vld [vmem:[#allocation7 + $0xf8] sm:$0xff]  ;;  %v2711_v54 = vld [vmem:[#allocation7 + $0x70] sm:$0xff] }
 0x2b5   : > { %3896 = vmatpush1.bf16.msra.mxu0 %v3895_v60  ;;  %v2719_v60 = vld [vmem:[#allocation7 + $0xb0] sm:$0xff]  ;;  %v4447_v57 = vpack.c.bf16 %v2712_v55, %v2711_v54  ;;  %v2924_v44 = vld [vmem:[%s5416_s5 + $0x40] sm:$0xff] }
 0x2b6   : > { %4408 = vmatpush1.bf16.msra.mxu1 %v4407_v61  ;;  %3898 = vmatprep.subr.bf16.mxu0 %v3897_v62  ;;  %v2720_v61 = vld [vmem:[#allocation7 + $0xb8] sm:$0xff]  ;;  %v2751_v62 = vld [vmem:[#allocation7 + $0x1b0] sm:$0xff] }
 0x2b7   : > { %4410 = vmatprep.subr.bf16.mxu1 %v4409_v19  ;;  %v4429_v1 = vpack.c.bf16 %v2720_v61, %v2719_v60  ;;  %v2704_v19 = vld [vmem:[#allocation7 + $0x38] sm:$0xff]  ;;  %v4461_v4 = vpack.c.bf16 %v2752_v2, %v2751_v62  ;;  %v4927_v61 = vmov 0.0|0.0   ;;  %v2931_v54 = vld [vmem:[%s5416_s5 + $0x78] sm:$0xf] }
 0x2b8   : > { %v4431_v5 = vpack.c.bf16 %v2704_v19, %v2703_v3  ;;  %v1433_v62 = vld [vmem:[#allocation5] sm:$0xf] }
 0x2b9   : > { %3900 = vmatpush1.bf16.msra.mxu0 %v3899_v10  ;;  %v2721_v10 = vld [vmem:[#allocation7 + $0xc0] sm:$0xff]  ;;  %v1528_v2 = vrot.slane %v1433_v62, %v5230_v29  ;;  %v1524_v3 = vrot.slane %v1433_v62, %v5212_v8  ;;  %v1532_v19 = vrot.slane %v1433_v62, %v5223_v21 }
 0x2ba   : > { %4412 = vmatpush1.bf16.msra.mxu1 %v4411_v11  ;;  %3902 = vmatprep.subr.bf16.mxu0 %v3901_v12  ;;  %v2722_v11 = vld [vmem:[#allocation7 + $0xc8] sm:$0xff]  ;;  %v2753_v12 = vld [vmem:[#allocation7 + $0x1c0] sm:$0xff] }
 0x2bb   : > { %4414 = vmatprep.subr.bf16.mxu1 %v4413_v16  ;;  %v4433_v13 = vpack.c.bf16 %v2722_v11, %v2721_v10  ;;  %v2706_v16 = vld [vmem:[#allocation7 + $0x48] sm:$0xff]  ;;  %v4465_v17 = vpack.c.bf16 %v2754_v14, %v2753_v12 }
 0x2bc   : > { %v4435_v18 = vpack.c.bf16 %v2706_v16, %v2705_v15 }
 0x2bd   : > { %3904 = vmatpush1.bf16.msra.mxu0 %v3903_v25  ;;  %v2723_v25 = vld [vmem:[#allocation7 + $0xd0] sm:$0xff] }
 0x2be   : > { %4416 = vmatpush1.bf16.msra.mxu1 %v4415_v26  ;;  %4418 = vmatprep.subr.bf16.mxu0 %v4417_v27  ;;  %v2724_v26 = vld [vmem:[#allocation7 + $0xd8] sm:$0xff]  ;;  %v2755_v27 = vld [vmem:[#allocation7 + $0x1d0] sm:$0xff] }
 0x2bf   : > { %4450 = vmatprep.subr.bf16.mxu1 %v4449_v31  ;;  %v4437_v51 = vpack.c.bf16 %v2724_v26, %v2723_v25  ;;  %v2708_v31 = vld [vmem:[#allocation7 + $0x58] sm:$0xff]  ;;  %v4469_v32 = vpack.c.bf16 %v2756_v28, %v2755_v27 }
 0x2c0   : > { %2099 = vmatmul.mubr.f32.vlgmr.msra.gmra.mrb[0].mxu0 %v1495_v37  ;;  %v4439_v33 = vpack.c.bf16 %v2708_v31, %v2707_v30  ;;  %v4483_v30 = vpack.c.bf16 %v2917_v22, %v2916_v20  ;;  %v3019_v20 = vld [vmem:[#allocation11] sm:$0x1] }
 0x2c1   : > { %2667 = vmatmul.mubr.f32.vlgmr.msra.gmra.mrb[0].mxu1 %v1495_v37  ;;  %4420 = vmatpush3.bf16.msra.mxu0 %v4419_v35  ;;  %v2725_v37 = vld [vmem:[#allocation7 + $0xe0] sm:$0xff] }
 0x2c2   : > { %4452 = vmatpush3.bf16.msra.mxu1 %v4451_v41  ;;  %4422 = vmatprep.subr.bf16.mxu0 %v4421_v63  ;;  %v2757_v35 = vld [vmem:[#allocation7 + $0x1e0] sm:$0xff]  ;;  %v2758_v41 = vld [vmem:[#allocation7 + $0x1e8] sm:$0xff]  ;;  %v4441_v63 = vpack.c.bf16 %v2726_v39, %v2725_v37 }
 0x2c3   : > { %4454 = vmatprep.subr.bf16.mxu1 %v4453_v45  ;;  %v4473_v43 = vpack.c.bf16 %v2758_v41, %v2757_v35  ;;  %v2741_v45 = vld [vmem:[#allocation7 + $0x160] sm:$0xff] }
 0x2c4   : > { %v4475_v59 = vpack.c.bf16 %v2742_v47, %v2741_v45  ;;  %v2920_v39 = vld [vmem:[%s5416_s5 + $0x20] sm:$0xff]  ;;  %v2921_v35 = vld [vmem:[%s5416_s5 + $0x28] sm:$0xff]  ;;  %v2926_v47 = vld [vmem:[%s5416_s5 + $0x50] sm:$0xff] }
 0x2c5   : > { %4424 = vmatpush3.bf16.msra.mxu0 %v4423_v23  ;;  %v4445_v23 = vpack.c.bf16 %v2728_v49, %v2727_v48  ;;  %v4489_v41 = vpack.c.bf16 %v2921_v35, %v2920_v39  ;;  %v2925_v45 = vld [vmem:[%s5416_s5 + $0x48] sm:$0xff]  ;;  %v2927_v48 = vld [vmem:[%s5416_s5 + $0x58] sm:$0xff] }
 0x2c6   : > { %4456 = vmatpush3.bf16.msra.mxu1 %v4455_v50  ;;  %4426 = vmatprep.subr.bf16.mxu0 %v4425_v0  ;;  %v2759_v50 = vld [vmem:[#allocation7 + $0x1f0] sm:$0xff]  ;;  %v2760_v0 = vld [vmem:[#allocation7 + $0x1f8] sm:$0xf]  ;;  %v4498_v49 = vpack.c.bf16 %v2927_v48, %v2926_v47 }
 0x2c7   : > { %4458 = vmatprep.subr.bf16.mxu1 %v4457_v52  ;;  %v4477_v53 = vpack.c.bf16 %v2760_v0, %v2759_v50  ;;  %v4929_v50 = vmov 0.0   ;;  %v3015_v52 = vld [vmem:[%s5418_s7] sm:$0xff] }
 0x2c9   : > { %4428 = vmatpush3.bf16.msra.mxu0 %v4427_v56  ;;  %v2743_v56 = vld [vmem:[#allocation7 + $0x170] sm:$0xff] }
 0x2ca   : > { %4460 = vmatpush3.bf16.msra.mxu1 %v4459_v58  ;;  %4430 = vmatprep.subr.bf16.mxu0 %v4429_v1  ;;  %v2744_v58 = vld [vmem:[#allocation7 + $0x178] sm:$0xff]  ;;  %v1520_v1 = vrot.slane %v1433_v62, %v5220_v9 }
 0x2cb   : > { %4462 = vmatprep.subr.bf16.mxu1 %v4461_v4  ;;  %v4480_v60 = vpack.c.bf16 %v2744_v58, %v2743_v56  ;;  %v2761_v58 = vld [vmem:[#allocation8] sm:$0x1] }
 0x2cd   : > { %4432 = vmatpush3.bf16.msra.mxu0 %v4431_v5 }
 0x2ce   : > { %4464 = vmatpush3.bf16.msra.mxu1 %v4463_v40  ;;  %4434 = vmatprep.subr.bf16.mxu0 %v4433_v13 }
 0x2cf   : > { %4466 = vmatprep.subr.bf16.mxu1 %v4465_v17 }
 0x2d1   : > { %4436 = vmatpush3.bf16.msra.mxu0 %v4435_v18 }
 0x2d2   : > { %4468 = vmatpush3.bf16.msra.mxu1 %v4467_v24  ;;  %4438 = vmatprep.subr.bf16.mxu0 %v4437_v51 }
 0x2d3   : > { %4470 = vmatprep.subr.bf16.mxu1 %v4469_v32  ;;  %v2918_v32 = vld [vmem:[%s5416_s5 + $0x10] sm:$0xff] }
 0x2d5   : > { %4440 = vmatpush3.bf16.msra.mxu0 %v4439_v33  ;;  %v2919_v33 = vld [vmem:[%s5416_s5 + $0x18] sm:$0xff] }
 0x2d6   : > { %4472 = vmatpush3.bf16.msra.mxu1 %v4471_v38  ;;  %4442 = vmatprep.subr.bf16.mxu0 %v4441_v63  ;;  %v4486_v38 = vpack.c.bf16 %v2919_v33, %v2918_v32  ;;  %v2922_v63 = vld [vmem:[%s5416_s5 + $0x30] sm:$0xff] }
 0x2d7   : > { %4474 = vmatprep.subr.bf16.mxu1 %v4473_v43  ;;  %v2923_v43 = vld [vmem:[%s5416_s5 + $0x38] sm:$0xff] }
 0x2d8   : > { %v4492_v42 = vpack.c.bf16 %v2923_v43, %v2922_v63 }
 0x2d9   : > { %4444 = vmatpush3.bf16.msra.mxu0 %v4443_v46  ;;  %v4495_v46 = vpack.c.bf16 %v2925_v45, %v2924_v44 }
 0x2da   : > { %4476 = vmatpush3.bf16.msra.mxu1 %v4475_v59  ;;  %4446 = vmatprep.subr.bf16.mxu0 %v4445_v23  ;;  %v2928_v59 = vld [vmem:[%s5416_s5 + $0x60] sm:$0xff]  ;;  %v2929_v23 = vld [vmem:[%s5416_s5 + $0x68] sm:$0xff] }
 0x2db   : > { %4479 = vmatprep.subr.msk.bf16.mxu1 %vm5280_vm2, %v4477_v53  ;;  %v4501_v0 = vpack.c.bf16 %v2929_v23, %v2928_v59  ;;  %v2930_v53 = vld [vmem:[%s5416_s5 + $0x70] sm:$0xff] }
 0x2dc   : > { %v4504_v55 = vpack.c.bf16 %v2931_v54, %v2930_v53 }
 0x2dd   : > { %4448 = vmatpush3.bf16.msra.mxu0 %v4447_v57 }
 0x2de   : > { %4481 = vmatpush3.bf16.msra.mxu1 %v4480_v60  ;;  %4482 = vmatprep.subr.bf16.mxu0 %v4927_v61 }
 0x2df   : > { %4507 = vmatprep.subr.bf16.mxu1 %v4927_v61 }
 0x393   : > { %v2100_v4 = vpop.f32.mrb[0].mxu0 }
 0x394   : > { %v4513_v5 = vadd.f32 %v2100_v4, %v1520_v1  ;;  %v2668_v6 = vpop.f32.mrb[0].mxu1  ;;  %v2102_v7 = vpop.f32.mrb[1].mxu0 }
 0x395   : > { %v4515_v40 = vadd.f32 %v2668_v6, %v1528_v2  ;;  %v4514_v10 = vadd.f32 %v2102_v7, %v1524_v3  ;;  %v2670_v11 = vpop.f32.mrb[1].mxu1 }
 0x396   : > { %v2677_v12 = vmin.f32 %v4513_v5, 0.0  ;;  %v4516_v13 = vadd.f32 %v2670_v11, %v1532_v19  ;;  %vm2673_vm5 = vcmp.gt.f32.partialorder %v4513_v5, 0.0 }
 0x397   : > { %v2679_v14 = vmin.f32 %v4515_v40, 0.0  ;;  %v2678_v15 = vmin.f32 %v4514_v10, 0.0  ;;  %vm2674_vm3 = vcmp.gt.f32.partialorder %v4514_v10, 0.0  ;;  %vm2675_vm7 = vcmp.gt.f32.partialorder %v4515_v40, 0.0 }
 0x398   : > { %v2681_v16 = vmul.f32 1.442695, %v2677_v12  ;;  %v2680_v17 = vmin.f32 %v4516_v13, 0.0  ;;  %vm2676_vm6 = vcmp.gt.f32.partialorder %v4516_v13, 0.0  ;;  %v3017_v12 = vld [vmem:[%s5418_s7 + $0x10] sm:$0xff] }
 0x399   : > { %v2685_v9 = vmul.f32 1.442695, %v2679_v14  ;;  %v2683_v18 = vmul.f32 1.442695, %v2678_v15  ;;  %v2932_v15 = vld [vmem:[#allocation10] sm:$0x1] }
 0x39a   : > { %4653 = vpow2.f32 %v2681_v16  ;;  %v2687_v29 = vmul.f32 1.442695, %v2680_v17 }
 0x39b   : > { %4655 = vpow2.f32 %v2685_v9 }
 0x39c   : > { %4657 = vpow2.f32 %v2683_v18 }
 0x39d   : > { %4659 = vpow2.f32 %v2687_v29 }
 0x3a4   : > { %v4654_v8 = vpop.eup %4653 }
 0x3a5   : > { %v4656_v21 = vpop.eup %4655  ;;  %v3241_v25 = vadd.f32 -1.0, %v4654_v8 }
 0x3a6   : > { %v4658_v24 = vpop.eup %4657  ;;  %v3243_v51 = vadd.f32 -1.0, %v4656_v21 }
 0x3a7   : > { %v4660_v26 = vpop.eup %4659  ;;  %v3242_v27 = vadd.f32 -1.0, %v4658_v24  ;;  %v2693_v36 = vsel %vm2673_vm5, %v4513_v5, %v3241_v25 }
 0x3a8   : > { %v3244_v28 = vadd.f32 -1.0, %v4660_v26  ;;  %v2695_v37 = vsel %vm2675_vm7, %v4515_v40, %v3243_v51 }
 0x3a9   : > { %v2694_v31 = vsel %vm2674_vm3, %v4514_v10, %v3242_v27  ;;  %v3016_v10 = vld [vmem:[%s5418_s7 + $0x8] sm:$0xff] }
 0x3aa   : > { %2834 = vmatprep.mubr.f32.mxu0 %v2694_v31  ;;  %v2696_v34 = vsel %vm2676_vm6, %v4516_v13, %v3244_v28  ;;  %v4508_v11 = vpack.c.bf16 %v3016_v10, %v3015_v52  ;;  %v3018_v13 = vld [vmem:[%s5418_s7 + $0x18] sm:$0xff] }
 0x3ab   : > { %3246 = vmatprep.mubr.msk.f32.mxu1 %vm2762_vm4, %v2696_v34  ;;  %2835 = vmatmul.mubr.f32.vlgmr.msra.gmra.mrb[2].mxu0 %v2693_v36  ;;  %v4511_v14 = vpack.c.bf16 %v3018_v13, %v3017_v12 }
 0x3ac   : > { %2905 = vmatmul.mubr.f32.vlgmr.msra.gmra.mrb[2].mxu1 %v2695_v37  ;;  %4484 = vmatpush3.bf16.msra.mxu0 %v4483_v30 }
 0x3ad   : > { %4485 = vmatprep.subr.bf16.mxu0 %v4927_v61  ;;  %3379 = vmatprep.mubr.msk.f32.mxu0 %vm4928_vm8, %v4929_v50 }
 0x3ae   : > { %3390 = vmatprep.mubr.msk.f32.mxu1 %vm4928_vm8, %v4929_v50  ;;  %4509 = vmatpush3.bf16.msra.mxu1 %v4508_v11 }
 0x3af   : > { %4510 = vmatprep.subr.bf16.mxu1 %v4927_v61 }
 0x3b0   : > { %4487 = vmatpush3.bf16.msra.mxu0 %v4486_v38 }
 0x3b1   : > { %4488 = vmatprep.subr.bf16.mxu0 %v4927_v61 }
 0x3b2   : > { %4512 = vmatpush3.bf16.msra.mxu1 %v4511_v14 }
 0x3b4   : > { %4490 = vmatpush3.bf16.msra.mxu0 %v4489_v41 }
 0x3b5   : > { %4491 = vmatprep.subr.bf16.mxu0 %v4927_v61 }
 0x3b8   : > { %4493 = vmatpush3.bf16.msra.mxu0 %v4492_v42 }
 0x3b9   : > { %4494 = vmatprep.subr.bf16.mxu0 %v4927_v61 }
 0x3bc   : > { %4496 = vmatpush3.bf16.msra.mxu0 %v4495_v46 }
 0x3bd   : > { %4497 = vmatprep.subr.bf16.mxu0 %v4927_v61 }
 0x3c0   : > { %4499 = vmatpush3.bf16.msra.mxu0 %v4498_v49 }
 0x3c1   : > { %4500 = vmatprep.subr.bf16.mxu0 %v4927_v61 }
 0x3c4   : > { %4502 = vmatpush3.bf16.msra.mxu0 %v4501_v0 }
 0x3c5   : > { %4503 = vmatprep.subr.bf16.mxu0 %v4927_v61 }
 0x3c8   : > { %4506 = vmatpush3.bf16.msk.msra.mxu0 %vm5280_vm2, %v4504_v55 }
 0x47e   : > { %v3287_v56 = vpop.f32.mrb[2].mxu0 }
 0x47f   : > { %v3322_v57 = vpop.f32.mrb[2].mxu1  ;;  %v3288_v60 = vpop.f32.mrb[3].mxu0 }
 0x480   : > { %v3289_v62 = vadd.f32 %v3288_v60, %v3287_v56  ;;  %v3323_v1 = vpop.f32.mrb[3].mxu1 }
 0x481   : > { %v3324_v2 = vadd.f32 %v3323_v1, %v3322_v57 }
 0x482   : > { %v2837_v3 = vadd.f32 %v3289_v62, %v2761_v58 }
 0x484   : > { %v2907_v19 = vadd.f32 %v3324_v2, %v2837_v3 }
 0x486   : > { %v2911_v4 = vmin.f32 %v2907_v19, 0.0  ;;  %vm2910_vm9 = vcmp.gt.f32.partialorder %v2907_v19, 0.0 }
 0x488   : > { %v2912_v5 = vmul.f32 1.442695, %v2911_v4 }
 0x48a   : > { %4661 = vpow2.f32 %v2912_v5 }
 0x494   : > { %v4662_v6 = vpop.eup %4661 }
 0x495   : > { %v3247_v7 = vadd.f32 -1.0, %v4662_v6 }
 0x497   : > { %v2915_v40 = vsel %vm2910_vm9, %v2907_v19, %v3247_v7 }
 0x498   : > { %3380 = vmatmul.mubr.msk.f32.vlgmr.msra.gmra.mrb[4].mxu0 %vm2762_vm4, %v2915_v40 }
 0x56b   : > { %v3005_v16 = vpop.f32.mrb[4].mxu0 }
 0x56c   : > { %v3006_v17 = vadd.f32 %v3005_v16, %v2932_v15  ;;  %v3381_v9 = vpop.f32.mrb[5].mxu0 }
 0x56e   : > { %v3010_v18 = vmin.f32 %v3006_v17, 0.0  ;;  %vm3009_vm11 = vcmp.gt.f32.partialorder %v3006_v17, 0.0 }
 0x570   : > { %v3011_v29 = vmul.f32 1.442695, %v3010_v18 }
 0x572   : > { %4663 = vpow2.f32 %v3011_v29 }
 0x57c   : > { %v4664_v61 = vpop.eup %4663 }
 0x57d   : > { %v3250_v8 = vadd.f32 -1.0, %v4664_v61 }
 0x57f   : > { %v3014_v21 = vsel %vm3009_vm11, %v3006_v17, %v3250_v8 }
 0x580   : > { %3391 = vmatmul.mubr.msk.f32.vlgmr.msra.gmra.mrb[4].mxu1 %vm3020_vm10, %v3014_v21 }
 0x653   : > { %v3090_v22 = vpop.f32.mrb[4].mxu1 }
 0x654   : > { %v3091_v24 = vadd.f32 %v3090_v22, %v3019_v20  ;;  %v3392_v25 = vpop.f32.mrb[5].mxu1 }
 0x656   : > { %3095 = vst.msk [vmem:[%s402_s17] sm:$0x1] %vm3094_vm12, %v3091_v24 }
 0x657   : > { %4849 = shalt.err (!%p4846_p6)
}
 0x658   : > { %s4850_s14 = scalar_lea.hbm %s5369_s21, 16  ;;  %s4854_s29 = scalar_lea.hbm %s5420_s9, 32 }
 0x659   : > { %p4851_p5 = scmp.ne.s32.totalorder %s5369_s21, %s4850_s14  ;;  %p4855_p10 = scmp.lt.u32.totalorder %s5369_s21, %s5420_s9 }
 0x65a   : > { %p4856_p2 = scmp.lt.u32.totalorder %s4854_s29, %s4850_s14  ;;  %p4858_p4 = scmp.lt.u32.totalorder %s4850_s14, %s5369_s21 }
 0x65b   : > { %p4852_p9 = pnand %p4851_p5, %p5450_p7 }
 0x65c   : > { %p4857_p3 = por %p4856_p2, %p4855_p10 }
 0x65d   : > { %p4853_p12 = pneg %p4852_p9 }
 0x65e   : > { %p4859_p8 = por %p4858_p4, %p4857_p3 }
 0x660   : > { %p4860_p11 = pnand %p4859_p8, %p4853_p12 }
 0x662   : > { %4863 = shalt.err (!%p4860_p11)
}
 0x663   : > { %4569 = dma.vmem_to_hbm [thread:$0]  (%p5450_p7), %s5371_s16, 16, %s5369_s21, %s3097_s26  }
 0x664 PF: > { %p4606_p13 = scmp.ge.s32.totalorder %s4914_s12, 2  ;;  %s3121_s28 = sand.u32 1, %s4902_s30  }
 0x665   : > { %p5451_p0 = scmp.ne.s32.totalorder %s5433_s20, 0  ;;  %s3122_s2 = scalar_lea.sflag [#allocation4], %s3121_s28 }
 0x667   : > { %p4591_p1 = pnand %p4606_p13, %p5451_p0 }
 0x669   : > { %4897 = dma.done.wait (!%p4591_p1), %s3122_s2, 16  }
 0x66a   : > { %4899 = vsyncadd (!%p4591_p1), %s3122_s2, 4294967280  ;;  %s5452_s12 = sld [smem:[#allocation20_spill]]  ;;  %s5453_s17 = sld [smem:[#allocation19_spill]] }
 0x66b   : > { %s5454_s11 = sld [smem:[#allocation21_spill]]  ;;  %s5455_s30 = smov %s4906_s10 }
 0x670   : > { %p23_p6 = scmp.ge.s32.totalorder %s5452_s12, 4   ;;  %s5456_s10 = smov %s5453_s17 }
 0x672   :  { %25 = sbr.rel (!%p23_p6) target bundleno = 10 (0xa), region = 116 }
 0x679   :  { %3126 = vsyncpa [#allocation3], 1 }
 0x67a   :  { %3128 = vsyncpa [#allocation3 + $0x1], 1 }
 0x67b   :  { %3129 = vsyncpa [#allocation6], 1 }
 0x67c   :  { %3130 = vsyncpa [#allocation9], 1 }
 0x67d   :  { %3131 = vsyncpa [#allocation12], 1 }
 0x67e   :  { %3132 = vsyncpa [#allocation4], 1 }
 0x67f   :  { %3134 = vsyncpa [#allocation4 + $0x1], 1 }

</bundles_post_ra>
